<compile_context>
chip_gen: v7x
topology: tpu7x:2x2x1
jax: 0.10.0
libtpu: 0.0.40
codegen_flags: <defaults>
</compile_context>

<pallas_src>
import jax
import jax.numpy as jnp
import numpy as np
from jax import lax
from jax.experimental import pallas as pl
from jax.experimental.pallas import tpu as pltpu


def _svdpp_kernel(rated_ref,            # (L, TB)  int32   rated-movie ids (transposed)
                  pu_ref, qm_ref,       # (E, TB)  f32     P[users]^T, Q[movies]^T
                  side_ref,             # (8, TB)  f32     [ku, km, 1/sqrtn, bias, 0...]
                  yt_ref,               # (E, NR)  f32     Y^T, resident in VMEM
                  out_ref):             # (1, TB)  f32     lane-dense result row
    L, TB = rated_ref.shape
    NR = yt_ref.shape[1]

    # ---- count matrix S^T: S^T[n, b] = #{ l : rated[b, l] == n } -------------
    # L broadcasted compares of shape (NR, TB); cheap VPU work, no scalar loads.
    iota = lax.broadcasted_iota(jnp.int32, (NR, TB), 0)
    s_t = jnp.zeros((NR, TB), jnp.float32)
    for l in range(L):                                   # static, small trip count
        row = rated_ref[pl.ds(l, 1), :]                  # (1, TB) int32
        s_t = s_t + (iota == row).astype(jnp.float32)

    # ---- ysum^T = Y^T @ S^T : one MXU matmul per batch tile -------------------
    # (For very large item tables a row-gather formulation is cheaper; the
    #  matmul is the right choice while Y fits comfortably in VMEM.)
    ysum = jnp.dot(yt_ref[...], s_t,
                   preferred_element_type=jnp.float32,
                   precision=jax.lax.Precision.HIGHEST)  # (E, TB)

    # ---- epilogue, fully batched over the (E, TB) tile ------------------------
    ku = side_ref[0:1, :]                                # (1, TB)
    km = side_ref[1:2, :]
    isn = side_ref[2:3, :]                               # 1 / sqrt(n)
    bias = side_ref[3:4, :]                              # ku*Bu + km*Bi + global_mean

    p = ku * pu_ref[...]                                 # (E, TB)
    q = km * qm_ref[...]                                 # (E, TB)
    y = (ku * isn) * ysum                                # (E, TB)
    dot = jnp.sum(q * (p + y), axis=0, keepdims=True)    # (1, TB) sublane reduce
    out_ref[...] = (dot + bias).astype(out_ref.dtype)


def svdpp_forward(params, data, *, global_mean, tb=128):
    users = jnp.asarray(data["user"], jnp.int32).reshape(-1)                       # (B,)
    movies = jnp.asarray(data["movie"], jnp.int32).reshape(-1)                     # (B,)
    rated = jnp.asarray(data["movies_rated_by_this_user"], jnp.int32)              # (B, L)
    sqrtn = jnp.asarray(data["sqrt_of_number_of_movies_rated_by_this_user"],
                        jnp.float32).reshape(-1)                                   # (B,)
    ku = jnp.asarray(data["is_known_user"], jnp.float32).reshape(-1)               # (B,)
    km = jnp.asarray(data["is_known_movie"], jnp.float32).reshape(-1)              # (B,)

    B, L = rated.shape
    E = params["P"].shape[1]
    NR = params["Y"].shape[0]
    NR_pad = ((NR + 127) // 128) * 128                 # MXU-friendly contraction dim
    TB = tb                                            # batch tile = lane width multiple
    B_pad = ((B + TB - 1) // TB) * TB
    G = B_pad // TB

    P = params["P"].astype(jnp.float32)
    Q = params["Q"].astype(jnp.float32)
    Y = params["Y"].astype(jnp.float32)

    # Feature-major (transposed) layouts: E on sublanes, batch / item-id on lanes.
    y_t = jnp.pad(Y, ((0, NR_pad - NR), (0, 0))).T                 # (E, NR_pad)
    pu_t = jnp.take(P, users, axis=0).T                            # (E, B)
    qm_t = jnp.take(Q, movies, axis=0).T                           # (E, B)
    bu = jnp.take(params["Bu"].astype(jnp.float32)[:, 0], users)   # (B,)
    bi = jnp.take(params["Bi"].astype(jnp.float32)[:, 0], movies)  # (B,)

    # Pack all per-sample scalars into ONE small lane-major array.
    bias = ku * bu + km * bi + jnp.float32(global_mean)
    inv_sqrtn = 1.0 / sqrtn
    side = jnp.zeros((8, B), jnp.float32)
    side = side.at[0].set(ku).at[1].set(km).at[2].set(inv_sqrtn).at[3].set(bias)

    def pad_lanes(t):
        return t if B_pad == B else jnp.pad(t, ((0, 0), (0, B_pad - B)))

    rated_t = pad_lanes(rated.T)          # padded columns: ku=km=0 -> output 0, sliced off
    pu_t = pad_lanes(pu_t)
    qm_t = pad_lanes(qm_t)
    side = pad_lanes(side)

    lane_map = lambda i: (0, i)           # batch-tiled (lane axis) operands
    const_map = lambda i: (0, 0)          # constant index -> Y^T copied to VMEM once

    out = pl.pallas_call(
        _svdpp_kernel,
        out_shape=jax.ShapeDtypeStruct((1, B_pad), jnp.float32),
        grid_spec=pltpu.PrefetchScalarGridSpec(
            num_scalar_prefetch=0,
            grid=(G,),
            in_specs=[
                pl.BlockSpec((L, TB), lane_map),          # rated^T (int32)
                pl.BlockSpec((E, TB), lane_map),          # P[users]^T
                pl.BlockSpec((E, TB), lane_map),          # Q[movies]^T
                pl.BlockSpec((8, TB), lane_map),          # packed side scalars
                pl.BlockSpec((E, NR_pad), const_map),     # Y^T (resident)
            ],
            out_specs=pl.BlockSpec((1, TB), lane_map),
        ),
        compiler_params=pltpu.CompilerParams(
            dimension_semantics=("parallel",),            # megacore split on v7x when G>1
            vmem_limit_bytes=32 * 1024 * 1024,            # raise for production-size Y
        ),
    )(rated_t, pu_t, qm_t, side, y_t)

    return out[0, :B]


def svdpp_reference(params, data, *, global_mean):
    users = jnp.asarray(data["user"], jnp.int32)
    movies = jnp.asarray(data["movie"], jnp.int32)
    rated = jnp.asarray(data["movies_rated_by_this_user"], jnp.int32)
    sqrtn = jnp.asarray(data["sqrt_of_number_of_movies_rated_by_this_user"], jnp.float32)
    ku = jnp.asarray(data["is_known_user"], jnp.float32)
    km = jnp.asarray(data["is_known_movie"], jnp.float32)

    bu = ku * params["Bu"][users, 0]
    bi = km * params["Bi"][movies, 0]
    p = ku[:, None] * params["P"][users]
    q = km[:, None] * params["Q"][movies]
    y = ku[:, None] * (params["Y"][rated].sum(axis=1) / sqrtn[:, None])
    return (q * (p + y)).sum(axis=1) + bi + bu + global_mean


if __name__ == "__main__":
    num_users, num_movies = 50, 40
    embedding_size = 200
    B, L = 8, 16
    mean_init, std_init = 0.2, 0.001
    global_mean = 3.5  # stand-in for np.mean(train_labels)

    k = jax.random.split(jax.random.PRNGKey(0), 10)
    params = {
        "Bu": mean_init + std_init * jax.random.normal(k[0], (num_users, 1), jnp.float32),
        "Bi": mean_init + std_init * jax.random.normal(k[1], (num_movies, 1), jnp.float32),
        "P":  mean_init + std_init * jax.random.normal(k[2], (num_users, embedding_size), jnp.float32),
        "Q":  mean_init + std_init * jax.random.normal(k[3], (num_movies, embedding_size), jnp.float32),
        "Y":  mean_init + std_init * jax.random.normal(k[4], (num_movies + 1, embedding_size), jnp.float32),
    }

    users = jax.random.randint(k[5], (B,), 0, num_users)
    movies = jax.random.randint(k[6], (B,), 0, num_movies)
    rated = jax.random.randint(k[7], (B, L), 0, num_movies + 1)  # index 0 = padding row
    counts = jnp.sum(rated > 0, axis=1).astype(jnp.float32)
    sqrtn = jnp.sqrt(jnp.maximum(counts, 1.0))
    is_known_user = (jax.random.uniform(k[8], (B,)) > 0.25).astype(jnp.float32)
    is_known_movie = (jax.random.uniform(k[9], (B,)) > 0.25).astype(jnp.float32)

    data = {
        "user": users,
        "movie": movies,
        "movies_rated_by_this_user": rated,
        "sqrt_of_number_of_movies_rated_by_this_user": sqrtn,
        "is_known_user": is_known_user,
        "is_known_movie": is_known_movie,
        # 'users_who_rated_this_movie' / 'sqrt_of_number_of_users_who_rated_this_movie'
        # are unpacked but never used in the PyTorch forward, so they are omitted.
    }

    out = jax.block_until_ready(svdpp_forward(params, data, global_mean=global_mean))
    ref = svdpp_reference(params, data, global_mean=global_mean)
    np.testing.assert_allclose(np.asarray(out), np.asarray(ref), rtol=1e-4, atol=1e-3)
    print("KERNEL_OK")
</pallas_src>

<mosaic_0001>
module attributes {stable_mosaic.version = 11 : i64} {
  func.func @_svdpp_kernel(%arg0: i32, %arg1: memref<16x128xi32, #tpu.memory_space<vmem>>, %arg2: memref<200x128xf32, #tpu.memory_space<vmem>>, %arg3: memref<200x128xf32, #tpu.memory_space<vmem>>, %arg4: memref<8x128xf32, #tpu.memory_space<vmem>>, %arg5: memref<200x128xf32, #tpu.memory_space<vmem>>, %arg6: memref<1x128xf32, #tpu.memory_space<vmem>>) attributes {dimension_semantics = [#tpu.dimension_semantics<parallel>], iteration_bounds = array<i64: 1>, scalar_prefetch = 0 : i64, scratch_operands = 0 : i64, tpu.core_type = #tpu.core_type<tc>, window_params = [{transform_indices = @transform_0, window_bounds = array<i64: 16, 128>}, {transform_indices = @transform_1, window_bounds = array<i64: 200, 128>}, {transform_indices = @transform_2, window_bounds = array<i64: 200, 128>}, {transform_indices = @transform_3, window_bounds = array<i64: 8, 128>}, {pipeline_mode = #tpu.pipeline_mode<synchronous>, transform_indices = @transform_4, window_bounds = array<i64: 200, 128>}, {transform_indices = @transform_5, window_bounds = array<i64: 1, 128>}]} {
    %0 = tpu.iota {dimensions = array<i32: 0>} : vector<128x128xi32>
    %cst = arith.constant 0.000000e+00 : f32
    %1 = vector.broadcast %cst : f32 to vector<128x128xf32>
    %c0 = arith.constant 0 : index
    %c0_0 = arith.constant 0 : index
    %2 = vector.load %arg1[%c0, %c0_0] : memref<16x128xi32, #tpu.memory_space<vmem>>, vector<1x128xi32>
    %3 = vector.broadcast %2 : vector<1x128xi32> to vector<128x128xi32>
    %4 = arith.cmpi eq, %0, %3 : vector<128x128xi32>
    %5 = arith.extui %4 : vector<128x128xi1> to vector<128x128xi32>
    %6 = arith.sitofp %5 : vector<128x128xi32> to vector<128x128xf32>
    %7 = arith.addf %1, %6 : vector<128x128xf32>
    %c1 = arith.constant 1 : index
    %c0_1 = arith.constant 0 : index
    %8 = vector.load %arg1[%c1, %c0_1] : memref<16x128xi32, #tpu.memory_space<vmem>>, vector<1x128xi32>
    %9 = vector.broadcast %8 : vector<1x128xi32> to vector<128x128xi32>
    %10 = arith.cmpi eq, %0, %9 : vector<128x128xi32>
    %11 = arith.extui %10 : vector<128x128xi1> to vector<128x128xi32>
    %12 = arith.sitofp %11 : vector<128x128xi32> to vector<128x128xf32>
    %13 = arith.addf %7, %12 : vector<128x128xf32>
    %c2 = arith.constant 2 : index
    %c0_2 = arith.constant 0 : index
    %14 = vector.load %arg1[%c2, %c0_2] : memref<16x128xi32, #tpu.memory_space<vmem>>, vector<1x128xi32>
    %15 = vector.broadcast %14 : vector<1x128xi32> to vector<128x128xi32>
    %16 = arith.cmpi eq, %0, %15 : vector<128x128xi32>
    %17 = arith.extui %16 : vector<128x128xi1> to vector<128x128xi32>
    %18 = arith.sitofp %17 : vector<128x128xi32> to vector<128x128xf32>
    %19 = arith.addf %13, %18 : vector<128x128xf32>
    %c3 = arith.constant 3 : index
    %c0_3 = arith.constant 0 : index
    %20 = vector.load %arg1[%c3, %c0_3] : memref<16x128xi32, #tpu.memory_space<vmem>>, vector<1x128xi32>
    %21 = vector.broadcast %20 : vector<1x128xi32> to vector<128x128xi32>
    %22 = arith.cmpi eq, %0, %21 : vector<128x128xi32>
    %23 = arith.extui %22 : vector<128x128xi1> to vector<128x128xi32>
    %24 = arith.sitofp %23 : vector<128x128xi32> to vector<128x128xf32>
    %25 = arith.addf %19, %24 : vector<128x128xf32>
    %c4 = arith.constant 4 : index
    %c0_4 = arith.constant 0 : index
    %26 = vector.load %arg1[%c4, %c0_4] : memref<16x128xi32, #tpu.memory_space<vmem>>, vector<1x128xi32>
    %27 = vector.broadcast %26 : vector<1x128xi32> to vector<128x128xi32>
    %28 = arith.cmpi eq, %0, %27 : vector<128x128xi32>
    %29 = arith.extui %28 : vector<128x128xi1> to vector<128x128xi32>
    %30 = arith.sitofp %29 : vector<128x128xi32> to vector<128x128xf32>
    %31 = arith.addf %25, %30 : vector<128x128xf32>
    %c5 = arith.constant 5 : index
    %c0_5 = arith.constant 0 : index
    %32 = vector.load %arg1[%c5, %c0_5] : memref<16x128xi32, #tpu.memory_space<vmem>>, vector<1x128xi32>
    %33 = vector.broadcast %32 : vector<1x128xi32> to vector<128x128xi32>
    %34 = arith.cmpi eq, %0, %33 : vector<128x128xi32>
    %35 = arith.extui %34 : vector<128x128xi1> to vector<128x128xi32>
    %36 = arith.sitofp %35 : vector<128x128xi32> to vector<128x128xf32>
    %37 = arith.addf %31, %36 : vector<128x128xf32>
    %c6 = arith.constant 6 : index
    %c0_6 = arith.constant 0 : index
    %38 = vector.load %arg1[%c6, %c0_6] : memref<16x128xi32, #tpu.memory_space<vmem>>, vector<1x128xi32>
    %39 = vector.broadcast %38 : vector<1x128xi32> to vector<128x128xi32>
    %40 = arith.cmpi eq, %0, %39 : vector<128x128xi32>
    %41 = arith.extui %40 : vector<128x128xi1> to vector<128x128xi32>
    %42 = arith.sitofp %41 : vector<128x128xi32> to vector<128x128xf32>
    %43 = arith.addf %37, %42 : vector<128x128xf32>
    %c7 = arith.constant 7 : index
    %c0_7 = arith.constant 0 : index
    %44 = vector.load %arg1[%c7, %c0_7] : memref<16x128xi32, #tpu.memory_space<vmem>>, vector<1x128xi32>
    %45 = vector.broadcast %44 : vector<1x128xi32> to vector<128x128xi32>
    %46 = arith.cmpi eq, %0, %45 : vector<128x128xi32>
    %47 = arith.extui %46 : vector<128x128xi1> to vector<128x128xi32>
    %48 = arith.sitofp %47 : vector<128x128xi32> to vector<128x128xf32>
    %49 = arith.addf %43, %48 : vector<128x128xf32>
    %c8 = arith.constant 8 : index
    %c0_8 = arith.constant 0 : index
    %50 = vector.load %arg1[%c8, %c0_8] : memref<16x128xi32, #tpu.memory_space<vmem>>, vector<1x128xi32>
    %51 = vector.broadcast %50 : vector<1x128xi32> to vector<128x128xi32>
    %52 = arith.cmpi eq, %0, %51 : vector<128x128xi32>
    %53 = arith.extui %52 : vector<128x128xi1> to vector<128x128xi32>
    %54 = arith.sitofp %53 : vector<128x128xi32> to vector<128x128xf32>
    %55 = arith.addf %49, %54 : vector<128x128xf32>
    %c9 = arith.constant 9 : index
    %c0_9 = arith.constant 0 : index
    %56 = vector.load %arg1[%c9, %c0_9] : memref<16x128xi32, #tpu.memory_space<vmem>>, vector<1x128xi32>
    %57 = vector.broadcast %56 : vector<1x128xi32> to vector<128x128xi32>
    %58 = arith.cmpi eq, %0, %57 : vector<128x128xi32>
    %59 = arith.extui %58 : vector<128x128xi1> to vector<128x128xi32>
    %60 = arith.sitofp %59 : vector<128x128xi32> to vector<128x128xf32>
    %61 = arith.addf %55, %60 : vector<128x128xf32>
    %c10 = arith.constant 10 : index
    %c0_10 = arith.constant 0 : index
    %62 = vector.load %arg1[%c10, %c0_10] : memref<16x128xi32, #tpu.memory_space<vmem>>, vector<1x128xi32>
    %63 = vector.broadcast %62 : vector<1x128xi32> to vector<128x128xi32>
    %64 = arith.cmpi eq, %0, %63 : vector<128x128xi32>
    %65 = arith.extui %64 : vector<128x128xi1> to vector<128x128xi32>
    %66 = arith.sitofp %65 : vector<128x128xi32> to vector<128x128xf32>
    %67 = arith.addf %61, %66 : vector<128x128xf32>
    %c11 = arith.constant 11 : index
    %c0_11 = arith.constant 0 : index
    %68 = vector.load %arg1[%c11, %c0_11] : memref<16x128xi32, #tpu.memory_space<vmem>>, vector<1x128xi32>
    %69 = vector.broadcast %68 : vector<1x128xi32> to vector<128x128xi32>
    %70 = arith.cmpi eq, %0, %69 : vector<128x128xi32>
    %71 = arith.extui %70 : vector<128x128xi1> to vector<128x128xi32>
    %72 = arith.sitofp %71 : vector<128x128xi32> to vector<128x128xf32>
    %73 = arith.addf %67, %72 : vector<128x128xf32>
    %c12 = arith.constant 12 : index
    %c0_12 = arith.constant 0 : index
    %74 = vector.load %arg1[%c12, %c0_12] : memref<16x128xi32, #tpu.memory_space<vmem>>, vector<1x128xi32>
    %75 = vector.broadcast %74 : vector<1x128xi32> to vector<128x128xi32>
    %76 = arith.cmpi eq, %0, %75 : vector<128x128xi32>
    %77 = arith.extui %76 : vector<128x128xi1> to vector<128x128xi32>
    %78 = arith.sitofp %77 : vector<128x128xi32> to vector<128x128xf32>
    %79 = arith.addf %73, %78 : vector<128x128xf32>
    %c13 = arith.constant 13 : index
    %c0_13 = arith.constant 0 : index
    %80 = vector.load %arg1[%c13, %c0_13] : memref<16x128xi32, #tpu.memory_space<vmem>>, vector<1x128xi32>
    %81 = vector.broadcast %80 : vector<1x128xi32> to vector<128x128xi32>
    %82 = arith.cmpi eq, %0, %81 : vector<128x128xi32>
    %83 = arith.extui %82 : vector<128x128xi1> to vector<128x128xi32>
    %84 = arith.sitofp %83 : vector<128x128xi32> to vector<128x128xf32>
    %85 = arith.addf %79, %84 : vector<128x128xf32>
    %c14 = arith.constant 14 : index
    %c0_14 = arith.constant 0 : index
    %86 = vector.load %arg1[%c14, %c0_14] : memref<16x128xi32, #tpu.memory_space<vmem>>, vector<1x128xi32>
    %87 = vector.broadcast %86 : vector<1x128xi32> to vector<128x128xi32>
    %88 = arith.cmpi eq, %0, %87 : vector<128x128xi32>
    %89 = arith.extui %88 : vector<128x128xi1> to vector<128x128xi32>
    %90 = arith.sitofp %89 : vector<128x128xi32> to vector<128x128xf32>
    %91 = arith.addf %85, %90 : vector<128x128xf32>
    %c15 = arith.constant 15 : index
    %c0_15 = arith.constant 0 : index
    %92 = vector.load %arg1[%c15, %c0_15] : memref<16x128xi32, #tpu.memory_space<vmem>>, vector<1x128xi32>
    %93 = vector.broadcast %92 : vector<1x128xi32> to vector<128x128xi32>
    %94 = arith.cmpi eq, %0, %93 : vector<128x128xi32>
    %95 = arith.extui %94 : vector<128x128xi1> to vector<128x128xi32>
    %96 = arith.sitofp %95 : vector<128x128xi32> to vector<128x128xf32>
    %97 = arith.addf %91, %96 : vector<128x128xf32>
    %c0_16 = arith.constant 0 : index
    %c0_17 = arith.constant 0 : index
    %98 = vector.load %arg5[%c0_16, %c0_17] : memref<200x128xf32, #tpu.memory_space<vmem>>, vector<200x128xf32>
    %cst_18 = arith.constant dense<0.000000e+00> : vector<200x128xf32>
    %99 = tpu.matmul %98, %97, %cst_18 {dimension_numbers = #tpu.dot_dimension_numbers<[1], [0], [0], [1], [0, 0, 1, 1], [], []>, precision = #tpu.contract_precision<fp32>} : vector<200x128xf32>, vector<128x128xf32>, vector<200x128xf32> -> vector<200x128xf32>
    %c0_19 = arith.constant 0 : index
    %c0_20 = arith.constant 0 : index
    %100 = vector.load %arg4[%c0_19, %c0_20] : memref<8x128xf32, #tpu.memory_space<vmem>>, vector<1x128xf32>
    %c1_21 = arith.constant 1 : index
    %c0_22 = arith.constant 0 : index
    %101 = vector.load %arg4[%c1_21, %c0_22] : memref<8x128xf32, #tpu.memory_space<vmem>>, vector<1x128xf32>
    %c2_23 = arith.constant 2 : index
    %c0_24 = arith.constant 0 : index
    %102 = vector.load %arg4[%c2_23, %c0_24] : memref<8x128xf32, #tpu.memory_space<vmem>>, vector<1x128xf32>
    %c3_25 = arith.constant 3 : index
    %c0_26 = arith.constant 0 : index
    %103 = vector.load %arg4[%c3_25, %c0_26] : memref<8x128xf32, #tpu.memory_space<vmem>>, vector<1x128xf32>
    %c0_27 = arith.constant 0 : index
    %c0_28 = arith.constant 0 : index
    %104 = vector.load %arg2[%c0_27, %c0_28] : memref<200x128xf32, #tpu.memory_space<vmem>>, vector<200x128xf32>
    %105 = vector.broadcast %100 : vector<1x128xf32> to vector<200x128xf32>
    %106 = arith.mulf %105, %104 : vector<200x128xf32>
    %c0_29 = arith.constant 0 : index
    %c0_30 = arith.constant 0 : index
    %107 = vector.load %arg3[%c0_29, %c0_30] : memref<200x128xf32, #tpu.memory_space<vmem>>, vector<200x128xf32>
    %108 = vector.broadcast %101 : vector<1x128xf32> to vector<200x128xf32>
    %109 = arith.mulf %108, %107 : vector<200x128xf32>
    %110 = arith.mulf %100, %102 : vector<1x128xf32>
    %111 = vector.broadcast %110 : vector<1x128xf32> to vector<200x128xf32>
    %112 = arith.mulf %111, %99 : vector<200x128xf32>
    %113 = arith.addf %106, %112 : vector<200x128xf32>
    %114 = arith.mulf %109, %113 : vector<200x128xf32>
    %cst_31 = arith.constant dense<0.000000e+00> : vector<128xf32>
    %115 = vector.multi_reduction <add>, %114, %cst_31 [0] : vector<200x128xf32> to vector<128xf32>
    %116 = vector.shape_cast %115 : vector<128xf32> to vector<1x128xf32>
    %117 = arith.addf %116, %103 : vector<1x128xf32>
    %c0_32 = arith.constant 0 : index
    %c0_33 = arith.constant 0 : index
    %118 = vector.load %arg6[%c0_32, %c0_33] : memref<1x128xf32, #tpu.memory_space<vmem>>, vector<1x128xf32>
    tpu.vector_store %arg6[%c0_32, %c0_33], %117 {strides = array<i32>} : memref<1x128xf32, #tpu.memory_space<vmem>>, vector<1x128xf32>,
    return
  }
  func.func @transform_0(%arg0: i32) -> (i32, i32) {
    %c0_i32 = arith.constant 0 : i32
    %c0_i32_0 = arith.constant 0 : i32
    return %c0_i32, %arg0 : i32, i32
  }
  func.func @transform_1(%arg0: i32) -> (i32, i32) {
    %c0_i32 = arith.constant 0 : i32
    %c0_i32_0 = arith.constant 0 : i32
    return %c0_i32, %arg0 : i32, i32
  }
  func.func @transform_2(%arg0: i32) -> (i32, i32) {
    %c0_i32 = arith.constant 0 : i32
    %c0_i32_0 = arith.constant 0 : i32
    return %c0_i32, %arg0 : i32, i32
  }
  func.func @transform_3(%arg0: i32) -> (i32, i32) {
    %c0_i32 = arith.constant 0 : i32
    %c0_i32_0 = arith.constant 0 : i32
    return %c0_i32, %arg0 : i32, i32
  }
  func.func @transform_4(%arg0: i32) -> (i32, i32) {
    %c0_i32 = arith.constant 0 : i32
    %c0_i32_0 = arith.constant 0 : i32
    %c0_i32_1 = arith.constant 0 : i32
    return %c0_i32, %c0_i32_0 : i32, i32
  }
  func.func @transform_5(%arg0: i32) -> (i32, i32) {
    %c0_i32 = arith.constant 0 : i32
    %c0_i32_0 = arith.constant 0 : i32
    return %c0_i32, %arg0 : i32, i32
  }
}

</mosaic_0001>

<bundles_post_ra>
// kernel: tpu_custom_call.1
= control target key start
LH: loop header
LB: loop body
LE: loop exit
PB: predicated region body
PF: predicated region fallthrough
CT: control target
= control target key end

     0   :  { %10 = vsyncpa [#allocation3], 0  ;;  %s6712_s0 = inlined_call_operand.hbm [shape: s32[16,128], index: 0, kind: input, shape index: {}]   ;;  %s6713_s1 = inlined_call_operand.hbm [shape: f32[200,128], index: 1, kind: input, shape index: {}]   ;;  %s6714_s2 = inlined_call_operand.hbm [shape: f32[200,128], index: 2, kind: input, shape index: {}]   ;;  %s6715_s3 = inlined_call_operand.vmem [shape: f32[8,128], index: 3, kind: input, shape index: {}]   ;;  %s6716_s4 = inlined_call_operand.hbm [shape: f32[200,128], index: 4, kind: input, shape index: {}]   ;;  %s6717_s5 = inlined_call_operand.hbm [shape: f32[1,128], index: 5, kind: output, shape index: {}]  }
   0x1   :  { %11 = vsyncpa [#allocation6], 0 }
   0x2   :  { %12 = vsyncpa [#allocation9], 0 }
   0x3   :  { %13 = vsyncpa [#allocation4], 0  ;;  %s4810_s18 = smov [#allocation5]   ;;  %s4811_s20 = smov [#allocation2]  }
   0x4   :  { %s31_s19 = sshll.u32 %s4810_s18, 4  ;;  %s19_s21 = sshll.u32 %s4811_s20, 4  ;;  %s32_s19 = int_to_ptr.vmem [resolvable:$true] %s31_s19  ;;  %s4850_s21 = int_to_ptr.vmem [resolvable:$true] %s19_s21 }
   0x5   :  { %s4692_s24 = scalar_lea.hbm %s6713_s1, 3200 }
   0x6   :  { %p4693_p0 = scmp.ne.s32.totalorder %s6713_s1, %s4692_s24  ;;  %p4696_p1 = scmp.lt.u32.totalorder %s4692_s24, %s6713_s1 }
   0x8   :  { %p4698_p2 = pnand %p4696_p1, %p4693_p0 }
   0xa   :  { %4701 = shalt.err (!%p4698_p2)
}
   0xb   :  { %s4702_s29 = scalar_lea.vmem %s32_s19, 3200  ;;  %p4707_p4 = scmp.lt.s32.totalorder %s32_s19, %s32_s19 }
   0xc   :  { %p4703_p3 = scmp.ne.s32.totalorder %s32_s19, %s4702_s29  ;;  %p4708_p5 = scmp.lt.s32.totalorder %s4702_s29, %s4702_s29 }
   0xe   :  { %p4709_p6 = por %p4708_p5, %p4707_p4 }
  0x10   :  { %p4710_p7 = pnand %p4709_p6, %p4703_p3 }
  0x12   :  { %4713 = shalt.err (!%p4710_p7)
}
  0x13   :  { %s4812_s30 = smov 128   ;;  %s4813_s6 = smov 8  }
  0x14   :  { %37 = dma.hbm_to_vmem [thread:$0]  %s6713_s1, 3200, %s32_s19, [#allocation6], %s4812_s30, %s4812_s30, %s4813_s6  }
  0x15   :  { %s4714_s11 = scalar_lea.hbm %s6712_s0, 256 }
  0x16   :  { %p4715_p8 = scmp.ne.s32.totalorder %s6712_s0, %s4714_s11  ;;  %p4718_p9 = scmp.lt.u32.totalorder %s4714_s11, %s6712_s0 }
  0x18   :  { %p4720_p10 = pnand %p4718_p9, %p4715_p8 }
  0x1a   :  { %4723 = shalt.err (!%p4720_p10)
}
  0x1b   :  { %s4724_s16 = scalar_lea.vmem %s4850_s21, 256  ;;  %p4729_p12 = scmp.lt.s32.totalorder %s4850_s21, %s4850_s21 }
  0x1c   :  { %p4725_p11 = scmp.ne.s32.totalorder %s4850_s21, %s4724_s16  ;;  %p4730_p13 = scmp.lt.s32.totalorder %s4724_s16, %s4724_s16 }
  0x1e   :  { %p4731_p0 = por %p4730_p13, %p4729_p12 }
  0x20   :  { %p4732_p1 = pnand %p4731_p0, %p4725_p11 }
  0x22   :  { %4735 = shalt.err (!%p4732_p1)
}
  0x23   :  { %25 = dma.hbm_to_vmem [thread:$0]  %s6712_s0, 256, %s4850_s21, [#allocation3], %s4812_s30, %s4812_s30, %s4813_s6  }
  0x24   :  { %s4814_s18 = smov [#allocation7]   ;;  %s4815_s20 = smov [#allocation8]  }
  0x25   :  { %s43_s19 = sshll.u32 %s4814_s18, 4  ;;  %s57_s22 = sshll.u32 %s4815_s20, 4  ;;  %s44_s19 = int_to_ptr.vmem [resolvable:$true] %s43_s19  ;;  %s4887_s22 = int_to_ptr.vmem [resolvable:$true] %s57_s22 }
  0x26   :  { %s4736_s25 = scalar_lea.hbm %s6714_s2, 3200 }
  0x27   :  { %p4737_p2 = scmp.ne.s32.totalorder %s6714_s2, %s4736_s25  ;;  %p4740_p3 = scmp.lt.u32.totalorder %s4736_s25, %s6714_s2 }
  0x29   :  { %p4742_p4 = pnand %p4740_p3, %p4737_p2 }
  0x2b   :  { %4745 = shalt.err (!%p4742_p4)
}
  0x2c   :  { %s4746_s0 = scalar_lea.vmem %s44_s19, 3200  ;;  %p4751_p6 = scmp.lt.s32.totalorder %s44_s19, %s44_s19 }
  0x2d   :  { %p4747_p5 = scmp.ne.s32.totalorder %s44_s19, %s4746_s0  ;;  %p4752_p7 = scmp.lt.s32.totalorder %s4746_s0, %s4746_s0 }
  0x2f   :  { %p4753_p8 = por %p4752_p7, %p4751_p6 }
  0x31   :  { %p4754_p9 = pnand %p4753_p8, %p4747_p5 }
  0x33   :  { %4757 = shalt.err (!%p4754_p9)
}
  0x34   :  { %49 = dma.hbm_to_vmem [thread:$0]  %s6714_s2, 3200, %s44_s19, [#allocation6], %s4812_s30, %s4812_s30, %s4813_s6  }
  0x35   :  { %s4758_s10 = scalar_lea.hbm %s6716_s4, 3200 }
  0x36   :  { %p4759_p10 = scmp.ne.s32.totalorder %s6716_s4, %s4758_s10  ;;  %p4762_p11 = scmp.lt.u32.totalorder %s4758_s10, %s6716_s4 }
  0x38   :  { %p4764_p12 = pnand %p4762_p11, %p4759_p10 }
  0x3a   :  { %4767 = shalt.err (!%p4764_p12)
}
  0x3b   :  { %s4768_s15 = scalar_lea.vmem %s4887_s22, 3200  ;;  %p4773_p0 = scmp.lt.s32.totalorder %s4887_s22, %s4887_s22 }
  0x3c   :  { %p4769_p13 = scmp.ne.s32.totalorder %s4887_s22, %s4768_s15  ;;  %p4774_p1 = scmp.lt.s32.totalorder %s4768_s15, %s4768_s15 }
  0x3e   :  { %p4775_p2 = por %p4774_p1, %p4773_p0 }
  0x40   :  { %p4776_p3 = pnand %p4775_p2, %p4769_p13 }
  0x42   :  { %4779 = shalt.err (!%p4776_p3)
}
  0x43   :  { %63 = dma.hbm_to_vmem [thread:$0]  %s6716_s4, 3200, %s4887_s22, [#allocation9], %s4812_s30, %s4812_s30, %s4813_s6  }
  0x44   :  { %4802 = dma.done.wait [#allocation3], 256  }
  0x45   :  { %4803 = vsyncadd [#allocation3], 4294967040 }
  0x46   :  { %4804 = dma.done.wait [#allocation6], 6400  }
  0x47   :  { %4805 = vsyncadd [#allocation6], 4294960896 }
  0x48   :  { %4806 = dma.done.wait [#allocation9], 3200  }
  0x49   :  { %4807 = vsyncadd [#allocation9], 4294964096  ;;  %v76_v0 = vlaneseq  ;;  %v6727_v1 = vmov 0.0|0.0   ;;  %v4964_v15 = vld [vmem:[#allocation2] ss:$0 sm:$0xff]  ;;  %v6722_v19 = vmov 0.0  }
  0x4a   :  { %4297 = vmatprep.subr.bf16.mxu1 %v6727_v1  ;;  %4369 = vmatprep.subr.bf16.mxu0 %v6727_v1  ;;  %v4966_v16 = vld [vmem:[#allocation2 + $0x1] ss:$0 sm:$0xff]  ;;  %v4968_v17 = vld [vmem:[#allocation2 + $0x2] ss:$0 sm:$0xff]  ;;  %v4978_v18 = vld [vmem:[#allocation2 + $0x3] ss:$0 sm:$0xff] }
  0x4b   :  { %v4926_v2 = vshrl.u32 %v76_v0, 7  ;;  %v4988_v26 = vld [vmem:[#allocation2 + $0x4] ss:$0 sm:$0xff]  ;;  %v4990_v27 = vld [vmem:[#allocation2 + $0x5] ss:$0 sm:$0xff]  ;;  %s4819_s22 = smov [#allocation10]  }
  0x4c   :  { %v5000_v34 = vld [vmem:[#allocation2 + $0x6] ss:$0 sm:$0xff]  ;;  %v5012_v39 = vld [vmem:[#allocation2 + $0x7] ss:$0 sm:$0xff]  ;;  %v5014_v40 = vld [vmem:[#allocation2 + $0x8] ss:$0 sm:$0xff] }
  0x4d   :  { %6751 = vst [vmem:[#allocation15_spill] sm:$0xff] %v4926_v2  ;;  %v4929_v3 = vadd.s32 8, %v4926_v2  ;;  %v4932_v4 = vadd.s32 16, %v4926_v2  ;;  %v4935_v5 = vadd.s32 24, %v4926_v2  ;;  %v4938_v6 = vadd.s32 32, %v4926_v2  ;;  %s3125_s23 = sshll.u32 %s4819_s22, 4  ;;  %s3126_s23 = int_to_ptr.vmem [resolvable:$true] %s3125_s23 }
  0x4e   :  { %v4941_v7 = vadd.s32 40, %v4926_v2  ;;  %v4944_v8 = vadd.s32 48, %v4926_v2  ;;  %v4947_v9 = vadd.s32 56, %v4926_v2  ;;  %v4950_v10 = vadd.s32 64, %v4926_v2  ;;  %v5024_v47 = vld [vmem:[#allocation2 + $0x9] ss:$0 sm:$0xff]  ;;  %p4785_p5 = scmp.lt.s32.totalorder %s3126_s23, %s3126_s23 }
  0x4f   :  { %v4953_v11 = vadd.s32 72, %v4926_v2  ;;  %v4956_v12 = vadd.s32 80, %v4926_v2  ;;  %v4959_v13 = vadd.s32 88, %v4926_v2  ;;  %v4962_v14 = vadd.s32 96, %v4926_v2  ;;  %v5036_v52 = vld [vmem:[#allocation2 + $0xa] ss:$0 sm:$0xff] }
  0x50   :  { %vm98_vm0 = vcmp.eq.s32.totalorder %v4926_v2, %v4964_v15  ;;  %vm99_vm1 = vcmp.eq.s32.totalorder %v4929_v3, %v4964_v15  ;;  %vm167_vm2 = vcmp.eq.s32.totalorder %v4926_v2, %v4966_v16  ;;  %vm168_vm3 = vcmp.eq.s32.totalorder %v4929_v3, %v4966_v16  ;;  %v5038_v53 = vld [vmem:[#allocation2 + $0xb] ss:$0 sm:$0xff]  ;;  %v5048_v60 = vld [vmem:[#allocation2 + $0xc] ss:$0 sm:$0xff]  ;;  %s4780_s24 = scalar_lea.vmem %s3126_s23, 16  ;;  %s4784_s25 = scalar_lea.vmem %s3126_s23, 32 }
  0x51   :  { %v3137_v20 = vsel %vm98_vm0, 1.0, %v6722_v19  ;;  %v3138_v21 = vsel %vm99_vm1, 1.0, %v6722_v19  ;;  %v3154_v22 = vsel %vm167_vm2, 1.0, %v6722_v19  ;;  %v3155_v23 = vsel %vm168_vm3, 1.0, %v6722_v19  ;;  %p4781_p4 = scmp.ne.s32.totalorder %s3126_s23, %s4780_s24  ;;  %p4786_p6 = scmp.lt.s32.totalorder %s4784_s25, %s4780_s24 }
  0x52   :  { %v215_v24 = vadd.f32 %v3154_v22, %v3137_v20  ;;  %v216_v25 = vadd.f32 %v3155_v23, %v3138_v21  ;;  %vm236_vm4 = vcmp.eq.s32.totalorder %v4926_v2, %v4968_v17  ;;  %vm237_vm5 = vcmp.eq.s32.totalorder %v4929_v3, %v4968_v17  ;;  %v5060_v20 = vld [vmem:[#allocation2 + $0xd] ss:$0 sm:$0xff]  ;;  %v5062_v21 = vld [vmem:[#allocation2 + $0xe] ss:$0 sm:$0xff] }
  0x53   :  { %v3171_v28 = vsel %vm236_vm4, 1.0, %v6722_v19  ;;  %v3172_v29 = vsel %vm237_vm5, 1.0, %v6722_v19  ;;  %vm305_vm6 = vcmp.eq.s32.totalorder %v4926_v2, %v4978_v18  ;;  %vm306_vm7 = vcmp.eq.s32.totalorder %v4929_v3, %v4978_v18  ;;  %p4787_p7 = por %p4786_p6, %p4785_p5 }
  0x54   :  { %v284_v30 = vadd.f32 %v3171_v28, %v215_v24  ;;  %v285_v31 = vadd.f32 %v3172_v29, %v216_v25  ;;  %v3188_v32 = vsel %vm305_vm6, 1.0, %v6722_v19  ;;  %v3189_v33 = vsel %vm306_vm7, 1.0, %v6722_v19 }
  0x55   :  { %vm374_vm8 = vcmp.eq.s32.totalorder %v4926_v2, %v4988_v26  ;;  %vm375_vm9 = vcmp.eq.s32.totalorder %v4929_v3, %v4988_v26  ;;  %vm443_vm10 = vcmp.eq.s32.totalorder %v4926_v2, %v4990_v27  ;;  %vm444_vm11 = vcmp.eq.s32.totalorder %v4929_v3, %v4990_v27  ;;  %p4788_p8 = pnand %p4787_p7, %p4781_p4 }
  0x56   :  { %v353_v35 = vadd.f32 %v3188_v32, %v284_v30  ;;  %v354_v36 = vadd.f32 %v3189_v33, %v285_v31  ;;  %v3205_v37 = vsel %vm374_vm8, 1.0, %v6722_v19  ;;  %v3206_v38 = vsel %vm375_vm9, 1.0, %v6722_v19  ;;  %v5072_v30 = vld [vmem:[#allocation2 + $0xf] ss:$0 sm:$0xff] }
  0x57   :  { %v3222_v41 = vsel %vm443_vm10, 1.0, %v6722_v19  ;;  %v3223_v42 = vsel %vm444_vm11, 1.0, %v6722_v19  ;;  %vm512_vm12 = vcmp.eq.s32.totalorder %v4926_v2, %v5000_v34  ;;  %vm513_vm13 = vcmp.eq.s32.totalorder %v4929_v3, %v5000_v34 }
  0x58   :  { %v422_v43 = vadd.f32 %v3205_v37, %v353_v35  ;;  %v423_v44 = vadd.f32 %v3206_v38, %v354_v36  ;;  %v3239_v45 = vsel %vm512_vm12, 1.0, %v6722_v19  ;;  %v3240_v46 = vsel %vm513_vm13, 1.0, %v6722_v19 }
  0x59   :  { %vm581_vm14 = vcmp.eq.s32.totalorder %v4926_v2, %v5012_v39  ;;  %vm582_vm15 = vcmp.eq.s32.totalorder %v4929_v3, %v5012_v39  ;;  %vm650_vm0 = vcmp.eq.s32.totalorder %v4926_v2, %v5014_v40  ;;  %vm651_vm1 = vcmp.eq.s32.totalorder %v4929_v3, %v5014_v40 }
  0x5a   :  { %v491_v48 = vadd.f32 %v3222_v41, %v422_v43  ;;  %v492_v49 = vadd.f32 %v3223_v42, %v423_v44  ;;  %v3256_v50 = vsel %vm581_vm14, 1.0, %v6722_v19  ;;  %v3257_v51 = vsel %vm582_vm15, 1.0, %v6722_v19 }
  0x5b   :  { %v3273_v54 = vsel %vm650_vm0, 1.0, %v6722_v19  ;;  %v3274_v55 = vsel %vm651_vm1, 1.0, %v6722_v19  ;;  %vm719_vm2 = vcmp.eq.s32.totalorder %v4926_v2, %v5024_v47  ;;  %vm720_vm3 = vcmp.eq.s32.totalorder %v4929_v3, %v5024_v47 }
  0x5c   :  { %v560_v56 = vadd.f32 %v3239_v45, %v491_v48  ;;  %v561_v57 = vadd.f32 %v3240_v46, %v492_v49  ;;  %v3290_v58 = vsel %vm719_vm2, 1.0, %v6722_v19  ;;  %v3291_v59 = vsel %vm720_vm3, 1.0, %v6722_v19 }
  0x5d   :  { %vm788_vm4 = vcmp.eq.s32.totalorder %v4926_v2, %v5036_v52  ;;  %vm789_vm5 = vcmp.eq.s32.totalorder %v4929_v3, %v5036_v52  ;;  %vm857_vm6 = vcmp.eq.s32.totalorder %v4926_v2, %v5038_v53  ;;  %vm858_vm7 = vcmp.eq.s32.totalorder %v4929_v3, %v5038_v53 }
  0x5e   :  { %v629_v61 = vadd.f32 %v3256_v50, %v560_v56  ;;  %v630_v62 = vadd.f32 %v3257_v51, %v561_v57  ;;  %v3307_v63 = vsel %vm788_vm4, 1.0, %v6722_v19  ;;  %v3308_v0 = vsel %vm789_vm5, 1.0, %v6722_v19 }
  0x5f   :  { %v3324_v22 = vsel %vm857_vm6, 1.0, %v6722_v19  ;;  %v3325_v23 = vsel %vm858_vm7, 1.0, %v6722_v19  ;;  %vm926_vm8 = vcmp.eq.s32.totalorder %v4926_v2, %v5048_v60  ;;  %vm927_vm9 = vcmp.eq.s32.totalorder %v4929_v3, %v5048_v60 }
  0x60   :  { %v698_v24 = vadd.f32 %v3273_v54, %v629_v61  ;;  %v699_v25 = vadd.f32 %v3274_v55, %v630_v62  ;;  %v3341_v28 = vsel %vm926_vm8, 1.0, %v6722_v19  ;;  %v3342_v29 = vsel %vm927_vm9, 1.0, %v6722_v19 }
  0x61   :  { %vm995_vm10 = vcmp.eq.s32.totalorder %v4926_v2, %v5060_v20  ;;  %vm996_vm11 = vcmp.eq.s32.totalorder %v4929_v3, %v5060_v20  ;;  %vm1064_vm12 = vcmp.eq.s32.totalorder %v4926_v2, %v5062_v21  ;;  %vm1065_vm13 = vcmp.eq.s32.totalorder %v4929_v3, %v5062_v21 }
  0x62   :  { %v767_v31 = vadd.f32 %v3290_v58, %v698_v24  ;;  %v768_v32 = vadd.f32 %v3291_v59, %v699_v25  ;;  %v3358_v33 = vsel %vm995_vm10, 1.0, %v6722_v19  ;;  %v3359_v35 = vsel %vm996_vm11, 1.0, %v6722_v19 }
  0x63   :  { %v3375_v36 = vsel %vm1064_vm12, 1.0, %v6722_v19  ;;  %v3376_v37 = vsel %vm1065_vm13, 1.0, %v6722_v19  ;;  %vm1133_vm14 = vcmp.eq.s32.totalorder %v4926_v2, %v5072_v30  ;;  %vm1134_vm15 = vcmp.eq.s32.totalorder %v4929_v3, %v5072_v30 }
  0x64   :  { %v836_v38 = vadd.f32 %v3307_v63, %v767_v31  ;;  %v837_v41 = vadd.f32 %v3308_v0, %v768_v32  ;;  %v3392_v42 = vsel %vm1133_vm14, 1.0, %v6722_v19  ;;  %v3393_v43 = vsel %vm1134_vm15, 1.0, %v6722_v19 }
  0x65   :  { %vm100_vm0 = vcmp.eq.s32.totalorder %v4932_v4, %v4964_v15  ;;  %vm101_vm1 = vcmp.eq.s32.totalorder %v4935_v5, %v4964_v15  ;;  %vm169_vm2 = vcmp.eq.s32.totalorder %v4932_v4, %v4966_v16  ;;  %vm170_vm3 = vcmp.eq.s32.totalorder %v4935_v5, %v4966_v16 }
  0x66   :  { %v905_v44 = vadd.f32 %v3324_v22, %v836_v38  ;;  %v906_v3 = vadd.f32 %v3325_v23, %v837_v41  ;;  %v3139_v45 = vsel %vm100_vm0, 1.0, %v6722_v19  ;;  %v3140_v46 = vsel %vm101_vm1, 1.0, %v6722_v19 }
  0x67   :  { %v3156_v48 = vsel %vm169_vm2, 1.0, %v6722_v19  ;;  %v3157_v49 = vsel %vm170_vm3, 1.0, %v6722_v19  ;;  %vm238_vm4 = vcmp.eq.s32.totalorder %v4932_v4, %v4968_v17  ;;  %vm239_vm5 = vcmp.eq.s32.totalorder %v4935_v5, %v4968_v17 }
  0x68   :  { %v974_v50 = vadd.f32 %v3341_v28, %v905_v44  ;;  %v975_v51 = vadd.f32 %v3342_v29, %v906_v3  ;;  %v217_v54 = vadd.f32 %v3156_v48, %v3139_v45  ;;  %v218_v55 = vadd.f32 %v3157_v49, %v3140_v46 }
  0x69   :  { %v3173_v56 = vsel %vm238_vm4, 1.0, %v6722_v19  ;;  %v3174_v57 = vsel %vm239_vm5, 1.0, %v6722_v19  ;;  %vm307_vm6 = vcmp.eq.s32.totalorder %v4932_v4, %v4978_v18  ;;  %vm308_vm7 = vcmp.eq.s32.totalorder %v4935_v5, %v4978_v18 }
  0x6a   :  { %v1043_v58 = vadd.f32 %v3358_v33, %v974_v50  ;;  %v1044_v59 = vadd.f32 %v3359_v35, %v975_v51  ;;  %v286_v61 = vadd.f32 %v3173_v56, %v217_v54  ;;  %v287_v62 = vadd.f32 %v3174_v57, %v218_v55 }
  0x6b   :  { %v3190_v63 = vsel %vm307_vm6, 1.0, %v6722_v19  ;;  %v3191_v0 = vsel %vm308_vm7, 1.0, %v6722_v19  ;;  %vm376_vm8 = vcmp.eq.s32.totalorder %v4932_v4, %v4988_v26  ;;  %vm377_vm9 = vcmp.eq.s32.totalorder %v4935_v5, %v4988_v26 }
  0x6c   :  { %v1112_v22 = vadd.f32 %v3375_v36, %v1043_v58  ;;  %v1113_v23 = vadd.f32 %v3376_v37, %v1044_v59  ;;  %v355_v24 = vadd.f32 %v3190_v63, %v286_v61  ;;  %v356_v25 = vadd.f32 %v3191_v0, %v287_v62 }
  0x6d   :  { %v3207_v28 = vsel %vm376_vm8, 1.0, %v6722_v19  ;;  %v3208_v29 = vsel %vm377_vm9, 1.0, %v6722_v19  ;;  %vm445_vm10 = vcmp.eq.s32.totalorder %v4932_v4, %v4990_v27  ;;  %vm446_vm11 = vcmp.eq.s32.totalorder %v4935_v5, %v4990_v27 }
  0x6e   :  { %v1181_v31 = vadd.f32 %v3392_v42, %v1112_v22  ;;  %v1182_v32 = vadd.f32 %v3393_v43, %v1113_v23  ;;  %v424_v33 = vadd.f32 %v3207_v28, %v355_v24  ;;  %v425_v35 = vadd.f32 %v3208_v29, %v356_v25 }
  0x6f   :  { %v3224_v38 = vsel %vm445_vm10, 1.0, %v6722_v19  ;;  %v3225_v36 = vsel %vm446_vm11, 1.0, %v6722_v19  ;;  %vm514_vm12 = vcmp.eq.s32.totalorder %v4932_v4, %v5000_v34  ;;  %vm515_vm13 = vcmp.eq.s32.totalorder %v4935_v5, %v5000_v34 }
  0x70   :  { %v1223_v37 = vand.u32 4294901760, %v1181_v31  ;;  %v1226_v41 = vand.u32 4294901760, %v1182_v32  ;;  %v493_v44 = vadd.f32 %v3224_v38, %v424_v33  ;;  %v494_v3 = vadd.f32 %v3225_v36, %v425_v35 }
  0x71   :  { %v3241_v45 = vsel %vm514_vm12, 1.0, %v6722_v19  ;;  %v3242_v42 = vsel %vm515_vm13, 1.0, %v6722_v19  ;;  %vm583_vm14 = vcmp.eq.s32.totalorder %v4932_v4, %v5012_v39  ;;  %vm584_vm15 = vcmp.eq.s32.totalorder %v4935_v5, %v5012_v39 }
  0x72   :  { %v5138_v43 = vpack.c.bf16 %v1226_v41, %v1223_v37  ;;  %v5140_v46 = vsub.f32 %v1181_v31, %v1223_v37  ;;  %v5142_v48 = vsub.f32 %v1182_v32, %v1226_v41  ;;  %v562_v49 = vadd.f32 %v3241_v45, %v493_v44 }
  0x73   :  { %v563_v50 = vadd.f32 %v3242_v42, %v494_v3  ;;  %v3258_v51 = vsel %vm583_vm14, 1.0, %v6722_v19  ;;  %v3259_v54 = vsel %vm584_vm15, 1.0, %v6722_v19  ;;  %vm652_vm0 = vcmp.eq.s32.totalorder %v4932_v4, %v5014_v40 }
  0x74   :  { %4299 = vmatpush3.bf16.msra.mxu1 %v5138_v43  ;;  %4371 = vmatpush3.bf16.msra.mxu0 %v5138_v43  ;;  %v631_v55 = vadd.f32 %v3258_v51, %v562_v49  ;;  %vm653_vm1 = vcmp.eq.s32.totalorder %v4935_v5, %v5014_v40  ;;  %v3275_v56 = vsel %vm652_vm0, 1.0, %v6722_v19  ;;  %vm721_vm2 = vcmp.eq.s32.totalorder %v4932_v4, %v5024_v47 }
  0x75   :  { %4300 = vmatprep.subr.bf16.mxu1 %v6727_v1  ;;  %4372 = vmatprep.subr.bf16.mxu0 %v6727_v1  ;;  %v632_v57 = vadd.f32 %v3259_v54, %v563_v50  ;;  %v3276_v58 = vsel %vm653_vm1, 1.0, %v6722_v19  ;;  %vm722_vm3 = vcmp.eq.s32.totalorder %v4935_v5, %v5024_v47  ;;  %v3292_v59 = vsel %vm721_vm2, 1.0, %v6722_v19 }
  0x76   :  { %v700_v61 = vadd.f32 %v3275_v56, %v631_v55  ;;  %v3293_v62 = vsel %vm722_vm3, 1.0, %v6722_v19  ;;  %vm790_vm4 = vcmp.eq.s32.totalorder %v4932_v4, %v5036_v52  ;;  %vm791_vm5 = vcmp.eq.s32.totalorder %v4935_v5, %v5036_v52 }
  0x77   :  { %v701_v63 = vadd.f32 %v3276_v58, %v632_v57  ;;  %v3309_v0 = vsel %vm790_vm4, 1.0, %v6722_v19  ;;  %v3310_v22 = vsel %vm791_vm5, 1.0, %v6722_v19  ;;  %vm859_vm6 = vcmp.eq.s32.totalorder %v4932_v4, %v5038_v53 }
  0x78   :  { %v769_v23 = vadd.f32 %v3292_v59, %v700_v61  ;;  %vm860_vm7 = vcmp.eq.s32.totalorder %v4935_v5, %v5038_v53  ;;  %v3326_v24 = vsel %vm859_vm6, 1.0, %v6722_v19  ;;  %vm928_vm8 = vcmp.eq.s32.totalorder %v4932_v4, %v5048_v60 }
  0x79   :  { %v770_v25 = vadd.f32 %v3293_v62, %v701_v63  ;;  %v3327_v28 = vsel %vm860_vm7, 1.0, %v6722_v19  ;;  %vm929_vm9 = vcmp.eq.s32.totalorder %v4935_v5, %v5048_v60  ;;  %v3343_v29 = vsel %vm928_vm8, 1.0, %v6722_v19 }
  0x7a   :  { %v838_v31 = vadd.f32 %v3309_v0, %v769_v23  ;;  %v3344_v32 = vsel %vm929_vm9, 1.0, %v6722_v19  ;;  %vm997_vm10 = vcmp.eq.s32.totalorder %v4932_v4, %v5060_v20  ;;  %vm998_vm11 = vcmp.eq.s32.totalorder %v4935_v5, %v5060_v20 }
  0x7b   :  { %v839_v33 = vadd.f32 %v3310_v22, %v770_v25  ;;  %v3360_v35 = vsel %vm997_vm10, 1.0, %v6722_v19  ;;  %v3361_v38 = vsel %vm998_vm11, 1.0, %v6722_v19  ;;  %vm1066_vm12 = vcmp.eq.s32.totalorder %v4932_v4, %v5062_v21 }
  0x7c   :  { %v907_v36 = vadd.f32 %v3326_v24, %v838_v31  ;;  %vm1067_vm13 = vcmp.eq.s32.totalorder %v4935_v5, %v5062_v21  ;;  %v3377_v37 = vsel %vm1066_vm12, 1.0, %v6722_v19  ;;  %vm1135_vm14 = vcmp.eq.s32.totalorder %v4932_v4, %v5072_v30 }
  0x7d   :  { %v908_v41 = vadd.f32 %v3327_v28, %v839_v33  ;;  %v3378_v44 = vsel %vm1067_vm13, 1.0, %v6722_v19  ;;  %vm1136_vm15 = vcmp.eq.s32.totalorder %v4935_v5, %v5072_v30  ;;  %v3394_v3 = vsel %vm1135_vm14, 1.0, %v6722_v19 }
  0x7e   :  { %v976_v45 = vadd.f32 %v3343_v29, %v907_v36  ;;  %v3395_v42 = vsel %vm1136_vm15, 1.0, %v6722_v19  ;;  %vm102_vm0 = vcmp.eq.s32.totalorder %v4938_v6, %v4964_v15  ;;  %vm103_vm1 = vcmp.eq.s32.totalorder %v4941_v7, %v4964_v15 }
  0x7f   :  { %v977_v49 = vadd.f32 %v3344_v32, %v908_v41  ;;  %v3141_v4 = vsel %vm102_vm0, 1.0, %v6722_v19  ;;  %v3142_v50 = vsel %vm103_vm1, 1.0, %v6722_v19  ;;  %vm171_vm2 = vcmp.eq.s32.totalorder %v4938_v6, %v4966_v16 }
  0x80   :  { %v1045_v5 = vadd.f32 %v3360_v35, %v976_v45  ;;  %vm172_vm3 = vcmp.eq.s32.totalorder %v4941_v7, %v4966_v16  ;;  %v3158_v51 = vsel %vm171_vm2, 1.0, %v6722_v19  ;;  %vm240_vm4 = vcmp.eq.s32.totalorder %v4938_v6, %v4968_v17 }
  0x81   :  { %v1046_v54 = vadd.f32 %v3361_v38, %v977_v49  ;;  %v3159_v55 = vsel %vm172_vm3, 1.0, %v6722_v19  ;;  %v219_v56 = vadd.f32 %v3158_v51, %v3141_v4  ;;  %vm241_vm5 = vcmp.eq.s32.totalorder %v4941_v7, %v4968_v17 }
  0x82   :  { %v1114_v57 = vadd.f32 %v3377_v37, %v1045_v5  ;;  %v220_v58 = vadd.f32 %v3159_v55, %v3142_v50  ;;  %v3175_v59 = vsel %vm240_vm4, 1.0, %v6722_v19  ;;  %v3176_v61 = vsel %vm241_vm5, 1.0, %v6722_v19 }
  0x83   :  { %v1115_v62 = vadd.f32 %v3378_v44, %v1046_v54  ;;  %v288_v63 = vadd.f32 %v3175_v59, %v219_v56  ;;  %vm309_vm6 = vcmp.eq.s32.totalorder %v4938_v6, %v4978_v18  ;;  %vm310_vm7 = vcmp.eq.s32.totalorder %v4941_v7, %v4978_v18 }
  0x84   :  { %v1183_v0 = vadd.f32 %v3394_v3, %v1114_v57  ;;  %v289_v22 = vadd.f32 %v3176_v61, %v220_v58  ;;  %v3192_v23 = vsel %vm309_vm6, 1.0, %v6722_v19  ;;  %v3193_v24 = vsel %vm310_vm7, 1.0, %v6722_v19 }
  0x85   :  { %v1184_v25 = vadd.f32 %v3395_v42, %v1115_v62  ;;  %v357_v28 = vadd.f32 %v3192_v23, %v288_v63  ;;  %vm378_vm8 = vcmp.eq.s32.totalorder %v4938_v6, %v4988_v26  ;;  %vm379_vm9 = vcmp.eq.s32.totalorder %v4941_v7, %v4988_v26 }
  0x86   :  { %v1229_v29 = vand.u32 4294901760, %v1183_v0  ;;  %v358_v31 = vadd.f32 %v3193_v24, %v289_v22  ;;  %v3209_v32 = vsel %vm378_vm8, 1.0, %v6722_v19  ;;  %v3210_v33 = vsel %vm379_vm9, 1.0, %v6722_v19 }
  0x87   :  { %v1232_v35 = vand.u32 4294901760, %v1184_v25  ;;  %v426_v38 = vadd.f32 %v3209_v32, %v357_v28  ;;  %vm447_vm10 = vcmp.eq.s32.totalorder %v4938_v6, %v4990_v27  ;;  %vm448_vm11 = vcmp.eq.s32.totalorder %v4941_v7, %v4990_v27 }
  0x88   :  { %v5232_v36 = vsub.f32 %v1183_v0, %v1229_v29  ;;  %v427_v37 = vadd.f32 %v3210_v33, %v358_v31  ;;  %v3226_v41 = vsel %vm447_vm10, 1.0, %v6722_v19  ;;  %v3227_v44 = vsel %vm448_vm11, 1.0, %v6722_v19 }
  0x89   :  { %v5236_v3 = vpack.c.bf16 %v1232_v35, %v1229_v29  ;;  %v5238_v45 = vsub.f32 %v1184_v25, %v1232_v35  ;;  %v495_v42 = vadd.f32 %v3226_v41, %v426_v38  ;;  %vm516_vm12 = vcmp.eq.s32.totalorder %v4938_v6, %v5000_v34 }
  0x8a   :  { %v496_v49 = vadd.f32 %v3227_v44, %v427_v37  ;;  %vm517_vm13 = vcmp.eq.s32.totalorder %v4941_v7, %v5000_v34  ;;  %v3243_v4 = vsel %vm516_vm12, 1.0, %v6722_v19  ;;  %vm585_vm14 = vcmp.eq.s32.totalorder %v4938_v6, %v5012_v39 }
  0x8b   :  { %4302 = vmatpush3.bf16.msra.mxu1 %v5236_v3  ;;  %4374 = vmatpush3.bf16.msra.mxu0 %v5236_v3  ;;  %v3244_v50 = vsel %vm517_vm13, 1.0, %v6722_v19  ;;  %v564_v5 = vadd.f32 %v3243_v4, %v495_v42  ;;  %vm586_vm15 = vcmp.eq.s32.totalorder %v4941_v7, %v5012_v39  ;;  %v3260_v51 = vsel %vm585_vm14, 1.0, %v6722_v19 }
  0x8c   :  { %4303 = vmatprep.subr.bf16.mxu1 %v6727_v1  ;;  %4375 = vmatprep.subr.bf16.mxu0 %v6727_v1  ;;  %v565_v54 = vadd.f32 %v3244_v50, %v496_v49  ;;  %v3261_v55 = vsel %vm586_vm15, 1.0, %v6722_v19  ;;  %vm654_vm0 = vcmp.eq.s32.totalorder %v4938_v6, %v5014_v40  ;;  %vm655_vm1 = vcmp.eq.s32.totalorder %v4941_v7, %v5014_v40 }
  0x8d   :  { %v633_v56 = vadd.f32 %v3260_v51, %v564_v5  ;;  %v3277_v57 = vsel %vm654_vm0, 1.0, %v6722_v19  ;;  %v3278_v58 = vsel %vm655_vm1, 1.0, %v6722_v19  ;;  %vm723_vm2 = vcmp.eq.s32.totalorder %v4938_v6, %v5024_v47 }
  0x8e   :  { %v634_v59 = vadd.f32 %v3261_v55, %v565_v54  ;;  %vm724_vm3 = vcmp.eq.s32.totalorder %v4941_v7, %v5024_v47  ;;  %v3294_v61 = vsel %vm723_vm2, 1.0, %v6722_v19  ;;  %vm792_vm4 = vcmp.eq.s32.totalorder %v4938_v6, %v5036_v52 }
  0x8f   :  { %v702_v62 = vadd.f32 %v3277_v57, %v633_v56  ;;  %v3295_v63 = vsel %vm724_vm3, 1.0, %v6722_v19  ;;  %vm793_vm5 = vcmp.eq.s32.totalorder %v4941_v7, %v5036_v52  ;;  %v3311_v0 = vsel %vm792_vm4, 1.0, %v6722_v19 }
  0x90   :  { %v703_v22 = vadd.f32 %v3278_v58, %v634_v59  ;;  %v3312_v23 = vsel %vm793_vm5, 1.0, %v6722_v19  ;;  %vm861_vm6 = vcmp.eq.s32.totalorder %v4938_v6, %v5038_v53  ;;  %vm862_vm7 = vcmp.eq.s32.totalorder %v4941_v7, %v5038_v53 }
  0x91   :  { %v771_v24 = vadd.f32 %v3294_v61, %v702_v62  ;;  %v3328_v25 = vsel %vm861_vm6, 1.0, %v6722_v19  ;;  %v3329_v28 = vsel %vm862_vm7, 1.0, %v6722_v19  ;;  %vm930_vm8 = vcmp.eq.s32.totalorder %v4938_v6, %v5048_v60 }
  0x92   :  { %v772_v29 = vadd.f32 %v3295_v63, %v703_v22  ;;  %vm931_vm9 = vcmp.eq.s32.totalorder %v4941_v7, %v5048_v60  ;;  %v3345_v31 = vsel %vm930_vm8, 1.0, %v6722_v19  ;;  %vm999_vm10 = vcmp.eq.s32.totalorder %v4938_v6, %v5060_v20 }
  0x93   :  { %v840_v32 = vadd.f32 %v3311_v0, %v771_v24  ;;  %v3346_v33 = vsel %vm931_vm9, 1.0, %v6722_v19  ;;  %vm1000_vm11 = vcmp.eq.s32.totalorder %v4941_v7, %v5060_v20  ;;  %v3362_v35 = vsel %vm999_vm10, 1.0, %v6722_v19 }
  0x94   :  { %v841_v38 = vadd.f32 %v3312_v23, %v772_v29  ;;  %v3363_v37 = vsel %vm1000_vm11, 1.0, %v6722_v19  ;;  %vm1068_vm12 = vcmp.eq.s32.totalorder %v4938_v6, %v5062_v21  ;;  %vm1069_vm13 = vcmp.eq.s32.totalorder %v4941_v7, %v5062_v21 }
  0x95   :  { %v909_v41 = vadd.f32 %v3328_v25, %v840_v32  ;;  %v3379_v44 = vsel %vm1068_vm12, 1.0, %v6722_v19  ;;  %v3380_v42 = vsel %vm1069_vm13, 1.0, %v6722_v19  ;;  %vm1137_vm14 = vcmp.eq.s32.totalorder %v4938_v6, %v5072_v30 }
  0x96   :  { %v910_v49 = vadd.f32 %v3329_v28, %v841_v38  ;;  %vm1138_vm15 = vcmp.eq.s32.totalorder %v4941_v7, %v5072_v30  ;;  %v3396_v4 = vsel %vm1137_vm14, 1.0, %v6722_v19  ;;  %vm104_vm0 = vcmp.eq.s32.totalorder %v4944_v8, %v4964_v15 }
  0x97   :  { %v978_v50 = vadd.f32 %v3345_v31, %v909_v41  ;;  %v3397_v5 = vsel %vm1138_vm15, 1.0, %v6722_v19  ;;  %vm105_vm1 = vcmp.eq.s32.totalorder %v4947_v9, %v4964_v15  ;;  %v3143_v51 = vsel %vm104_vm0, 1.0, %v6722_v19 }
  0x98   :  { %v979_v54 = vadd.f32 %v3346_v33, %v910_v49  ;;  %v3144_v6 = vsel %vm105_vm1, 1.0, %v6722_v19  ;;  %vm173_vm2 = vcmp.eq.s32.totalorder %v4944_v8, %v4966_v16  ;;  %vm174_vm3 = vcmp.eq.s32.totalorder %v4947_v9, %v4966_v16 }
  0x99   :  { %v1047_v7 = vadd.f32 %v3362_v35, %v978_v50  ;;  %v3160_v55 = vsel %vm173_vm2, 1.0, %v6722_v19  ;;  %v3161_v56 = vsel %vm174_vm3, 1.0, %v6722_v19  ;;  %vm242_vm4 = vcmp.eq.s32.totalorder %v4944_v8, %v4968_v17 }
  0x9a   :  { %v1048_v57 = vadd.f32 %v3363_v37, %v979_v54  ;;  %v221_v58 = vadd.f32 %v3160_v55, %v3143_v51  ;;  %v222_v59 = vadd.f32 %v3161_v56, %v3144_v6  ;;  %vm243_vm5 = vcmp.eq.s32.totalorder %v4947_v9, %v4968_v17 }
  0x9b   :  { %v1116_v61 = vadd.f32 %v3379_v44, %v1047_v7  ;;  %v3177_v62 = vsel %vm242_vm4, 1.0, %v6722_v19  ;;  %v3178_v63 = vsel %vm243_vm5, 1.0, %v6722_v19  ;;  %vm311_vm6 = vcmp.eq.s32.totalorder %v4944_v8, %v4978_v18 }
  0x9c   :  { %v1117_v0 = vadd.f32 %v3380_v42, %v1048_v57  ;;  %v290_v22 = vadd.f32 %v3177_v62, %v221_v58  ;;  %v291_v23 = vadd.f32 %v3178_v63, %v222_v59  ;;  %vm312_vm7 = vcmp.eq.s32.totalorder %v4947_v9, %v4978_v18 }
  0x9d   :  { %v1185_v24 = vadd.f32 %v3396_v4, %v1116_v61  ;;  %v3194_v25 = vsel %vm311_vm6, 1.0, %v6722_v19  ;;  %v3195_v28 = vsel %vm312_vm7, 1.0, %v6722_v19  ;;  %vm380_vm8 = vcmp.eq.s32.totalorder %v4944_v8, %v4988_v26 }
  0x9e   :  { %v1186_v29 = vadd.f32 %v3397_v5, %v1117_v0  ;;  %v359_v31 = vadd.f32 %v3194_v25, %v290_v22  ;;  %v360_v32 = vadd.f32 %v3195_v28, %v291_v23  ;;  %vm381_vm9 = vcmp.eq.s32.totalorder %v4947_v9, %v4988_v26 }
  0x9f   :  { %v1235_v33 = vand.u32 4294901760, %v1185_v24  ;;  %v3211_v35 = vsel %vm380_vm8, 1.0, %v6722_v19  ;;  %v3212_v38 = vsel %vm381_vm9, 1.0, %v6722_v19  ;;  %vm449_vm10 = vcmp.eq.s32.totalorder %v4944_v8, %v4990_v27 }
  0xa0   :  { %v1238_v37 = vand.u32 4294901760, %v1186_v29  ;;  %v428_v41 = vadd.f32 %v3211_v35, %v359_v31  ;;  %v429_v44 = vadd.f32 %v3212_v38, %v360_v32  ;;  %vm450_vm11 = vcmp.eq.s32.totalorder %v4947_v9, %v4990_v27 }
  0xa1   :  { %v5338_v42 = vsub.f32 %v1185_v24, %v1235_v33  ;;  %v3228_v49 = vsel %vm449_vm10, 1.0, %v6722_v19  ;;  %v3229_v4 = vsel %vm450_vm11, 1.0, %v6722_v19  ;;  %vm518_vm12 = vcmp.eq.s32.totalorder %v4944_v8, %v5000_v34 }
  0xa2   :  { %v5344_v50 = vpack.c.bf16 %v1238_v37, %v1235_v33  ;;  %v5346_v5 = vsub.f32 %v1186_v29, %v1238_v37  ;;  %v497_v51 = vadd.f32 %v3228_v49, %v428_v41  ;;  %v498_v54 = vadd.f32 %v3229_v4, %v429_v44 }
  0xa3   :  { %vm519_vm13 = vcmp.eq.s32.totalorder %v4947_v9, %v5000_v34  ;;  %v3245_v6 = vsel %vm518_vm12, 1.0, %v6722_v19  ;;  %vm587_vm14 = vcmp.eq.s32.totalorder %v4944_v8, %v5012_v39  ;;  %vm588_vm15 = vcmp.eq.s32.totalorder %v4947_v9, %v5012_v39 }
  0xa4   :  { %4305 = vmatpush3.bf16.msra.mxu1 %v5344_v50  ;;  %4377 = vmatpush3.bf16.msra.mxu0 %v5344_v50  ;;  %v3246_v7 = vsel %vm519_vm13, 1.0, %v6722_v19  ;;  %v566_v55 = vadd.f32 %v3245_v6, %v497_v51  ;;  %v3262_v56 = vsel %vm587_vm14, 1.0, %v6722_v19  ;;  %v3263_v57 = vsel %vm588_vm15, 1.0, %v6722_v19 }
  0xa5   :  { %4306 = vmatprep.subr.bf16.mxu1 %v6727_v1  ;;  %4378 = vmatprep.subr.bf16.mxu0 %v6727_v1  ;;  %v567_v58 = vadd.f32 %v3246_v7, %v498_v54  ;;  %vm656_vm0 = vcmp.eq.s32.totalorder %v4944_v8, %v5014_v40  ;;  %vm657_vm1 = vcmp.eq.s32.totalorder %v4947_v9, %v5014_v40  ;;  %v5367_v59 = vadd.s32 104, %v4926_v2 }
  0xa6   :  { %v635_v61 = vadd.f32 %v3262_v56, %v566_v55  ;;  %v3279_v62 = vsel %vm656_vm0, 1.0, %v6722_v19  ;;  %v3280_v63 = vsel %vm657_vm1, 1.0, %v6722_v19  ;;  %vm725_vm2 = vcmp.eq.s32.totalorder %v4944_v8, %v5024_v47 }
  0xa7   :  { %v636_v0 = vadd.f32 %v3263_v57, %v567_v58  ;;  %vm726_vm3 = vcmp.eq.s32.totalorder %v4947_v9, %v5024_v47  ;;  %v3296_v22 = vsel %vm725_vm2, 1.0, %v6722_v19  ;;  %vm794_vm4 = vcmp.eq.s32.totalorder %v4944_v8, %v5036_v52 }
  0xa8   :  { %v704_v23 = vadd.f32 %v3279_v62, %v635_v61  ;;  %v3297_v24 = vsel %vm726_vm3, 1.0, %v6722_v19  ;;  %vm795_vm5 = vcmp.eq.s32.totalorder %v4947_v9, %v5036_v52  ;;  %v3313_v25 = vsel %vm794_vm4, 1.0, %v6722_v19 }
  0xa9   :  { %v705_v28 = vadd.f32 %v3280_v63, %v636_v0  ;;  %v3314_v29 = vsel %vm795_vm5, 1.0, %v6722_v19  ;;  %vm863_vm6 = vcmp.eq.s32.totalorder %v4944_v8, %v5038_v53  ;;  %vm864_vm7 = vcmp.eq.s32.totalorder %v4947_v9, %v5038_v53 }
  0xaa   :  { %v773_v31 = vadd.f32 %v3296_v22, %v704_v23  ;;  %v3330_v32 = vsel %vm863_vm6, 1.0, %v6722_v19  ;;  %v3331_v33 = vsel %vm864_vm7, 1.0, %v6722_v19  ;;  %vm932_vm8 = vcmp.eq.s32.totalorder %v4944_v8, %v5048_v60 }
  0xab   :  { %v774_v35 = vadd.f32 %v3297_v24, %v705_v28  ;;  %vm933_vm9 = vcmp.eq.s32.totalorder %v4947_v9, %v5048_v60  ;;  %v3347_v38 = vsel %vm932_vm8, 1.0, %v6722_v19  ;;  %vm1001_vm10 = vcmp.eq.s32.totalorder %v4944_v8, %v5060_v20 }
  0xac   :  { %v842_v37 = vadd.f32 %v3313_v25, %v773_v31  ;;  %v3348_v41 = vsel %vm933_vm9, 1.0, %v6722_v19  ;;  %vm1002_vm11 = vcmp.eq.s32.totalorder %v4947_v9, %v5060_v20  ;;  %v3364_v44 = vsel %vm1001_vm10, 1.0, %v6722_v19 }
  0xad   :  { %v843_v49 = vadd.f32 %v3314_v29, %v774_v35  ;;  %v3365_v4 = vsel %vm1002_vm11, 1.0, %v6722_v19  ;;  %vm1070_vm12 = vcmp.eq.s32.totalorder %v4944_v8, %v5062_v21  ;;  %vm1071_vm13 = vcmp.eq.s32.totalorder %v4947_v9, %v5062_v21 }
  0xae   :  { %v911_v51 = vadd.f32 %v3330_v32, %v842_v37  ;;  %v3381_v54 = vsel %vm1070_vm12, 1.0, %v6722_v19  ;;  %v3382_v6 = vsel %vm1071_vm13, 1.0, %v6722_v19  ;;  %vm1139_vm14 = vcmp.eq.s32.totalorder %v4944_v8, %v5072_v30 }
  0xaf   :  { %v912_v7 = vadd.f32 %v3331_v33, %v843_v49  ;;  %vm1140_vm15 = vcmp.eq.s32.totalorder %v4947_v9, %v5072_v30  ;;  %v3398_v55 = vsel %vm1139_vm14, 1.0, %v6722_v19  ;;  %vm106_vm0 = vcmp.eq.s32.totalorder %v4950_v10, %v4964_v15 }
  0xb0   :  { %v980_v56 = vadd.f32 %v3347_v38, %v911_v51  ;;  %v3399_v57 = vsel %vm1140_vm15, 1.0, %v6722_v19  ;;  %vm107_vm1 = vcmp.eq.s32.totalorder %v4953_v11, %v4964_v15  ;;  %v3145_v58 = vsel %vm106_vm0, 1.0, %v6722_v19 }
  0xb1   :  { %v981_v61 = vadd.f32 %v3348_v41, %v912_v7  ;;  %v3146_v8 = vsel %vm107_vm1, 1.0, %v6722_v19  ;;  %vm175_vm2 = vcmp.eq.s32.totalorder %v4950_v10, %v4966_v16  ;;  %vm176_vm3 = vcmp.eq.s32.totalorder %v4953_v11, %v4966_v16 }
  0xb2   :  { %v1049_v9 = vadd.f32 %v3364_v44, %v980_v56  ;;  %v3162_v62 = vsel %vm175_vm2, 1.0, %v6722_v19  ;;  %v3163_v63 = vsel %vm176_vm3, 1.0, %v6722_v19  ;;  %vm244_vm4 = vcmp.eq.s32.totalorder %v4950_v10, %v4968_v17 }
  0xb3   :  { %v1050_v15 = vadd.f32 %v3365_v4, %v981_v61  ;;  %v223_v0 = vadd.f32 %v3162_v62, %v3145_v58  ;;  %v224_v22 = vadd.f32 %v3163_v63, %v3146_v8  ;;  %vm245_vm5 = vcmp.eq.s32.totalorder %v4953_v11, %v4968_v17 }
  0xb4   :  { %v1118_v23 = vadd.f32 %v3381_v54, %v1049_v9  ;;  %v3179_v24 = vsel %vm244_vm4, 1.0, %v6722_v19  ;;  %v3180_v25 = vsel %vm245_vm5, 1.0, %v6722_v19  ;;  %vm313_vm6 = vcmp.eq.s32.totalorder %v4950_v10, %v4978_v18 }
  0xb5   :  { %v1119_v16 = vadd.f32 %v3382_v6, %v1050_v15  ;;  %v292_v28 = vadd.f32 %v3179_v24, %v223_v0  ;;  %v293_v29 = vadd.f32 %v3180_v25, %v224_v22  ;;  %vm314_vm7 = vcmp.eq.s32.totalorder %v4953_v11, %v4978_v18 }
  0xb6   :  { %v1187_v31 = vadd.f32 %v3398_v55, %v1118_v23  ;;  %v3196_v32 = vsel %vm313_vm6, 1.0, %v6722_v19  ;;  %v3197_v33 = vsel %vm314_vm7, 1.0, %v6722_v19  ;;  %vm382_vm8 = vcmp.eq.s32.totalorder %v4950_v10, %v4988_v26 }
  0xb7   :  { %v1188_v17 = vadd.f32 %v3399_v57, %v1119_v16  ;;  %v361_v35 = vadd.f32 %v3196_v32, %v292_v28  ;;  %v362_v38 = vadd.f32 %v3197_v33, %v293_v29  ;;  %vm383_vm9 = vcmp.eq.s32.totalorder %v4953_v11, %v4988_v26 }
  0xb8   :  { %v1241_v37 = vand.u32 4294901760, %v1187_v31  ;;  %v3213_v41 = vsel %vm382_vm8, 1.0, %v6722_v19  ;;  %v3214_v44 = vsel %vm383_vm9, 1.0, %v6722_v19  ;;  %vm451_vm10 = vcmp.eq.s32.totalorder %v4950_v10, %v4990_v27 }
  0xb9   :  { %v1244_v18 = vand.u32 4294901760, %v1188_v17  ;;  %v430_v49 = vadd.f32 %v3213_v41, %v361_v35  ;;  %v431_v4 = vadd.f32 %v3214_v44, %v362_v38  ;;  %vm452_vm11 = vcmp.eq.s32.totalorder %v4953_v11, %v4990_v27  ;;  %v5521_v41 = vld [vmem:[#allocation2] ss:$0 sm:$0xff] }
  0xba   :  { %v5447_v51 = vsub.f32 %v1187_v31, %v1241_v37  ;;  %v3230_v54 = vsel %vm451_vm10, 1.0, %v6722_v19  ;;  %v3231_v26 = vsel %vm452_vm11, 1.0, %v6722_v19  ;;  %vm520_vm12 = vcmp.eq.s32.totalorder %v4950_v10, %v5000_v34 }
  0xbb   :  { %v5453_v6 = vpack.c.bf16 %v1244_v18, %v1241_v37  ;;  %v5455_v7 = vsub.f32 %v1188_v17, %v1244_v18  ;;  %v499_v55 = vadd.f32 %v3230_v54, %v430_v49  ;;  %v500_v56 = vadd.f32 %v3231_v26, %v431_v4  ;;  %v5530_v4 = vld [vmem:[#allocation2 + $0x1] ss:$0 sm:$0xff]  ;;  %v5538_v26 = vld [vmem:[#allocation2 + $0x2] ss:$0 sm:$0xff] }
  0xbc   :  { %vm521_vm13 = vcmp.eq.s32.totalorder %v4953_v11, %v5000_v34  ;;  %v3247_v27 = vsel %vm520_vm12, 1.0, %v6722_v19  ;;  %vm589_vm14 = vcmp.eq.s32.totalorder %v4950_v10, %v5012_v39  ;;  %vm590_vm15 = vcmp.eq.s32.totalorder %v4953_v11, %v5012_v39 }
  0xbd   :  { %4308 = vmatpush3.bf16.msra.mxu1 %v5453_v6  ;;  %4380 = vmatpush3.bf16.msra.mxu0 %v5453_v6  ;;  %v3248_v57 = vsel %vm521_vm13, 1.0, %v6722_v19  ;;  %v568_v58 = vadd.f32 %v3247_v27, %v499_v55  ;;  %v3264_v61 = vsel %vm589_vm14, 1.0, %v6722_v19  ;;  %v3265_v8 = vsel %vm590_vm15, 1.0, %v6722_v19 }
  0xbe   :  { %4309 = vmatprep.subr.bf16.mxu1 %v6727_v1  ;;  %4381 = vmatprep.subr.bf16.mxu0 %v6727_v1  ;;  %v569_v34 = vadd.f32 %v3248_v57, %v500_v56  ;;  %vm658_vm0 = vcmp.eq.s32.totalorder %v4950_v10, %v5014_v40  ;;  %vm659_vm1 = vcmp.eq.s32.totalorder %v4953_v11, %v5014_v40  ;;  %v5476_v39 = vadd.s32 112, %v4926_v2 }
  0xbf   :  { %v637_v9 = vadd.f32 %v3264_v61, %v568_v58  ;;  %v3281_v62 = vsel %vm658_vm0, 1.0, %v6722_v19  ;;  %v3282_v63 = vsel %vm659_vm1, 1.0, %v6722_v19  ;;  %vm727_vm2 = vcmp.eq.s32.totalorder %v4950_v10, %v5024_v47 }
  0xc0   :  { %v638_v15 = vadd.f32 %v3265_v8, %v569_v34  ;;  %vm728_vm3 = vcmp.eq.s32.totalorder %v4953_v11, %v5024_v47  ;;  %v3298_v0 = vsel %vm727_vm2, 1.0, %v6722_v19  ;;  %vm796_vm4 = vcmp.eq.s32.totalorder %v4950_v10, %v5036_v52  ;;  %v5546_v8 = vld [vmem:[#allocation2 + $0x3] ss:$0 sm:$0xff] }
  0xc1   :  { %v706_v40 = vadd.f32 %v3281_v62, %v637_v9  ;;  %v3299_v22 = vsel %vm728_vm3, 1.0, %v6722_v19  ;;  %vm797_vm5 = vcmp.eq.s32.totalorder %v4953_v11, %v5036_v52  ;;  %v3315_v23 = vsel %vm796_vm4, 1.0, %v6722_v19 }
  0xc2   :  { %v707_v24 = vadd.f32 %v3282_v63, %v638_v15  ;;  %v3316_v25 = vsel %vm797_vm5, 1.0, %v6722_v19  ;;  %vm865_vm6 = vcmp.eq.s32.totalorder %v4950_v10, %v5038_v53  ;;  %vm866_vm7 = vcmp.eq.s32.totalorder %v4953_v11, %v5038_v53 }
  0xc3   :  { %v775_v47 = vadd.f32 %v3298_v0, %v706_v40  ;;  %v3332_v16 = vsel %vm865_vm6, 1.0, %v6722_v19  ;;  %v3333_v28 = vsel %vm866_vm7, 1.0, %v6722_v19  ;;  %vm934_vm8 = vcmp.eq.s32.totalorder %v4950_v10, %v5048_v60  ;;  %v5554_v40 = vld [vmem:[#allocation2 + $0x4] ss:$0 sm:$0xff] }
  0xc4   :  { %v776_v52 = vadd.f32 %v3299_v22, %v707_v24  ;;  %vm935_vm9 = vcmp.eq.s32.totalorder %v4953_v11, %v5048_v60  ;;  %v3349_v29 = vsel %vm934_vm8, 1.0, %v6722_v19  ;;  %vm1003_vm10 = vcmp.eq.s32.totalorder %v4950_v10, %v5060_v20 }
  0xc5   :  { %v844_v31 = vadd.f32 %v3315_v23, %v775_v47  ;;  %v3350_v53 = vsel %vm935_vm9, 1.0, %v6722_v19  ;;  %vm1004_vm11 = vcmp.eq.s32.totalorder %v4953_v11, %v5060_v20  ;;  %v3366_v32 = vsel %vm1003_vm10, 1.0, %v6722_v19 }
  0xc6   :  { %v845_v33 = vadd.f32 %v3316_v25, %v776_v52  ;;  %v3367_v17 = vsel %vm1004_vm11, 1.0, %v6722_v19  ;;  %vm1072_vm12 = vcmp.eq.s32.totalorder %v4950_v10, %v5062_v21  ;;  %vm1073_vm13 = vcmp.eq.s32.totalorder %v4953_v11, %v5062_v21 }
  0xc7   :  { %v913_v60 = vadd.f32 %v3332_v16, %v844_v31  ;;  %v3383_v35 = vsel %vm1072_vm12, 1.0, %v6722_v19  ;;  %v3384_v38 = vsel %vm1073_vm13, 1.0, %v6722_v19  ;;  %vm1141_vm14 = vcmp.eq.s32.totalorder %v4950_v10, %v5072_v30 }
  0xc8   :  { %v914_v20 = vadd.f32 %v3333_v28, %v845_v33  ;;  %vm1142_vm15 = vcmp.eq.s32.totalorder %v4953_v11, %v5072_v30  ;;  %v3400_v37 = vsel %vm1141_vm14, 1.0, %v6722_v19  ;;  %vm108_vm0 = vcmp.eq.s32.totalorder %v4956_v12, %v5521_v41  ;;  %v5562_v28 = vld [vmem:[#allocation2 + $0x5] ss:$0 sm:$0xff] }
  0xc9   :  { %v982_v21 = vadd.f32 %v3349_v29, %v913_v60  ;;  %v3401_v44 = vsel %vm1142_vm15, 1.0, %v6722_v19  ;;  %vm109_vm1 = vcmp.eq.s32.totalorder %v4959_v13, %v5521_v41  ;;  %v3147_v18 = vsel %vm108_vm0, 1.0, %v6722_v19 }
  0xca   :  { %v983_v10 = vadd.f32 %v3350_v53, %v914_v20  ;;  %v3148_v49 = vsel %vm109_vm1, 1.0, %v6722_v19  ;;  %vm177_vm2 = vcmp.eq.s32.totalorder %v4956_v12, %v5530_v4  ;;  %vm178_vm3 = vcmp.eq.s32.totalorder %v4959_v13, %v5530_v4 }
  0xcb   :  { %v1051_v11 = vadd.f32 %v3366_v32, %v982_v21  ;;  %v3164_v30 = vsel %vm177_vm2, 1.0, %v6722_v19  ;;  %v3165_v54 = vsel %vm178_vm3, 1.0, %v6722_v19  ;;  %vm246_vm4 = vcmp.eq.s32.totalorder %v4956_v12, %v5538_v26  ;;  %v5583_v21 = vld [vmem:[#allocation2 + $0x7] ss:$0 sm:$0xff] }
  0xcc   :  { %v1052_v55 = vadd.f32 %v3367_v17, %v983_v10  ;;  %v225_v56 = vadd.f32 %v3164_v30, %v3147_v18  ;;  %v226_v27 = vadd.f32 %v3165_v54, %v3148_v49  ;;  %vm247_vm5 = vcmp.eq.s32.totalorder %v4959_v13, %v5538_v26  ;;  %v5572_v17 = vld [vmem:[#allocation2 + $0x6] ss:$0 sm:$0xff]  ;;  %v5596_v30 = vld [vmem:[#allocation2 + $0x8] ss:$0 sm:$0xff] }
  0xcd   :  { %v1120_v57 = vadd.f32 %v3383_v35, %v1051_v11  ;;  %v3181_v58 = vsel %vm246_vm4, 1.0, %v6722_v19  ;;  %v3182_v61 = vsel %vm247_vm5, 1.0, %v6722_v19  ;;  %vm315_vm6 = vcmp.eq.s32.totalorder %v4956_v12, %v5546_v8 }
  0xce   :  { %v1121_v34 = vadd.f32 %v3384_v38, %v1052_v55  ;;  %v294_v9 = vadd.f32 %v3181_v58, %v225_v56  ;;  %v295_v62 = vadd.f32 %v3182_v61, %v226_v27  ;;  %vm316_vm7 = vcmp.eq.s32.totalorder %v4959_v13, %v5546_v8 }
  0xcf   :  { %v1189_v63 = vadd.f32 %v3400_v37, %v1120_v57  ;;  %v3198_v15 = vsel %vm315_vm6, 1.0, %v6722_v19  ;;  %v3199_v0 = vsel %vm316_vm7, 1.0, %v6722_v19  ;;  %vm384_vm8 = vcmp.eq.s32.totalorder %v4956_v12, %v5554_v40  ;;  %v5607_v57 = vld [vmem:[#allocation2 + $0x9] ss:$0 sm:$0xff] }
  0xd0   :  { %v1190_v22 = vadd.f32 %v3401_v44, %v1121_v34  ;;  %v363_v23 = vadd.f32 %v3198_v15, %v294_v9  ;;  %v364_v24 = vadd.f32 %v3199_v0, %v295_v62  ;;  %vm385_vm9 = vcmp.eq.s32.totalorder %v4959_v13, %v5554_v40  ;;  %v5614_v34 = vld [vmem:[#allocation2 + $0xa] ss:$0 sm:$0xff] }
  0xd1   :  { %v1247_v25 = vand.u32 4294901760, %v1189_v63  ;;  %v3215_v47 = vsel %vm384_vm8, 1.0, %v6722_v19  ;;  %v3216_v16 = vsel %vm385_vm9, 1.0, %v6722_v19  ;;  %vm453_vm10 = vcmp.eq.s32.totalorder %v4956_v12, %v5562_v28 }
  0xd2   :  { %v1250_v52 = vand.u32 4294901760, %v1190_v22  ;;  %v432_v29 = vadd.f32 %v3215_v47, %v363_v23  ;;  %v433_v31 = vadd.f32 %v3216_v16, %v364_v24  ;;  %vm454_vm11 = vcmp.eq.s32.totalorder %v4959_v13, %v5562_v28  ;;  %v5631_v47 = vld [vmem:[#allocation2 + $0xc] ss:$0 sm:$0xff] }
  0xd3   :  { %v5568_v53 = vsub.f32 %v1189_v63, %v1247_v25  ;;  %v3232_v32 = vsel %vm453_vm10, 1.0, %v6722_v19  ;;  %v3233_v33 = vsel %vm454_vm11, 1.0, %v6722_v19  ;;  %vm522_vm12 = vcmp.eq.s32.totalorder %v4956_v12, %v5572_v17 }
  0xd4   :  { %v5576_v60 = vpack.c.bf16 %v1250_v52, %v1247_v25  ;;  %v5578_v35 = vsub.f32 %v1190_v22, %v1250_v52  ;;  %v501_v38 = vadd.f32 %v3232_v32, %v432_v29  ;;  %v502_v20 = vadd.f32 %v3233_v33, %v433_v31  ;;  %v5623_v22 = vld [vmem:[#allocation2 + $0xb] ss:$0 sm:$0xff]  ;;  %v5638_v29 = vld [vmem:[#allocation2 + $0xd] ss:$0 sm:$0xff] }
  0xd5   :  { %vm523_vm13 = vcmp.eq.s32.totalorder %v4959_v13, %v5572_v17  ;;  %v3249_v37 = vsel %vm522_vm12, 1.0, %v6722_v19  ;;  %vm591_vm14 = vcmp.eq.s32.totalorder %v4956_v12, %v5583_v21  ;;  %vm592_vm15 = vcmp.eq.s32.totalorder %v4959_v13, %v5583_v21 }
  0xd6   :  { %4311 = vmatpush3.bf16.msra.mxu1 %v5576_v60  ;;  %4383 = vmatpush3.bf16.msra.mxu0 %v5576_v60  ;;  %v3250_v44 = vsel %vm523_vm13, 1.0, %v6722_v19  ;;  %v570_v18 = vadd.f32 %v3249_v37, %v501_v38  ;;  %v3266_v10 = vsel %vm591_vm14, 1.0, %v6722_v19  ;;  %v3267_v49 = vsel %vm592_vm15, 1.0, %v6722_v19  ;;  %v5647_v37 = vld [vmem:[#allocation2 + $0xe] ss:$0 sm:$0xff] }
  0xd7   :  { %4312 = vmatprep.subr.bf16.mxu1 %v6727_v1  ;;  %4384 = vmatprep.subr.bf16.mxu0 %v6727_v1  ;;  %v571_v11 = vadd.f32 %v3250_v44, %v502_v20  ;;  %vm660_vm0 = vcmp.eq.s32.totalorder %v4956_v12, %v5596_v30  ;;  %vm661_vm1 = vcmp.eq.s32.totalorder %v4959_v13, %v5596_v30  ;;  %v5603_v54 = vadd.s32 120, %v4926_v2 }
  0xd8   :  { %v639_v55 = vadd.f32 %v3266_v10, %v570_v18  ;;  %v3283_v56 = vsel %vm660_vm0, 1.0, %v6722_v19  ;;  %v3284_v27 = vsel %vm661_vm1, 1.0, %v6722_v19  ;;  %vm729_vm2 = vcmp.eq.s32.totalorder %v4956_v12, %v5607_v57 }
  0xd9   :  { %v640_v58 = vadd.f32 %v3267_v49, %v571_v11  ;;  %vm730_vm3 = vcmp.eq.s32.totalorder %v4959_v13, %v5607_v57  ;;  %v3300_v61 = vsel %vm729_vm2, 1.0, %v6722_v19  ;;  %vm798_vm4 = vcmp.eq.s32.totalorder %v4956_v12, %v5614_v34  ;;  %v5655_v49 = vld [vmem:[#allocation2 + $0xf] ss:$0 sm:$0xff] }
  0xda   :  { %v708_v9 = vadd.f32 %v3283_v56, %v639_v55  ;;  %v3301_v62 = vsel %vm730_vm3, 1.0, %v6722_v19  ;;  %vm799_vm5 = vcmp.eq.s32.totalorder %v4959_v13, %v5614_v34  ;;  %v3317_v63 = vsel %vm798_vm4, 1.0, %v6722_v19 }
  0xdb   :  { %v709_v15 = vadd.f32 %v3284_v27, %v640_v58  ;;  %v3318_v0 = vsel %vm799_vm5, 1.0, %v6722_v19  ;;  %vm867_vm6 = vcmp.eq.s32.totalorder %v4956_v12, %v5623_v22  ;;  %vm868_vm7 = vcmp.eq.s32.totalorder %v4959_v13, %v5623_v22 }
  0xdc   :  { %v777_v23 = vadd.f32 %v3300_v61, %v708_v9  ;;  %v3334_v24 = vsel %vm867_vm6, 1.0, %v6722_v19  ;;  %v3335_v25 = vsel %vm868_vm7, 1.0, %v6722_v19  ;;  %vm936_vm8 = vcmp.eq.s32.totalorder %v4956_v12, %v5631_v47 }
  0xdd   :  { %v778_v16 = vadd.f32 %v3301_v62, %v709_v15  ;;  %vm937_vm9 = vcmp.eq.s32.totalorder %v4959_v13, %v5631_v47  ;;  %v3351_v52 = vsel %vm936_vm8, 1.0, %v6722_v19  ;;  %vm1005_vm10 = vcmp.eq.s32.totalorder %v4956_v12, %v5638_v29 }
  0xde   :  { %v846_v31 = vadd.f32 %v3317_v63, %v777_v23  ;;  %v3352_v32 = vsel %vm937_vm9, 1.0, %v6722_v19  ;;  %vm1006_vm11 = vcmp.eq.s32.totalorder %v4959_v13, %v5638_v29  ;;  %v3368_v33 = vsel %vm1005_vm10, 1.0, %v6722_v19 }
  0xdf   :  { %v847_v38 = vadd.f32 %v3318_v0, %v778_v16  ;;  %v3369_v20 = vsel %vm1006_vm11, 1.0, %v6722_v19  ;;  %vm1074_vm12 = vcmp.eq.s32.totalorder %v4956_v12, %v5647_v37  ;;  %vm1075_vm13 = vcmp.eq.s32.totalorder %v4959_v13, %v5647_v37 }
  0xe0   :  { %v915_v44 = vadd.f32 %v3334_v24, %v846_v31  ;;  %v3385_v18 = vsel %vm1074_vm12, 1.0, %v6722_v19  ;;  %v3386_v10 = vsel %vm1075_vm13, 1.0, %v6722_v19  ;;  %vm1143_vm14 = vcmp.eq.s32.totalorder %v4956_v12, %v5655_v49 }
  0xe1   :  { %v916_v11 = vadd.f32 %v3335_v25, %v847_v38  ;;  %vm1144_vm15 = vcmp.eq.s32.totalorder %v4959_v13, %v5655_v49  ;;  %v3402_v55 = vsel %vm1143_vm14, 1.0, %v6722_v19  ;;  %vm110_vm0 = vcmp.eq.s32.totalorder %v4962_v14, %v5521_v41 }
  0xe2   :  { %v984_v56 = vadd.f32 %v3351_v52, %v915_v44  ;;  %v3403_v27 = vsel %vm1144_vm15, 1.0, %v6722_v19  ;;  %vm111_vm1 = vcmp.eq.s32.totalorder %v5367_v59, %v5521_v41  ;;  %v3149_v58 = vsel %vm110_vm0, 1.0, %v6722_v19 }
  0xe3   :  { %v985_v61 = vadd.f32 %v3352_v32, %v916_v11  ;;  %v3150_v12 = vsel %vm111_vm1, 1.0, %v6722_v19  ;;  %vm179_vm2 = vcmp.eq.s32.totalorder %v4962_v14, %v5530_v4  ;;  %vm180_vm3 = vcmp.eq.s32.totalorder %v5367_v59, %v5530_v4 }
  0xe4   :  { %v1053_v13 = vadd.f32 %v3368_v33, %v984_v56  ;;  %v3166_v9 = vsel %vm179_vm2, 1.0, %v6722_v19  ;;  %v3167_v62 = vsel %vm180_vm3, 1.0, %v6722_v19  ;;  %vm248_vm4 = vcmp.eq.s32.totalorder %v4962_v14, %v5538_v26 }
  0xe5   :  { %v1054_v63 = vadd.f32 %v3369_v20, %v985_v61  ;;  %v227_v15 = vadd.f32 %v3166_v9, %v3149_v58  ;;  %v228_v0 = vadd.f32 %v3167_v62, %v3150_v12  ;;  %vm249_vm5 = vcmp.eq.s32.totalorder %v5367_v59, %v5538_v26 }
  0xe6   :  { %v1122_v23 = vadd.f32 %v3385_v18, %v1053_v13  ;;  %v3183_v24 = vsel %vm248_vm4, 1.0, %v6722_v19  ;;  %v3184_v25 = vsel %vm249_vm5, 1.0, %v6722_v19  ;;  %vm317_vm6 = vcmp.eq.s32.totalorder %v4962_v14, %v5546_v8 }
  0xe7   :  { %v1123_v16 = vadd.f32 %v3386_v10, %v1054_v63  ;;  %v296_v52 = vadd.f32 %v3183_v24, %v227_v15  ;;  %v297_v31 = vadd.f32 %v3184_v25, %v228_v0  ;;  %vm318_vm7 = vcmp.eq.s32.totalorder %v5367_v59, %v5546_v8 }
  0xe8   :  { %v1191_v32 = vadd.f32 %v3402_v55, %v1122_v23  ;;  %v3200_v33 = vsel %vm317_vm6, 1.0, %v6722_v19  ;;  %v3201_v38 = vsel %vm318_vm7, 1.0, %v6722_v19  ;;  %vm386_vm8 = vcmp.eq.s32.totalorder %v4962_v14, %v5554_v40 }
  0xe9   :  { %v1192_v20 = vadd.f32 %v3403_v27, %v1123_v16  ;;  %v365_v44 = vadd.f32 %v3200_v33, %v296_v52  ;;  %v366_v18 = vadd.f32 %v3201_v38, %v297_v31  ;;  %vm387_vm9 = vcmp.eq.s32.totalorder %v5367_v59, %v5554_v40 }
  0xea   :  { %v1253_v10 = vand.u32 4294901760, %v1191_v32  ;;  %v3217_v11 = vsel %vm386_vm8, 1.0, %v6722_v19  ;;  %v3218_v56 = vsel %vm387_vm9, 1.0, %v6722_v19  ;;  %vm455_vm10 = vcmp.eq.s32.totalorder %v4962_v14, %v5562_v28 }
  0xeb   :  { %v1256_v55 = vand.u32 4294901760, %v1192_v20  ;;  %v434_v58 = vadd.f32 %v3217_v11, %v365_v44  ;;  %v435_v61 = vadd.f32 %v3218_v56, %v366_v18  ;;  %vm456_vm11 = vcmp.eq.s32.totalorder %v5367_v59, %v5562_v28 }
  0xec   :  { %v5697_v27 = vsub.f32 %v1191_v32, %v1253_v10  ;;  %v3234_v12 = vsel %vm455_vm10, 1.0, %v6722_v19  ;;  %v3235_v13 = vsel %vm456_vm11, 1.0, %v6722_v19  ;;  %vm524_vm12 = vcmp.eq.s32.totalorder %v4962_v14, %v5572_v17 }
  0xed   :  { %v5703_v9 = vpack.c.bf16 %v1256_v55, %v1253_v10  ;;  %v5705_v62 = vsub.f32 %v1192_v20, %v1256_v55  ;;  %v503_v63 = vadd.f32 %v3234_v12, %v434_v58  ;;  %v504_v15 = vadd.f32 %v3235_v13, %v435_v61 }
  0xee   :  { %vm525_vm13 = vcmp.eq.s32.totalorder %v5367_v59, %v5572_v17  ;;  %v3251_v0 = vsel %vm524_vm12, 1.0, %v6722_v19  ;;  %vm593_vm14 = vcmp.eq.s32.totalorder %v4962_v14, %v5583_v21  ;;  %vm594_vm15 = vcmp.eq.s32.totalorder %v5367_v59, %v5583_v21 }
  0xef   :  { %4314 = vmatpush3.bf16.msra.mxu1 %v5703_v9  ;;  %4386 = vmatpush3.bf16.msra.mxu0 %v5703_v9  ;;  %v3252_v23 = vsel %vm525_vm13, 1.0, %v6722_v19  ;;  %v572_v24 = vadd.f32 %v3251_v0, %v503_v63  ;;  %v3268_v25 = vsel %vm593_vm14, 1.0, %v6722_v19  ;;  %v3269_v16 = vsel %vm594_vm15, 1.0, %v6722_v19 }
  0xf0   :  { %4315 = vmatprep.subr.bf16.mxu1 %v6727_v1  ;;  %4387 = vmatprep.subr.bf16.mxu0 %v6727_v1  ;;  %v573_v52 = vadd.f32 %v3252_v23, %v504_v15  ;;  %vm662_vm0 = vcmp.eq.s32.totalorder %v4962_v14, %v5596_v30  ;;  %vm663_vm1 = vcmp.eq.s32.totalorder %v5367_v59, %v5596_v30  ;;  %vm4818_vm3 = vmmov 0  }
  0xf1   :  { %v641_v31 = vadd.f32 %v3268_v25, %v572_v24  ;;  %v3285_v32 = vsel %vm662_vm0, 1.0, %v6722_v19  ;;  %v3286_v33 = vsel %vm663_vm1, 1.0, %v6722_v19  ;;  %vm731_vm2 = vcmp.eq.s32.totalorder %v4962_v14, %v5607_v57  ;;  %3687 = vmatprep.mubr.msk.f32.mxu1 %vm4818_vm3, %v6722_v19  ;;  %4008 = vmatprep.mubr.msk.f32.mxu0 %vm4818_vm3, %v6722_v19 }
  0xf2   :  { %v642_v38 = vadd.f32 %v3269_v16, %v573_v52  ;;  %vm732_vm4 = vcmp.eq.s32.totalorder %v5367_v59, %v5607_v57  ;;  %v3302_v20 = vsel %vm731_vm2, 1.0, %v6722_v19  ;;  %vm800_vm5 = vcmp.eq.s32.totalorder %v4962_v14, %v5614_v34 }
  0xf3   :  { %v710_v44 = vadd.f32 %v3285_v32, %v641_v31  ;;  %v3303_v18 = vsel %vm732_vm4, 1.0, %v6722_v19  ;;  %vm801_vm6 = vcmp.eq.s32.totalorder %v5367_v59, %v5614_v34  ;;  %v3319_v10 = vsel %vm800_vm5, 1.0, %v6722_v19 }
  0xf4   :  { %v711_v11 = vadd.f32 %v3286_v33, %v642_v38  ;;  %v3320_v56 = vsel %vm801_vm6, 1.0, %v6722_v19  ;;  %vm869_vm7 = vcmp.eq.s32.totalorder %v4962_v14, %v5623_v22  ;;  %vm870_vm8 = vcmp.eq.s32.totalorder %v5367_v59, %v5623_v22 }
  0xf5   :  { %v779_v55 = vadd.f32 %v3302_v20, %v710_v44  ;;  %v3336_v58 = vsel %vm869_vm7, 1.0, %v6722_v19  ;;  %v3337_v61 = vsel %vm870_vm8, 1.0, %v6722_v19  ;;  %vm938_vm9 = vcmp.eq.s32.totalorder %v4962_v14, %v5631_v47 }
  0xf6   :  { %v780_v12 = vadd.f32 %v3303_v18, %v711_v11  ;;  %vm939_vm10 = vcmp.eq.s32.totalorder %v5367_v59, %v5631_v47  ;;  %v3353_v13 = vsel %vm938_vm9, 1.0, %v6722_v19  ;;  %vm1007_vm11 = vcmp.eq.s32.totalorder %v4962_v14, %v5638_v29 }
  0xf7   :  { %v848_v63 = vadd.f32 %v3319_v10, %v779_v55  ;;  %v3354_v15 = vsel %vm939_vm10, 1.0, %v6722_v19  ;;  %vm1008_vm12 = vcmp.eq.s32.totalorder %v5367_v59, %v5638_v29  ;;  %v3370_v0 = vsel %vm1007_vm11, 1.0, %v6722_v19 }
  0xf8   :  { %v849_v23 = vadd.f32 %v3320_v56, %v780_v12  ;;  %v3371_v24 = vsel %vm1008_vm12, 1.0, %v6722_v19  ;;  %vm1076_vm13 = vcmp.eq.s32.totalorder %v4962_v14, %v5647_v37  ;;  %vm1077_vm14 = vcmp.eq.s32.totalorder %v5367_v59, %v5647_v37 }
  0xf9   :  { %v917_v25 = vadd.f32 %v3336_v58, %v848_v63  ;;  %v3387_v16 = vsel %vm1076_vm13, 1.0, %v6722_v19  ;;  %v3388_v52 = vsel %vm1077_vm14, 1.0, %v6722_v19  ;;  %vm1145_vm15 = vcmp.eq.s32.totalorder %v4962_v14, %v5655_v49 }
  0xfa   :  { %v918_v31 = vadd.f32 %v3337_v61, %v849_v23  ;;  %vm1146_vm0 = vcmp.eq.s32.totalorder %v5367_v59, %v5655_v49  ;;  %v3404_v32 = vsel %vm1145_vm15, 1.0, %v6722_v19  ;;  %vm112_vm1 = vcmp.eq.s32.totalorder %v5476_v39, %v5521_v41 }
  0xfb   :  { %v986_v33 = vadd.f32 %v3353_v13, %v917_v25  ;;  %v3405_v38 = vsel %vm1146_vm0, 1.0, %v6722_v19  ;;  %vm113_vm2 = vcmp.eq.s32.totalorder %v5603_v54, %v5521_v41  ;;  %v3151_v20 = vsel %vm112_vm1, 1.0, %v6722_v19 }
  0xfc   :  { %v987_v44 = vadd.f32 %v3354_v15, %v918_v31  ;;  %v3152_v14 = vsel %vm113_vm2, 1.0, %v6722_v19  ;;  %vm181_vm4 = vcmp.eq.s32.totalorder %v5476_v39, %v5530_v4  ;;  %vm182_vm5 = vcmp.eq.s32.totalorder %v5603_v54, %v5530_v4 }
  0xfd   :  { %v1055_v59 = vadd.f32 %v3370_v0, %v986_v33  ;;  %v3168_v18 = vsel %vm181_vm4, 1.0, %v6722_v19  ;;  %v3169_v10 = vsel %vm182_vm5, 1.0, %v6722_v19  ;;  %vm250_vm6 = vcmp.eq.s32.totalorder %v5476_v39, %v5538_v26 }
  0xfe   :  { %v1056_v41 = vadd.f32 %v3371_v24, %v987_v44  ;;  %v229_v11 = vadd.f32 %v3168_v18, %v3151_v20  ;;  %v230_v56 = vadd.f32 %v3169_v10, %v3152_v14  ;;  %vm251_vm7 = vcmp.eq.s32.totalorder %v5603_v54, %v5538_v26 }
  0xff   :  { %v1124_v55 = vadd.f32 %v3387_v16, %v1055_v59  ;;  %v3185_v58 = vsel %vm250_vm6, 1.0, %v6722_v19  ;;  %v3186_v61 = vsel %vm251_vm7, 1.0, %v6722_v19  ;;  %vm319_vm8 = vcmp.eq.s32.totalorder %v5476_v39, %v5546_v8 }
 0x100   :  { %v1125_v4 = vadd.f32 %v3388_v52, %v1056_v41  ;;  %v298_v12 = vadd.f32 %v3185_v58, %v229_v11  ;;  %v299_v13 = vadd.f32 %v3186_v61, %v230_v56  ;;  %vm320_vm9 = vcmp.eq.s32.totalorder %v5603_v54, %v5546_v8  ;;  %v1197_v58 = vld [vmem:[#allocation8] sm:$0xff] }
 0x101   :  { %v5795_v63 = vadd.f32 %v3404_v32, %v1124_v55  ;;  %v3202_v15 = vsel %vm319_vm8, 1.0, %v6722_v19  ;;  %v3203_v26 = vsel %vm320_vm9, 1.0, %v6722_v19  ;;  %vm388_vm10 = vcmp.eq.s32.totalorder %v5476_v39, %v5554_v40 }
 0x102   :  { %v5801_v0 = vadd.f32 %v3405_v38, %v1125_v4  ;;  %v367_v23 = vadd.f32 %v3202_v15, %v298_v12  ;;  %v368_v24 = vadd.f32 %v3203_v26, %v299_v13  ;;  %vm389_vm11 = vcmp.eq.s32.totalorder %v5603_v54, %v5554_v40 }
 0x103   :  { %v6721_v25 = vand.u32 4294901760, %v5795_v63  ;;  %v3219_v8 = vsel %vm388_vm10, 1.0, %v6722_v19  ;;  %v3220_v16 = vsel %vm389_vm11, 1.0, %v6722_v19  ;;  %vm457_vm12 = vcmp.eq.s32.totalorder %v5476_v39, %v5562_v28 }
 0x104   :  { %v6720_v52 = vand.u32 4294901760, %v5801_v0  ;;  %v436_v31 = vadd.f32 %v3219_v8, %v367_v23  ;;  %v437_v32 = vadd.f32 %v3220_v16, %v368_v24  ;;  %vm458_vm13 = vcmp.eq.s32.totalorder %v5603_v54, %v5562_v28 }
 0x105   :  { %v3236_v33 = vsel %vm457_vm12, 1.0, %v6722_v19  ;;  %v3237_v40 = vsel %vm458_vm13, 1.0, %v6722_v19  ;;  %vm526_vm14 = vcmp.eq.s32.totalorder %v5476_v39, %v5572_v17  ;;  %vm527_vm15 = vcmp.eq.s32.totalorder %v5603_v54, %v5572_v17 }
 0x106   :  { %v5821_v38 = vpack.c.bf16 %v6720_v52, %v6721_v25  ;;  %v505_v20 = vadd.f32 %v3236_v33, %v436_v31  ;;  %v506_v44 = vadd.f32 %v3237_v40, %v437_v32  ;;  %v3253_v28 = vsel %vm526_vm14, 1.0, %v6722_v19  ;;  %v1198_v32 = vld [vmem:[#allocation8 + $0x8] sm:$0xff] }
 0x107   :  { %vm595_vm0 = vcmp.eq.s32.totalorder %v5476_v39, %v5583_v21  ;;  %vm596_vm1 = vcmp.eq.s32.totalorder %v5603_v54, %v5583_v21  ;;  %v3254_v14 = vsel %vm527_vm15, 1.0, %v6722_v19  ;;  %vm664_vm2 = vcmp.eq.s32.totalorder %v5476_v39, %v5596_v30 }
 0x108   :  { %4317 = vmatpush3.bf16.msra.mxu1 %v5821_v38  ;;  %4389 = vmatpush3.bf16.msra.mxu0 %v5821_v38  ;;  %v574_v59 = vadd.f32 %v3253_v28, %v505_v20  ;;  %v3270_v18 = vsel %vm595_vm0, 1.0, %v6722_v19  ;;  %v3271_v10 = vsel %vm596_vm1, 1.0, %v6722_v19  ;;  %v575_v17 = vadd.f32 %v3254_v14, %v506_v44  ;;  %v1199_v14 = vld [vmem:[#allocation8 + $0x10] sm:$0xff] }
 0x109   :  { %4318 = vmatprep.subr.bf16.mxu1 %v6727_v1  ;;  %4390 = vmatprep.subr.bf16.mxu0 %v6727_v1  ;;  %vm665_vm4 = vcmp.eq.s32.totalorder %v5603_v54, %v5596_v30  ;;  %v3287_v41 = vsel %vm664_vm2, 1.0, %v6722_v19  ;;  %vm733_vm5 = vcmp.eq.s32.totalorder %v5476_v39, %v5607_v57  ;;  %vm734_vm6 = vcmp.eq.s32.totalorder %v5603_v54, %v5607_v57 }
 0x10a   :  { %v643_v21 = vadd.f32 %v3270_v18, %v574_v59  ;;  %v3288_v11 = vsel %vm665_vm4, 1.0, %v6722_v19  ;;  %v644_v56 = vadd.f32 %v3271_v10, %v575_v17  ;;  %v3304_v55 = vsel %vm733_vm5, 1.0, %v6722_v19 }
 0x10b   :  { %vm802_vm7 = vcmp.eq.s32.totalorder %v5476_v39, %v5614_v34  ;;  %v3305_v30 = vsel %vm734_vm6, 1.0, %v6722_v19  ;;  %vm803_vm8 = vcmp.eq.s32.totalorder %v5603_v54, %v5614_v34  ;;  %vm871_vm9 = vcmp.eq.s32.totalorder %v5476_v39, %v5623_v22 }
 0x10c   :  { %v712_v61 = vadd.f32 %v3287_v41, %v643_v21  ;;  %v713_v4 = vadd.f32 %v3288_v11, %v644_v56  ;;  %v3321_v12 = vsel %vm802_vm7, 1.0, %v6722_v19  ;;  %vm872_vm10 = vcmp.eq.s32.totalorder %v5603_v54, %v5623_v22 }
 0x10d   :  { %v3322_v13 = vsel %vm803_vm8, 1.0, %v6722_v19  ;;  %vm940_vm11 = vcmp.eq.s32.totalorder %v5476_v39, %v5631_v47  ;;  %v5861_v15 = vand.u32 4294901760, %v1197_v58  ;;  %v3338_v34 = vsel %vm871_vm9, 1.0, %v6722_v19 }
 0x10e   :  { %v781_v57 = vadd.f32 %v3304_v55, %v712_v61  ;;  %v782_v26 = vadd.f32 %v3305_v30, %v713_v4  ;;  %vm941_vm12 = vcmp.eq.s32.totalorder %v5603_v54, %v5631_v47  ;;  %vm1009_vm13 = vcmp.eq.s32.totalorder %v5476_v39, %v5638_v29 }
 0x10f   :  { %v3339_v22 = vsel %vm872_vm10, 1.0, %v6722_v19  ;;  %vm1010_vm14 = vcmp.eq.s32.totalorder %v5603_v54, %v5638_v29  ;;  %v3355_v8 = vsel %vm940_vm11, 1.0, %v6722_v19  ;;  %v3356_v16 = vsel %vm941_vm12, 1.0, %v6722_v19 }
 0x110   :  { %v850_v23 = vadd.f32 %v3321_v12, %v781_v57  ;;  %v851_v24 = vadd.f32 %v3322_v13, %v782_v26  ;;  %vm1078_vm15 = vcmp.eq.s32.totalorder %v5476_v39, %v5647_v37  ;;  %v3372_v47 = vsel %vm1009_vm13, 1.0, %v6722_v19  ;;  %v1200_v12 = vld [vmem:[#allocation8 + $0x18] sm:$0xff] }
 0x111   :  { %vm1079_vm0 = vcmp.eq.s32.totalorder %v5603_v54, %v5647_v37  ;;  %vm1147_vm1 = vcmp.eq.s32.totalorder %v5476_v39, %v5655_v49  ;;  %v3373_v29 = vsel %vm1010_vm14, 1.0, %v6722_v19  ;;  %v3389_v40 = vsel %vm1078_vm15, 1.0, %v6722_v19 }
 0x112   :  { %v919_v31 = vadd.f32 %v3338_v34, %v850_v23  ;;  %v920_v33 = vadd.f32 %v3339_v22, %v851_v24  ;;  %v5883_v20 = vsub.f32 %v1197_v58, %v5861_v15  ;;  %vm1148_vm2 = vcmp.eq.s32.totalorder %v5603_v54, %v5655_v49 }
 0x113   :  { %v1556_v28 = vand.u32 4294901760, %v5140_v46  ;;  %v1563_v37 = vand.u32 4294901760, %v5142_v48  ;;  %v3390_v39 = vsel %vm1079_vm0, 1.0, %v6722_v19  ;;  %v3406_v18 = vsel %vm1147_vm1, 1.0, %v6722_v19 }
 0x114   :  { %6752 = vst [vmem:[#allocation16_spill] sm:$0xff] %v5883_v20  ;;  %v988_v44 = vadd.f32 %v3355_v8, %v919_v31  ;;  %v989_v59 = vadd.f32 %v3356_v16, %v920_v33  ;;  %v5891_v10 = vand.u32 4294901760, %v1198_v32  ;;  %v3407_v54 = vsel %vm1148_vm2, 1.0, %v6722_v19 }
 0x115   :  { %v1557_v21 = vsub.f32 %v5140_v46, %v1556_v28  ;;  %v1564_v41 = vsub.f32 %v5142_v48, %v1563_v37  ;;  %v4394_v11 = vpack.c.bf16 %v1563_v37, %v1556_v28  ;;  %v1305_v49 = vand.u32 4294901760, %v5883_v20 }
 0x116   :  { %v1057_v17 = vadd.f32 %v3372_v47, %v988_v44  ;;  %v1058_v56 = vadd.f32 %v3373_v29, %v989_v59  ;;  %v5897_v55 = vand.u32 4294901760, %v1199_v14  ;;  %v5900_v4 = vsub.f32 %v1198_v32, %v5891_v10 }
 0x117   :  { %v1558_v61 = vand.u32 4294901760, %v1557_v21  ;;  %v1565_v30 = vand.u32 4294901760, %v1564_v41  ;;  %v1570_v34 = vand.u32 4294901760, %v5232_v36  ;;  %v5910_v24 = vand.u32 4294901760, %v1200_v12 }
 0x118   :  { %v1126_v58 = vadd.f32 %v3389_v40, %v1057_v17  ;;  %6753 = vst [vmem:[#allocation17_spill] sm:$0xff] %v5900_v4  ;;  %v1127_v57 = vadd.f32 %v3390_v39, %v1058_v56  ;;  %v5908_v22 = vsub.f32 %v1199_v14, %v5897_v55  ;;  %v1577_v8 = vand.u32 4294901760, %v5238_v45  ;;  %v1201_v40 = vld [vmem:[#allocation8 + $0x20] sm:$0xff] }
 0x119   :  { %v4322_v26 = vpack.c.bf16 %v1565_v30, %v1558_v61  ;;  %v1306_v31 = vsub.f32 %v5883_v20, %v1305_v49  ;;  %v1315_v47 = vand.u32 4294901760, %v5900_v4  ;;  %v1571_v32 = vsub.f32 %v5232_v36, %v1570_v34 }
 0x11a   :  { %v5902_v13 = vadd.f32 %v3406_v18, %v1126_v58  ;;  %v5905_v23 = vadd.f32 %v3407_v54, %v1127_v57  ;;  %6754 = vst [vmem:[#allocation18_spill] sm:$0xff] %v5908_v22  ;;  %v1578_v29 = vsub.f32 %v5238_v45, %v1577_v8  ;;  %v4397_v28 = vpack.c.bf16 %v1577_v8, %v1570_v34  ;;  %v1202_v54 = vld [vmem:[#allocation8 + $0x28] sm:$0xff] }
 0x11b   :  { %v1572_v44 = vand.u32 4294901760, %v1571_v32  ;;  %v1325_v14 = vand.u32 4294901760, %v5908_v22  ;;  %v5927_v59 = vsub.f32 %v1200_v12, %v5910_v24  ;;  %v1307_v18 = vand.u32 4294901760, %v1306_v31 }
 0x11c   :  { %v6719_v16 = vand.u32 4294901760, %v5902_v13  ;;  %v6718_v33 = vand.u32 4294901760, %v5905_v23  ;;  %v1579_v39 = vand.u32 4294901760, %v1578_v29  ;;  %v1316_v17 = vsub.f32 %v5900_v4, %v1315_v47 }
 0x11d   :  { %6755 = vst [vmem:[#allocation19_spill] sm:$0xff] %v5927_v59  ;;  %v5930_v21 = vand.u32 4294901760, %v1201_v40  ;;  %v1584_v41 = vand.u32 4294901760, %v5338_v42  ;;  %v1591_v58 = vand.u32 4294901760, %v5346_v5  ;;  %v1326_v30 = vsub.f32 %v5908_v22, %v1325_v14 }
 0x11e   :  { %v5923_v37 = vpack.c.bf16 %v6718_v33, %v6719_v16  ;;  %v4325_v56 = vpack.c.bf16 %v1579_v39, %v1572_v44  ;;  %v1335_v12 = vand.u32 4294901760, %v5927_v59  ;;  %v1317_v8 = vand.u32 4294901760, %v1316_v17  ;;  %v1203_v44 = vld [vmem:[#allocation8 + $0x30] sm:$0xff] }
 0x11f   :  { %v1585_v61 = vsub.f32 %v5338_v42, %v1584_v41  ;;  %v1592_v57 = vsub.f32 %v5346_v5, %v1591_v58  ;;  %v4400_v34 = vpack.c.bf16 %v1591_v58, %v1584_v41  ;;  %v5943_v31 = vsub.f32 %v1201_v40, %v5930_v21 }
 0x120   :  { %4320 = vmatpush3.bf16.msra.mxu1 %v5923_v37  ;;  %4392 = vmatpush3.bf16.msra.mxu0 %v5923_v37  ;;  %v5945_v32 = vand.u32 4294901760, %v1202_v54  ;;  %v1336_v17 = vsub.f32 %v5927_v59, %v1335_v12  ;;  %v5960_v58 = vand.u32 4294901760, %v1203_v44  ;;  %v1612_v33 = vand.u32 4294901760, %v5568_v53 }
 0x121   :  { %4321 = vmatprep.subr.bf16.mxu1 %v6727_v1  ;;  %4393 = vmatprep.subr.bf16.mxu0 %v6727_v1  ;;  %6756 = vst [vmem:[#allocation20_spill] sm:$0xff] %v5943_v31  ;;  %v1586_v29 = vand.u32 4294901760, %v1585_v61  ;;  %v1593_v39 = vand.u32 4294901760, %v1592_v57  ;;  %v1204_v61 = vld [vmem:[#allocation8 + $0x38] sm:$0xff]  ;;  %v6764_v2 = vmov 0.0  }
 0x122   :  { %v5958_v41 = vsub.f32 %v1202_v54, %v5945_v32  ;;  %v5970_v54 = vand.u32 4294901760, %v1204_v61 }
 0x123   :  { %3688 = vmatmul.mubr.f32.vlgmr.msra.gmra.mrb[0].mxu1 %v1307_v18  ;;  %4009 = vmatmul.mubr.f32.vlgmr.msra.gmra.mrb[0].mxu0 %v1305_v49  ;;  %v1598_v18 = vand.u32 4294901760, %v5447_v51  ;;  %v1327_v49 = vand.u32 4294901760, %v1326_v30  ;;  %v4328_v40 = vpack.c.bf16 %v1593_v39, %v1586_v29  ;;  %v1337_v29 = vand.u32 4294901760, %v1336_v17 }
 0x124   :  { %4323 = vmatpush3.bf16.msra.mxu1 %v4322_v26  ;;  %4395 = vmatpush3.bf16.msra.mxu0 %v4394_v11  ;;  %v1605_v11 = vand.u32 4294901760, %v5455_v7  ;;  %v1345_v26 = vand.u32 4294901760, %v5943_v31  ;;  %6757 = vst [vmem:[#allocation21_spill] sm:$0xff] %v5958_v41  ;;  %v1355_v52 = vand.u32 4294901760, %v5958_v41 }
 0x125   :  { %3690 = vmatprep.mubr.msk.f32.mxu1 %vm4818_vm3, %v6722_v19  ;;  %4011 = vmatprep.mubr.msk.f32.mxu0 %vm4818_vm3, %v6722_v19  ;;  %v1599_v30 = vsub.f32 %v5447_v51, %v1598_v18 }
 0x126   :  { %4324 = vmatprep.subr.bf16.mxu1 %v6727_v1  ;;  %4396 = vmatprep.subr.bf16.mxu0 %v6727_v1  ;;  %v1606_v57 = vsub.f32 %v5455_v7, %v1605_v11  ;;  %v1346_v16 = vsub.f32 %v5943_v31, %v1345_v26 }
 0x127   :  { %3691 = vmatmul.mubr.f32.gmra.mrb[2].mxu1 %v1317_v8  ;;  %4012 = vmatmul.mubr.f32.gmra.mrb[2].mxu0 %v1315_v47  ;;  %v4403_v8 = vpack.c.bf16 %v1605_v11, %v1598_v18  ;;  %v1600_v47 = vand.u32 4294901760, %v1599_v30  ;;  %v1619_v18 = vand.u32 4294901760, %v5578_v35 }
 0x128   :  { %3693 = vmatprep.mubr.msk.f32.mxu1 %vm4818_vm3, %v6722_v19  ;;  %4014 = vmatprep.mubr.msk.f32.mxu0 %vm4818_vm3, %v6722_v19  ;;  %v1607_v39 = vand.u32 4294901760, %v1606_v57 }
 0x129   :  { %4326 = vmatpush3.bf16.msra.mxu1 %v4325_v56  ;;  %4398 = vmatpush3.bf16.msra.mxu0 %v4397_v28  ;;  %v5976_v56 = vsub.f32 %v1203_v44, %v5960_v58  ;;  %v1205_v28 = vld [vmem:[#allocation8 + $0x40] sm:$0xff]  ;;  %v4406_v11 = vpack.c.bf16 %v1619_v18, %v1612_v33  ;;  %v5986_v44 = vsub.f32 %v1204_v61, %v5970_v54 }
 0x12a   :  { %4327 = vmatprep.subr.bf16.mxu1 %v6727_v1  ;;  %4399 = vmatprep.subr.bf16.mxu0 %v6727_v1  ;;  %v4331_v17 = vpack.c.bf16 %v1607_v39, %v1600_v47  ;;  %v5988_v30 = vand.u32 4294901760, %v1205_v28  ;;  %v1347_v47 = vand.u32 4294901760, %v1346_v16  ;;  %v1356_v39 = vsub.f32 %v5958_v41, %v1355_v52 }
 0x12b   :  { %3694 = vmatmul.mubr.f32.gmra.mrb[4].mxu1 %v1327_v49  ;;  %4015 = vmatmul.mubr.f32.gmra.mrb[4].mxu0 %v1325_v14  ;;  %6758 = vst [vmem:[#allocation22_spill] sm:$0xff] %v5976_v56  ;;  %v1613_v49 = vsub.f32 %v5568_v53, %v1612_v33  ;;  %v1620_v14 = vsub.f32 %v5578_v35, %v1619_v18  ;;  %6759 = vst [vmem:[#allocation23_spill] sm:$0xff] %v5986_v44  ;;  %v6725_v61 = vand.u32 4294901760, %v5986_v44  ;;  %v6767_v41 = vmov 0.0|0.0  }
 0x12c   :  { %3696 = vmatprep.mubr.msk.f32.mxu1 %vm4818_vm3, %v6722_v19  ;;  %4017 = vmatprep.mubr.msk.f32.mxu0 %vm4818_vm3, %v6722_v19 }
 0x12d   :  { %4329 = vmatpush3.bf16.msra.mxu1 %v4328_v40  ;;  %4401 = vmatpush3.bf16.msra.mxu0 %v4400_v34  ;;  %v1614_v57 = vand.u32 4294901760, %v1613_v49  ;;  %v1365_v34 = vand.u32 4294901760, %v5976_v56  ;;  %v1206_v40 = vld [vmem:[#allocation8 + $0x48] sm:$0xff]  ;;  %v1621_v25 = vand.u32 4294901760, %v1620_v14  ;;  %v1207_v49 = vld [vmem:[#allocation8 + $0x50] sm:$0xff] }
 0x12e   :  { %4330 = vmatprep.subr.bf16.mxu1 %v6727_v1  ;;  %4402 = vmatprep.subr.bf16.mxu0 %v6727_v1  ;;  %v6002_v16 = vand.u32 4294901760, %v1206_v40 }
 0x12f   :  { %3697 = vmatmul.mubr.f32.gmra.mrb[6].mxu1 %v1337_v29  ;;  %4018 = vmatmul.mubr.f32.gmra.mrb[6].mxu0 %v1335_v12  ;;  %v4334_v33 = vpack.c.bf16 %v1621_v25, %v1614_v57  ;;  %v6000_v12 = vsub.f32 %v1205_v28, %v5988_v30  ;;  %v1357_v29 = vand.u32 4294901760, %v1356_v39  ;;  %v1366_v18 = vsub.f32 %v5976_v56, %v1365_v34 }
 0x130   :  { %3699 = vmatprep.mubr.msk.f32.mxu1 %vm4818_vm3, %v6722_v19  ;;  %4020 = vmatprep.mubr.msk.f32.mxu0 %vm4818_vm3, %v6722_v19  ;;  %v1633_v25 = vand.u32 4294901760, %v5705_v62  ;;  %v6765_v56 = vand.u32 4294901760, %v5902_v13 }
 0x131   :  { %4332 = vmatpush3.bf16.msra.mxu1 %v4331_v17  ;;  %4404 = vmatpush3.bf16.msra.mxu0 %v4403_v8  ;;  %6760 = vst [vmem:[#allocation24_spill] sm:$0xff] %v6000_v12  ;;  %v1626_v17 = vand.u32 4294901760, %v5697_v27  ;;  %v6761_v8 = vand.u32 4294901760, %v5795_v63  ;;  %v1385_v39 = vand.u32 4294901760, %v6000_v12 }
 0x132   :  { %4333 = vmatprep.subr.bf16.mxu1 %v6727_v1  ;;  %4405 = vmatprep.subr.bf16.mxu0 %v6727_v1 }
 0x133   :  { %3700 = vmatmul.mubr.f32.gmra.mrb[8].mxu1 %v1347_v47  ;;  %4021 = vmatmul.mubr.f32.gmra.mrb[8].mxu0 %v1345_v26  ;;  %v6012_v28 = vsub.f32 %v5795_v63, %v6761_v8  ;;  %v6762_v26 = vand.u32 4294901760, %v5801_v0  ;;  %v1627_v57 = vsub.f32 %v5697_v27, %v1626_v17  ;;  %v1634_v47 = vsub.f32 %v5705_v62, %v1633_v25 }
 0x134   :  { %3702 = vmatprep.mubr.msk.f32.mxu1 %vm4818_vm3, %v6722_v19  ;;  %4023 = vmatprep.mubr.msk.f32.mxu0 %vm4818_vm3, %v6722_v19  ;;  %v1376_v63 = vsub.f32 %v5986_v44, %v6725_v61  ;;  %v6030_v8 = vsub.f32 %v1206_v40, %v6002_v16  ;;  %v1208_v40 = vld [vmem:[#allocation8 + $0x58] sm:$0xff] }
 0x135   :  { %v6021_v14 = vsub.f32 %v5801_v0, %v6762_v26  ;;  %4335 = vmatpush3.bf16.msra.mxu1 %v4334_v33  ;;  %4407 = vmatpush3.bf16.msra.mxu0 %v4406_v11  ;;  %v4409_v0 = vpack.c.bf16 %v1633_v25, %v1626_v17  ;;  %v1367_v11 = vand.u32 4294901760, %v1366_v18  ;;  %v6034_v33 = vand.u32 4294901760, %v1207_v49 }
 0x136   :  { %6763 = vst [vmem:[#allocation25_spill] sm:$0xff] %v6030_v8  ;;  %4336 = vmatprep.subr.bf16.mxu1 %v6727_v1  ;;  %4408 = vmatprep.subr.bf16.mxu0 %v6727_v1  ;;  %v1628_v26 = vand.u32 4294901760, %v1627_v57  ;;  %v1635_v19 = vand.u32 4294901760, %v1634_v47  ;;  %v1640_v61 = vand.u32 4294901760, %v6012_v28  ;;  %v6044_v17 = vsub.f32 %v5902_v13, %v6765_v56 }
 0x137   :  { %3703 = vmatmul.mubr.f32.gmra.mrb[10].mxu1 %v1357_v29  ;;  %4024 = vmatmul.mubr.f32.gmra.mrb[10].mxu0 %v1355_v52  ;;  %v6766_v52 = vand.u32 4294901760, %v5905_v23  ;;  %v1647_v25 = vand.u32 4294901760, %v6021_v14  ;;  %v1377_v57 = vand.u32 4294901760, %v1376_v63  ;;  %v1386_v47 = vsub.f32 %v6000_v12, %v1385_v39 }
 0x138   :  { %3705 = vmatprep.mubr.msk.f32.mxu1 %vm4818_vm3, %v6764_v2  ;;  %4026 = vmatprep.mubr.msk.f32.mxu0 %vm4818_vm3, %v6764_v2  ;;  %v4337_v18 = vpack.c.bf16 %v1635_v19, %v1628_v26  ;;  %v1395_v1 = vand.u32 4294901760, %v6030_v8  ;;  %v1641_v31 = vsub.f32 %v6012_v28, %v1640_v61  ;;  %v6057_v13 = vsub.f32 %v1207_v49, %v6034_v33  ;;  %v1209_v19 = vld [vmem:[#allocation8 + $0x60] sm:$0xff] }
 0x139   :  { %v6049_v29 = vsub.f32 %v5905_v23, %v6766_v52  ;;  %4410 = vmatpush3.bf16.msra.mxu0 %v4409_v0  ;;  %v6059_v23 = vand.u32 4294901760, %v1208_v40  ;;  %v1648_v56 = vsub.f32 %v6021_v14, %v1647_v25  ;;  %v4412_v0 = vpack.c.bf16 %v1647_v25, %v1640_v61 }
 0x13a   :  { %4411 = vmatprep.subr.bf16.mxu0 %v6767_v41  ;;  %6768 = vst [vmem:[#allocation26_spill] sm:$0xff] %v6057_v13  ;;  %v1642_v63 = vand.u32 4294901760, %v1641_v31  ;;  %4338 = vmatpush3.bf16.msra.mxu1 %v4337_v18  ;;  %v1654_v49 = vand.u32 4294901760, %v6044_v17  ;;  %v6769_v52 = vand.u32 4294901760, %v5986_v44  ;;  %v1396_v31 = vsub.f32 %v6030_v8, %v1395_v1 }
 0x13b   :  { %3706 = vmatmul.mubr.f32.gmra.mrb[12].mxu1 %v1367_v11  ;;  %4027 = vmatmul.mubr.f32.gmra.mrb[12].mxu0 %v1365_v34  ;;  %v1649_v26 = vand.u32 4294901760, %v1648_v56  ;;  %v1387_v34 = vand.u32 4294901760, %v1386_v47  ;;  %v6066_v11 = vand.u32 4294901760, %v1209_v19  ;;  %v1661_v61 = vand.u32 4294901760, %v6049_v29  ;;  %v1210_v47 = vld [vmem:[#allocation8 + $0x68] sm:$0xff] }
 0x13c   :  { %3708 = vmatprep.mubr.msk.f32.mxu1 %vm4818_vm3, %v6764_v2  ;;  %4029 = vmatprep.mubr.msk.f32.mxu0 %vm4818_vm3, %v6764_v2  ;;  %v1405_v18 = vand.u32 4294901760, %v6057_v13  ;;  %v6077_v25 = vsub.f32 %v1208_v40, %v6059_v23  ;;  %v6088_v12 = vand.u32 4294901760, %v1210_v47 }
 0x13d   :  { %4413 = vmatpush3.bf16.msra.mxu0 %v4412_v0  ;;  %4339 = vmatprep.subr.bf16.mxu1 %v6767_v41  ;;  %v4340_v56 = vpack.c.bf16 %v1649_v26, %v1642_v63  ;;  %v1662_v0 = vsub.f32 %v6049_v29, %v1661_v61  ;;  %v6086_v8 = vsub.f32 %v1209_v19, %v6066_v11  ;;  %v1397_v26 = vand.u32 4294901760, %v1396_v31  ;;  %v1211_v19 = vld [vmem:[#allocation8 + $0x70] sm:$0xff] }
 0x13e   :  { %4414 = vmatprep.subr.bf16.mxu0 %v6767_v41  ;;  %6770 = vst [vmem:[#allocation27_spill] sm:$0xff] %v6077_v25  ;;  %v1406_v44 = vsub.f32 %v6057_v13, %v1405_v18  ;;  %v1415_v59 = vand.u32 4294901760, %v6077_v25 }
 0x13f   :  { %3709 = vmatmul.mubr.f32.gmra.mrb[14].mxu1 %v1377_v57  ;;  %4030 = vmatmul.mubr.f32.gmra.mrb[14].mxu0 %v6769_v52  ;;  %v1655_v57 = vsub.f32 %v6044_v17, %v1654_v49  ;;  %v4415_v52 = vpack.c.bf16 %v1661_v61, %v1654_v49  ;;  %6771 = vst [vmem:[#allocation28_spill] sm:$0xff] %v6086_v8  ;;  %v1663_v63 = vand.u32 4294901760, %v1662_v0  ;;  %v1213_v61 = vld [vmem:[#allocation8 + $0x80] sm:$0xff] }
 0x140   :  { %3711 = vmatprep.mubr.msk.f32.mxu1 %vm4818_vm3, %v6764_v2  ;;  %4032 = vmatprep.mubr.msk.f32.mxu0 %vm4818_vm3, %v6764_v2  ;;  %v6109_v0 = vsub.f32 %v1210_v47, %v6088_v12 }
 0x141   :  { %4341 = vmatpush3.bf16.msra.mxu1 %v4340_v56  ;;  %v1656_v40 = vand.u32 4294901760, %v1655_v57  ;;  %4416 = vmatpush3.bf16.msra.mxu0 %v4415_v52  ;;  %v1425_v57 = vand.u32 4294901760, %v6086_v8  ;;  %v6113_v52 = vand.u32 4294901760, %v1211_v19 }
 0x142   :  { %4342 = vmatprep.subr.bf16.mxu1 %v6767_v41  ;;  %6772 = vst [vmem:[#allocation29_spill] sm:$0xff] %v6109_v0  ;;  %4417 = vmatprep.subr.bf16.mxu0 %v6767_v41 }
 0x143   :  { %3712 = vmatmul.mubr.f32.gmra.mrb[16].mxu1 %v1387_v34  ;;  %4033 = vmatmul.mubr.f32.gmra.mrb[16].mxu0 %v1385_v39  ;;  %v4343_v49 = vpack.c.bf16 %v1663_v63, %v1656_v40  ;;  %v1407_v40 = vand.u32 4294901760, %v1406_v44  ;;  %v1416_v63 = vsub.f32 %v6077_v25, %v1415_v59  ;;  %v1212_v39 = vld [vmem:[#allocation8 + $0x78] sm:$0xff]  ;;  %v1426_v44 = vsub.f32 %v6086_v8, %v1425_v57  ;;  %v1214_v34 = vld [vmem:[#allocation8 + $0x88] sm:$0xff]  ;;  %v1215_v8 = vld [vmem:[#allocation8 + $0x90] sm:$0xff] }
 0x144   :  { %3714 = vmatprep.mubr.msk.f32.mxu1 %vm4818_vm3, %v6764_v2  ;;  %4035 = vmatprep.mubr.msk.f32.mxu0 %vm4818_vm3, %v6764_v2  ;;  %v6122_v47 = vand.u32 4294901760, %v1212_v39 }
 0x145   :  { %4344 = vmatpush3.bf16.msra.mxu1 %v4343_v49  ;;  %v6127_v49 = vsub.f32 %v1211_v19, %v6113_v52 }
 0x146   :  { %4345 = vmatprep.subr.bf16.mxu1 %v6767_v41  ;;  %v6134_v31 = vsub.f32 %v1212_v39, %v6122_v47 }
 0x147   :  { %3715 = vmatmul.mubr.f32.gmra.mrb[18].mxu1 %v1397_v26  ;;  %4036 = vmatmul.mubr.f32.gmra.mrb[18].mxu0 %v1395_v1  ;;  %v1417_v1 = vand.u32 4294901760, %v1416_v63  ;;  %v1435_v26 = vand.u32 4294901760, %v6109_v0  ;;  %6773 = vst [vmem:[#allocation30_spill] sm:$0xff] %v6127_v49  ;;  %v1445_v19 = vand.u32 4294901760, %v6127_v49 }
 0x148   :  { %3717 = vmatprep.mubr.msk.f32.mxu1 %vm4818_vm3, %v6764_v2  ;;  %4038 = vmatprep.mubr.msk.f32.mxu0 %vm4818_vm3, %v6764_v2  ;;  %6774 = vst [vmem:[#allocation31_spill] sm:$0xff] %v6134_v31  ;;  %v1455_v56 = vand.u32 4294901760, %v6134_v31 }
 0x149   :  { %v1436_v63 = vsub.f32 %v6109_v0, %v1435_v26  ;;  %v1216_v0 = vld [vmem:[#allocation8 + $0x98] sm:$0xff] }
 0x14a   :  { %v6169_v13 = vand.u32 4294901760, %v1216_v0 }
 0x14b   :  { %3718 = vmatmul.mubr.f32.gmra.mrb[20].mxu1 %v1407_v40  ;;  %4039 = vmatmul.mubr.f32.gmra.mrb[20].mxu0 %v1405_v18  ;;  %v6136_v40 = vand.u32 4294901760, %v1213_v61  ;;  %v1427_v18 = vand.u32 4294901760, %v1426_v44  ;;  %v6149_v44 = vand.u32 4294901760, %v1214_v34 }
 0x14c   :  { %3720 = vmatprep.mubr.msk.f32.mxu1 %vm4818_vm3, %v6764_v2  ;;  %4041 = vmatprep.mubr.msk.f32.mxu0 %vm4818_vm3, %v6764_v2 }
 0x14d   :  { %v6146_v39 = vsub.f32 %v1213_v61, %v6136_v40 }
 0x14f   :  { %3721 = vmatmul.mubr.f32.gmra.mrb[22].mxu1 %v1417_v1  ;;  %4042 = vmatmul.mubr.f32.gmra.mrb[22].mxu0 %v1415_v59  ;;  %6775 = vst [vmem:[#allocation32_spill] sm:$0xff] %v6146_v39  ;;  %v1437_v59 = vand.u32 4294901760, %v1436_v63  ;;  %v1446_v1 = vsub.f32 %v6127_v49, %v1445_v19  ;;  %v1465_v61 = vand.u32 4294901760, %v6146_v39  ;;  %v6160_v63 = vsub.f32 %v1214_v34, %v6149_v44 }
 0x150   :  { %3723 = vmatprep.mubr.msk.f32.mxu1 %vm4818_vm3, %v6764_v2  ;;  %4044 = vmatprep.mubr.msk.f32.mxu0 %vm4818_vm3, %v6764_v2  ;;  %v6162_v49 = vand.u32 4294901760, %v1215_v8 }
 0x151   :  { %6776 = vst [vmem:[#allocation33_spill] sm:$0xff] %v6160_v63  ;;  %v1466_v25 = vsub.f32 %v6146_v39, %v1465_v61  ;;  %v6180_v39 = vsub.f32 %v1216_v0, %v6169_v13 }
 0x152   :  { %v6173_v34 = vsub.f32 %v1215_v8, %v6162_v49  ;;  %v1219_v8 = vld [vmem:[#allocation8 + $0xb0] sm:$0xff] }
 0x153   :  { %3724 = vmatmul.mubr.f32.gmra.mrb[24].mxu1 %v1427_v18  ;;  %4045 = vmatmul.mubr.f32.gmra.mrb[24].mxu0 %v1425_v57  ;;  %v1447_v57 = vand.u32 4294901760, %v1446_v1  ;;  %v1456_v18 = vsub.f32 %v6134_v31, %v1455_v56  ;;  %v1217_v1 = vld [vmem:[#allocation8 + $0xa0] sm:$0xff]  ;;  %v1467_v31 = vand.u32 4294901760, %v1466_v25  ;;  %6778 = vst [vmem:[#allocation35_spill] sm:$0xff] %v6180_v39  ;;  %v1218_v25 = vld [vmem:[#allocation8 + $0xa8] sm:$0xff]  ;;  %v1495_v0 = vand.u32 4294901760, %v6180_v39 }
 0x154   :  { %3726 = vmatprep.mubr.msk.f32.mxu1 %vm4818_vm3, %v6764_v2  ;;  %4047 = vmatprep.mubr.msk.f32.mxu0 %vm4818_vm3, %v6764_v2  ;;  %6777 = vst [vmem:[#allocation34_spill] sm:$0xff] %v6173_v34  ;;  %v6197_v22 = vand.u32 4294901760, %v1218_v25  ;;  %v6203_v4 = vand.u32 4294901760, %v1219_v8 }
 0x156   :  { %6780 = vst [vmem:[#allocation37_spill] sm:$0xff] %v6197_v22  ;;  %v6215_v20 = vsub.f32 %v1219_v8, %v6203_v4 }
 0x157   :  { %3727 = vmatmul.mubr.f32.gmra.mrb[26].mxu1 %v1437_v59  ;;  %4048 = vmatmul.mubr.f32.gmra.mrb[26].mxu0 %v1435_v26  ;;  %v1457_v26 = vand.u32 4294901760, %v1456_v18  ;;  %v1475_v59 = vand.u32 4294901760, %v6160_v63  ;;  %v6184_v18 = vand.u32 4294901760, %v1217_v1 }
 0x158   :  { %3729 = vmatprep.mubr.msk.f32.mxu1 %vm4818_vm3, %v6764_v2  ;;  %4050 = vmatprep.mubr.msk.f32.mxu0 %vm4818_vm3, %v6764_v2 }
 0x15b   :  { %3730 = vmatmul.mubr.f32.gmra.mrb[28].mxu1 %v1447_v57  ;;  %4051 = vmatmul.mubr.f32.gmra.mrb[28].mxu0 %v1445_v19  ;;  %v1476_v19 = vsub.f32 %v6160_v63, %v1475_v59  ;;  %v1485_v57 = vand.u32 4294901760, %v6173_v34  ;;  %v6195_v63 = vsub.f32 %v1217_v1, %v6184_v18  ;;  %v6208_v1 = vsub.f32 %v1218_v25, %v6197_v22  ;;  %v1221_v25 = vld [vmem:[#allocation8 + $0xc0] sm:$0xff] }
 0x15c   :  { %3732 = vmatprep.mubr.msk.f32.mxu1 %vm4818_vm3, %v6764_v2  ;;  %4053 = vmatprep.mubr.msk.f32.mxu0 %vm4818_vm3, %v6764_v2  ;;  %v1525_v22 = vand.u32 4294901760, %v6215_v20 }
 0x15d   :  { %6779 = vst [vmem:[#allocation36_spill] sm:$0xff] %v6195_v63 }
 0x15f   :  { %3733 = vmatmul.mubr.f32.gmra.mrb[30].mxu1 %v1457_v26  ;;  %4054 = vmatmul.mubr.f32.gmra.mrb[30].mxu0 %v1455_v56  ;;  %v1477_v56 = vand.u32 4294901760, %v1476_v19  ;;  %v1486_v26 = vsub.f32 %v6173_v34, %v1485_v57  ;;  %v1505_v19 = vand.u32 4294901760, %v6195_v63  ;;  %v1220_v34 = vld [vmem:[#allocation8 + $0xb8] sm:$0xff] }
 0x160   :  { %3735 = vmatprep.mubr.msk.f32.mxu1 %vm4818_vm3, %v6764_v2  ;;  %4056 = vmatprep.mubr.msk.f32.mxu0 %vm4818_vm3, %v6764_v2 }
 0x163   :  { %3736 = vmatmul.mubr.f32.gmra.mrb[32].mxu1 %v1467_v31  ;;  %4057 = vmatmul.mubr.f32.gmra.mrb[32].mxu0 %v1465_v61  ;;  %v1487_v31 = vand.u32 4294901760, %v1486_v26  ;;  %v1496_v61 = vsub.f32 %v6180_v39, %v1495_v0  ;;  %v1515_v26 = vand.u32 4294901760, %v6208_v1  ;;  %v6219_v39 = vand.u32 4294901760, %v1220_v34 }
 0x164   :  { %3738 = vmatprep.mubr.msk.f32.mxu1 %vm4818_vm3, %v6764_v2  ;;  %4059 = vmatprep.mubr.msk.f32.mxu0 %vm4818_vm3, %v6764_v2 }
 0x167   :  { %3739 = vmatmul.mubr.f32.gmra.mrb[34].mxu1 %v1477_v56  ;;  %4060 = vmatmul.mubr.f32.gmra.mrb[34].mxu0 %v1475_v59  ;;  %v1497_v59 = vand.u32 4294901760, %v1496_v61  ;;  %v1506_v56 = vsub.f32 %v6195_v63, %v1505_v19  ;;  %v6230_v61 = vand.u32 4294901760, %v1221_v25 }
 0x168   :  { %3741 = vmatprep.mubr.msk.f32.mxu1 %vm4818_vm3, %v6764_v2  ;;  %4062 = vmatprep.mubr.msk.f32.mxu0 %vm4818_vm3, %v6764_v2 }
 0x169   :  { %v1507_v8 = vand.u32 4294901760, %v1506_v56  ;;  %v6239_v56 = vsub.f32 %v1221_v25, %v6230_v61 }
 0x16b   :  { %3742 = vmatmul.mubr.f32.gmra.mrb[36].mxu1 %v1487_v31  ;;  %4063 = vmatmul.mubr.f32.gmra.mrb[36].mxu0 %v1485_v57  ;;  %v1516_v57 = vsub.f32 %v6208_v1, %v1515_v26  ;;  %v6228_v31 = vsub.f32 %v1220_v34, %v6219_v39 }
 0x16c   :  { %3744 = vmatprep.mubr.msk.f32.mxu1 %vm4818_vm3, %v6764_v2  ;;  %4065 = vmatprep.mubr.msk.f32.mxu0 %vm4818_vm3, %v6764_v2 }
 0x16d   :  { %v1517_v63 = vand.u32 4294901760, %v1516_v57 }
 0x16f   :  { %3745 = vmatmul.mubr.f32.gmra.mrb[38].mxu1 %v1497_v59  ;;  %4066 = vmatmul.mubr.f32.gmra.mrb[38].mxu0 %v1495_v0  ;;  %v1526_v59 = vsub.f32 %v6215_v20, %v1525_v22  ;;  %v1535_v0 = vand.u32 4294901760, %v6228_v31 }
 0x170   :  { %3747 = vmatprep.mubr.msk.f32.mxu1 %vm4818_vm3, %v6764_v2  ;;  %4068 = vmatprep.mubr.msk.f32.mxu0 %vm4818_vm3, %v6764_v2 }
 0x171   :  { %v1527_v34 = vand.u32 4294901760, %v1526_v59  ;;  %v2901_v59 = vld [vmem:[#allocation5 + $0x10] sm:$0xff] }
 0x173   :  { %3748 = vmatmul.mubr.f32.gmra.mrb[40].mxu1 %v1507_v8  ;;  %4069 = vmatmul.mubr.f32.gmra.mrb[40].mxu0 %v1505_v19  ;;  %v1536_v8 = vsub.f32 %v6228_v31, %v1535_v0  ;;  %v1545_v19 = vand.u32 4294901760, %v6239_v56 }
 0x174   :  { %3750 = vmatprep.mubr.msk.f32.mxu1 %vm4818_vm3, %v6764_v2  ;;  %4071 = vmatprep.mubr.msk.f32.mxu0 %vm4818_vm3, %v6764_v2 }
 0x175   :  { %v1537_v25 = vand.u32 4294901760, %v1536_v8  ;;  %v1546_v57 = vsub.f32 %v6239_v56, %v1545_v19 }
 0x177   :  { %3751 = vmatmul.mubr.f32.gmra.mrb[42].mxu1 %v1517_v63  ;;  %4072 = vmatmul.mubr.f32.gmra.mrb[42].mxu0 %v1515_v26  ;;  %v1547_v63 = vand.u32 4294901760, %v1546_v57  ;;  %v2955_v57 = vld [vmem:[#allocation7 + $0x10] sm:$0xff] }
 0x178   :  { %3753 = vmatprep.mubr.msk.f32.mxu1 %vm4818_vm3, %v6764_v2  ;;  %4074 = vmatprep.mubr.msk.f32.mxu0 %vm4818_vm3, %v6764_v2 }
 0x17b   :  { %3754 = vmatmul.mubr.f32.gmra.mrb[44].mxu1 %v1527_v34  ;;  %4075 = vmatmul.mubr.f32.gmra.mrb[44].mxu0 %v1525_v22  ;;  %v6781_v22 = vpack.c.bf16 %v5142_v48, %v5140_v46  ;;  %v6783_v46 = vpack.c.bf16 %v5346_v5, %v5338_v42  ;;  %v6784_v48 = vpack.c.bf16 %v5455_v7, %v5447_v51  ;;  %v6790_v5 = vld [vmem:[#allocation16_spill] sm:$0xff]  ;;  %v6791_v51 = vld [vmem:[#allocation17_spill] sm:$0xff]  ;;  %v6793_v7 = vld [vmem:[#allocation19_spill] sm:$0xff] }
 0x17c   :  { %3756 = vmatprep.mubr.msk.f32.mxu1 %vm4818_vm3, %v6764_v2  ;;  %4077 = vmatprep.mubr.msk.f32.mxu0 %vm4818_vm3, %v6764_v2  ;;  %v6788_v42 = vpack.c.bf16 %v6049_v29, %v6044_v17  ;;  %v2899_v17 = vld [vmem:[#allocation5] sm:$0xff] }
 0x17f   :  { %3757 = vmatmul.mubr.f32.gmra.mrb[46].mxu1 %v1537_v25  ;;  %4078 = vmatmul.mubr.f32.gmra.mrb[46].mxu0 %v1535_v0 }
 0x180   :  { %3759 = vmatprep.mubr.msk.f32.mxu1 %vm4818_vm3, %v6764_v2  ;;  %4080 = vmatprep.mubr.msk.f32.mxu0 %vm4818_vm3, %v6764_v2 }
 0x183   :  { %3760 = vmatmul.mubr.f32.gmra.mrb[48].mxu1 %v1547_v63  ;;  %4081 = vmatmul.mubr.f32.gmra.mrb[48].mxu0 %v1545_v19 }
 0x184   :  { %3794 = vmatprep.mubr.msk.f32.mxu1 %vm4818_vm3, %v6764_v2  ;;  %4115 = vmatprep.mubr.msk.f32.mxu0 %vm4818_vm3, %v6764_v2 }
 0x187   :  { %3795 = vmatmul.mubr.f32.vlgmr.msra.gmra.mrb[0].mxu1 %v5861_v15  ;;  %4116 = vmatmul.mubr.f32.vlgmr.msra.gmra.mrb[0].mxu0 %v5861_v15 }
 0x188   :  { %4347 = vmatpush3.bf16.msra.mxu1 %v6781_v22  ;;  %4419 = vmatpush3.bf16.msra.mxu0 %v5138_v43  ;;  %v6782_v43 = vpack.c.bf16 %v5238_v45, %v5232_v36  ;;  %v6785_v36 = vpack.c.bf16 %v5578_v35, %v5568_v53  ;;  %v6787_v45 = vpack.c.bf16 %v6021_v14, %v6012_v28  ;;  %v6794_v53 = vld [vmem:[#allocation20_spill] sm:$0xff]  ;;  %v6796_v35 = vld [vmem:[#allocation22_spill] sm:$0xff] }
 0x189   :  { %3797 = vmatprep.mubr.msk.f32.mxu1 %vm4818_vm3, %v6764_v2  ;;  %4118 = vmatprep.mubr.msk.f32.mxu0 %vm4818_vm3, %v6764_v2 }
 0x18a   :  { %4348 = vmatprep.subr.bf16.mxu1 %v6767_v41  ;;  %4420 = vmatprep.subr.bf16.mxu0 %v6767_v41 }
 0x18b   :  { %3798 = vmatmul.mubr.f32.gmra.mrb[2].mxu1 %v5891_v10  ;;  %4119 = vmatmul.mubr.f32.gmra.mrb[2].mxu0 %v5891_v10 }
 0x18c   :  { %3800 = vmatprep.mubr.msk.f32.mxu1 %vm4818_vm3, %v6764_v2  ;;  %4121 = vmatprep.mubr.msk.f32.mxu0 %vm4818_vm3, %v6764_v2 }
 0x18d   :  { %4350 = vmatpush3.bf16.msra.mxu1 %v6782_v43  ;;  %4422 = vmatpush3.bf16.msra.mxu0 %v5236_v3  ;;  %v6786_v3 = vpack.c.bf16 %v5705_v62, %v5697_v27  ;;  %v6797_v27 = vld [vmem:[#allocation23_spill] sm:$0xff]  ;;  %v6799_v62 = vld [vmem:[#allocation25_spill] sm:$0xff] }
 0x18e   :  { %4351 = vmatprep.subr.bf16.mxu1 %v6767_v41  ;;  %4423 = vmatprep.subr.bf16.mxu0 %v6767_v41 }
 0x18f   :  { %3801 = vmatmul.mubr.f32.gmra.mrb[4].mxu1 %v5897_v55  ;;  %4122 = vmatmul.mubr.f32.gmra.mrb[4].mxu0 %v5897_v55 }
 0x190   :  { %3803 = vmatprep.mubr.msk.f32.mxu1 %vm4818_vm3, %v6764_v2  ;;  %4124 = vmatprep.mubr.msk.f32.mxu0 %vm4818_vm3, %v6764_v2 }
 0x191   :  { %4353 = vmatpush3.bf16.msra.mxu1 %v6783_v46  ;;  %4425 = vmatpush3.bf16.msra.mxu0 %v5344_v50  ;;  %v6789_v50 = vld [vmem:[#allocation37_spill] sm:$0xff] }
 0x192   :  { %4354 = vmatprep.subr.bf16.mxu1 %v6767_v41  ;;  %4426 = vmatprep.subr.bf16.mxu0 %v6767_v41 }
 0x193   :  { %3804 = vmatmul.mubr.f32.gmra.mrb[6].mxu1 %v5910_v24  ;;  %4125 = vmatmul.mubr.f32.gmra.mrb[6].mxu0 %v5910_v24 }
 0x194   :  { %3806 = vmatprep.mubr.msk.f32.mxu1 %vm4818_vm3, %v6764_v2  ;;  %4127 = vmatprep.mubr.msk.f32.mxu0 %vm4818_vm3, %v6764_v2 }
 0x195   :  { %4356 = vmatpush3.bf16.msra.mxu1 %v6784_v48  ;;  %4428 = vmatpush3.bf16.msra.mxu0 %v5453_v6  ;;  %v6792_v6 = vld [vmem:[#allocation18_spill] sm:$0xff] }
 0x196   :  { %4357 = vmatprep.subr.bf16.mxu1 %v6767_v41  ;;  %4429 = vmatprep.subr.bf16.mxu0 %v6767_v41 }
 0x197   :  { %3807 = vmatmul.mubr.f32.gmra.mrb[8].mxu1 %v5930_v21  ;;  %4128 = vmatmul.mubr.f32.gmra.mrb[8].mxu0 %v5930_v21 }
 0x198   :  { %3809 = vmatprep.mubr.msk.f32.mxu1 %vm4818_vm3, %v6764_v2  ;;  %4130 = vmatprep.mubr.msk.f32.mxu0 %vm4818_vm3, %v6764_v2 }
 0x199   :  { %4359 = vmatpush3.bf16.msra.mxu1 %v6785_v36  ;;  %4431 = vmatpush3.bf16.msra.mxu0 %v5576_v60  ;;  %v6795_v60 = vld [vmem:[#allocation21_spill] sm:$0xff]  ;;  %v2902_v36 = vld [vmem:[#allocation5 + $0x18] sm:$0xff] }
 0x19a   :  { %4360 = vmatprep.subr.bf16.mxu1 %v6767_v41  ;;  %4432 = vmatprep.subr.bf16.mxu0 %v6767_v41 }
 0x19b   :  { %3810 = vmatmul.mubr.f32.gmra.mrb[10].mxu1 %v5945_v32  ;;  %4131 = vmatmul.mubr.f32.gmra.mrb[10].mxu0 %v5945_v32 }
 0x19c   :  { %3812 = vmatprep.mubr.msk.f32.mxu1 %vm4818_vm3, %v6764_v2  ;;  %4133 = vmatprep.mubr.msk.f32.mxu0 %vm4818_vm3, %v6764_v2 }
 0x19d   :  { %4362 = vmatpush3.bf16.msra.mxu1 %v6786_v3  ;;  %4434 = vmatpush3.bf16.msra.mxu0 %v5703_v9  ;;  %v6798_v9 = vld [vmem:[#allocation24_spill] sm:$0xff] }
 0x19e   :  { %4363 = vmatprep.subr.bf16.mxu1 %v6767_v41  ;;  %4435 = vmatprep.subr.bf16.mxu0 %v6767_v41 }
 0x19f   :  { %3813 = vmatmul.mubr.f32.gmra.mrb[12].mxu1 %v5960_v58  ;;  %4134 = vmatmul.mubr.f32.gmra.mrb[12].mxu0 %v5960_v58 }
 0x1a0   :  { %3815 = vmatprep.mubr.msk.f32.mxu1 %vm4818_vm3, %v6764_v2  ;;  %4136 = vmatprep.mubr.msk.f32.mxu0 %vm4818_vm3, %v6764_v2 }
 0x1a1   :  { %4365 = vmatpush3.bf16.msra.mxu1 %v6787_v45  ;;  %4437 = vmatpush3.bf16.msra.mxu0 %v5821_v38  ;;  %v6800_v38 = vld [vmem:[#allocation26_spill] sm:$0xff] }
 0x1a2   :  { %4366 = vmatprep.subr.bf16.mxu1 %v6767_v41  ;;  %4438 = vmatprep.subr.bf16.mxu0 %v6767_v41  ;;  %v6808_v41 = vld [vmem:[#allocation34_spill] sm:$0xff] }
 0x1a3   :  { %3816 = vmatmul.mubr.f32.gmra.mrb[14].mxu1 %v5970_v54  ;;  %4137 = vmatmul.mubr.f32.gmra.mrb[14].mxu0 %v5970_v54 }
 0x1a4   :  { %3818 = vmatprep.mubr.msk.f32.mxu1 %vm4818_vm3, %v6764_v2  ;;  %4139 = vmatprep.mubr.msk.f32.mxu0 %vm4818_vm3, %v6764_v2 }
 0x1a5   :  { %4368 = vmatpush3.bf16.msra.mxu1 %v6788_v42  ;;  %4440 = vmatpush3.bf16.msra.mxu0 %v5923_v37  ;;  %v6805_v37 = vld [vmem:[#allocation31_spill] sm:$0xff] }
 0x1a7   :  { %3819 = vmatmul.mubr.f32.gmra.mrb[16].mxu1 %v5988_v30  ;;  %4140 = vmatmul.mubr.f32.gmra.mrb[16].mxu0 %v5988_v30 }
 0x1a8   :  { %3821 = vmatprep.mubr.msk.f32.mxu1 %vm4818_vm3, %v6764_v2  ;;  %4142 = vmatprep.mubr.msk.f32.mxu0 %vm4818_vm3, %v6764_v2 }
 0x1ab   :  { %3822 = vmatmul.mubr.f32.gmra.mrb[18].mxu1 %v6002_v16  ;;  %4143 = vmatmul.mubr.f32.gmra.mrb[18].mxu0 %v6002_v16 }
 0x1ac   :  { %3824 = vmatprep.mubr.msk.f32.mxu1 %vm4818_vm3, %v6764_v2  ;;  %4145 = vmatprep.mubr.msk.f32.mxu0 %vm4818_vm3, %v6764_v2 }
 0x1af   :  { %3825 = vmatmul.mubr.f32.gmra.mrb[20].mxu1 %v6034_v33  ;;  %4146 = vmatmul.mubr.f32.gmra.mrb[20].mxu0 %v6034_v33 }
 0x1b0   :  { %3827 = vmatprep.mubr.msk.f32.mxu1 %vm4818_vm3, %v6764_v2  ;;  %4148 = vmatprep.mubr.msk.f32.mxu0 %vm4818_vm3, %v6764_v2 }
 0x1b3   :  { %3828 = vmatmul.mubr.f32.gmra.mrb[22].mxu1 %v6059_v23  ;;  %4149 = vmatmul.mubr.f32.gmra.mrb[22].mxu0 %v6059_v23 }
 0x1b4   :  { %3830 = vmatprep.mubr.msk.f32.mxu1 %vm4818_vm3, %v6764_v2  ;;  %4151 = vmatprep.mubr.msk.f32.mxu0 %vm4818_vm3, %v6764_v2 }
 0x1b7   :  { %3831 = vmatmul.mubr.f32.gmra.mrb[24].mxu1 %v6066_v11  ;;  %4152 = vmatmul.mubr.f32.gmra.mrb[24].mxu0 %v6066_v11 }
 0x1b8   :  { %3833 = vmatprep.mubr.msk.f32.mxu1 %vm4818_vm3, %v6764_v2  ;;  %4154 = vmatprep.mubr.msk.f32.mxu0 %vm4818_vm3, %v6764_v2 }
 0x1bb   :  { %3834 = vmatmul.mubr.f32.gmra.mrb[26].mxu1 %v6088_v12  ;;  %4155 = vmatmul.mubr.f32.gmra.mrb[26].mxu0 %v6088_v12 }
 0x1bc   :  { %3836 = vmatprep.mubr.msk.f32.mxu1 %vm4818_vm3, %v6764_v2  ;;  %4157 = vmatprep.mubr.msk.f32.mxu0 %vm4818_vm3, %v6764_v2 }
 0x1bf   :  { %3837 = vmatmul.mubr.f32.gmra.mrb[28].mxu1 %v6113_v52  ;;  %4158 = vmatmul.mubr.f32.gmra.mrb[28].mxu0 %v6113_v52 }
 0x1c0   :  { %3839 = vmatprep.mubr.msk.f32.mxu1 %vm4818_vm3, %v6764_v2  ;;  %4160 = vmatprep.mubr.msk.f32.mxu0 %vm4818_vm3, %v6764_v2 }
 0x1c3   :  { %3840 = vmatmul.mubr.f32.gmra.mrb[30].mxu1 %v6122_v47  ;;  %4161 = vmatmul.mubr.f32.gmra.mrb[30].mxu0 %v6122_v47 }
 0x1c4   :  { %3842 = vmatprep.mubr.msk.f32.mxu1 %vm4818_vm3, %v6764_v2  ;;  %4163 = vmatprep.mubr.msk.f32.mxu0 %vm4818_vm3, %v6764_v2 }
 0x1c7   :  { %3843 = vmatmul.mubr.f32.gmra.mrb[32].mxu1 %v6136_v40  ;;  %4164 = vmatmul.mubr.f32.gmra.mrb[32].mxu0 %v6136_v40 }
 0x1c8   :  { %3845 = vmatprep.mubr.msk.f32.mxu1 %vm4818_vm3, %v6764_v2  ;;  %4166 = vmatprep.mubr.msk.f32.mxu0 %vm4818_vm3, %v6764_v2 }
 0x1cb   :  { %3846 = vmatmul.mubr.f32.gmra.mrb[34].mxu1 %v6149_v44  ;;  %4167 = vmatmul.mubr.f32.gmra.mrb[34].mxu0 %v6149_v44 }
 0x1cc   :  { %3848 = vmatprep.mubr.msk.f32.mxu1 %vm4818_vm3, %v6764_v2  ;;  %4169 = vmatprep.mubr.msk.f32.mxu0 %vm4818_vm3, %v6764_v2 }
 0x1cf   :  { %3849 = vmatmul.mubr.f32.gmra.mrb[36].mxu1 %v6162_v49  ;;  %4170 = vmatmul.mubr.f32.gmra.mrb[36].mxu0 %v6162_v49 }
 0x1d0   :  { %3851 = vmatprep.mubr.msk.f32.mxu1 %vm4818_vm3, %v6764_v2  ;;  %4172 = vmatprep.mubr.msk.f32.mxu0 %vm4818_vm3, %v6764_v2 }
 0x1d3   :  { %3852 = vmatmul.mubr.f32.gmra.mrb[38].mxu1 %v6169_v13  ;;  %4173 = vmatmul.mubr.f32.gmra.mrb[38].mxu0 %v6169_v13 }
 0x1d4   :  { %3854 = vmatprep.mubr.msk.f32.mxu1 %vm4818_vm3, %v6764_v2  ;;  %4175 = vmatprep.mubr.msk.f32.mxu0 %vm4818_vm3, %v6764_v2 }
 0x1d7   :  { %3855 = vmatmul.mubr.f32.gmra.mrb[40].mxu1 %v6184_v18  ;;  %4176 = vmatmul.mubr.f32.gmra.mrb[40].mxu0 %v6184_v18 }
 0x1d8   :  { %3857 = vmatprep.mubr.msk.f32.mxu1 %vm4818_vm3, %v6764_v2  ;;  %4178 = vmatprep.mubr.msk.f32.mxu0 %vm4818_vm3, %v6764_v2 }
 0x1db   :  { %3858 = vmatmul.mubr.f32.gmra.mrb[42].mxu1 %v6789_v50  ;;  %4179 = vmatmul.mubr.f32.gmra.mrb[42].mxu0 %v6789_v50 }
 0x1dc   :  { %3860 = vmatprep.mubr.msk.f32.mxu1 %vm4818_vm3, %v6764_v2  ;;  %4181 = vmatprep.mubr.msk.f32.mxu0 %vm4818_vm3, %v6764_v2 }
 0x1df   :  { %3861 = vmatmul.mubr.f32.gmra.mrb[44].mxu1 %v6203_v4  ;;  %4182 = vmatmul.mubr.f32.gmra.mrb[44].mxu0 %v6203_v4 }
 0x1e0   :  { %3863 = vmatprep.mubr.msk.f32.mxu1 %vm4818_vm3, %v6764_v2  ;;  %4184 = vmatprep.mubr.msk.f32.mxu0 %vm4818_vm3, %v6764_v2 }
 0x1e3   :  { %3864 = vmatmul.mubr.f32.gmra.mrb[46].mxu1 %v6219_v39  ;;  %4185 = vmatmul.mubr.f32.gmra.mrb[46].mxu0 %v6219_v39 }
 0x1e4   :  { %3866 = vmatprep.mubr.msk.f32.mxu1 %vm4818_vm3, %v6764_v2  ;;  %4187 = vmatprep.mubr.msk.f32.mxu0 %vm4818_vm3, %v6764_v2 }
 0x1e7   :  { %3867 = vmatmul.mubr.f32.gmra.mrb[48].mxu1 %v6230_v61  ;;  %4188 = vmatmul.mubr.f32.gmra.mrb[48].mxu0 %v6230_v61 }
 0x1e8   :  { %3901 = vmatprep.mubr.msk.f32.mxu1 %vm4818_vm3, %v6764_v2  ;;  %4222 = vmatprep.mubr.msk.f32.mxu0 %vm4818_vm3, %v6764_v2 }
 0x1eb   :  { %3902 = vmatmul.mubr.f32.vlgmr.msra.gmra.mrb[0].mxu1 %v6790_v5  ;;  %4223 = vmatmul.mubr.f32.vlgmr.msra.gmra.mrb[0].mxu0 %v5861_v15  ;;  %v6801_v15 = vld [vmem:[#allocation27_spill] sm:$0xff] }
 0x1ec   :  { %3904 = vmatprep.mubr.msk.f32.mxu1 %vm4818_vm3, %v6764_v2  ;;  %4225 = vmatprep.mubr.msk.f32.mxu0 %vm4818_vm3, %v6764_v2 }
 0x1ef   :  { %3905 = vmatmul.mubr.f32.gmra.mrb[2].mxu1 %v6791_v51  ;;  %4226 = vmatmul.mubr.f32.gmra.mrb[2].mxu0 %v5891_v10  ;;  %v6802_v10 = vld [vmem:[#allocation28_spill] sm:$0xff] }
 0x1f0   :  { %3907 = vmatprep.mubr.msk.f32.mxu1 %vm4818_vm3, %v6764_v2  ;;  %4228 = vmatprep.mubr.msk.f32.mxu0 %vm4818_vm3, %v6764_v2 }
 0x1f3   :  { %3908 = vmatmul.mubr.f32.gmra.mrb[4].mxu1 %v6792_v6  ;;  %4229 = vmatmul.mubr.f32.gmra.mrb[4].mxu0 %v5897_v55  ;;  %v6803_v55 = vld [vmem:[#allocation29_spill] sm:$0xff]  ;;  %v2956_v6 = vld [vmem:[#allocation7 + $0x18] sm:$0xff] }
 0x1f4   :  { %3910 = vmatprep.mubr.msk.f32.mxu1 %vm4818_vm3, %v6764_v2  ;;  %4231 = vmatprep.mubr.msk.f32.mxu0 %vm4818_vm3, %v6764_v2 }
 0x1f7   :  { %3911 = vmatmul.mubr.f32.gmra.mrb[6].mxu1 %v6793_v7  ;;  %4232 = vmatmul.mubr.f32.gmra.mrb[6].mxu0 %v5910_v24  ;;  %v6804_v24 = vld [vmem:[#allocation30_spill] sm:$0xff] }
 0x1f8   :  { %3913 = vmatprep.mubr.msk.f32.mxu1 %vm4818_vm3, %v6764_v2  ;;  %4234 = vmatprep.mubr.msk.f32.mxu0 %vm4818_vm3, %v6764_v2 }
 0x1fb   :  { %3914 = vmatmul.mubr.f32.gmra.mrb[8].mxu1 %v6794_v53  ;;  %4235 = vmatmul.mubr.f32.gmra.mrb[8].mxu0 %v5930_v21  ;;  %v6806_v21 = vld [vmem:[#allocation32_spill] sm:$0xff] }
 0x1fc   :  { %3916 = vmatprep.mubr.msk.f32.mxu1 %vm4818_vm3, %v6764_v2  ;;  %4237 = vmatprep.mubr.msk.f32.mxu0 %vm4818_vm3, %v6764_v2 }
 0x1ff   :  { %3917 = vmatmul.mubr.f32.gmra.mrb[10].mxu1 %v6795_v60  ;;  %4238 = vmatmul.mubr.f32.gmra.mrb[10].mxu0 %v5945_v32  ;;  %v6807_v32 = vld [vmem:[#allocation33_spill] sm:$0xff] }
 0x200   :  { %3919 = vmatprep.mubr.msk.f32.mxu1 %vm4818_vm3, %v6764_v2  ;;  %4240 = vmatprep.mubr.msk.f32.mxu0 %vm4818_vm3, %v6764_v2 }
 0x203   :  { %3920 = vmatmul.mubr.f32.gmra.mrb[12].mxu1 %v6796_v35  ;;  %4241 = vmatmul.mubr.f32.gmra.mrb[12].mxu0 %v5960_v58  ;;  %v6809_v58 = vld [vmem:[#allocation35_spill] sm:$0xff] }
 0x204   :  { %3922 = vmatprep.mubr.msk.f32.mxu1 %vm4818_vm3, %v6764_v2  ;;  %4243 = vmatprep.mubr.msk.f32.mxu0 %vm4818_vm3, %v6764_v2 }
 0x207   :  { %3923 = vmatmul.mubr.f32.gmra.mrb[14].mxu1 %v6797_v27  ;;  %4244 = vmatmul.mubr.f32.gmra.mrb[14].mxu0 %v5970_v54  ;;  %v6810_v54 = vld [vmem:[#allocation36_spill] sm:$0xff] }
 0x208   :  { %3925 = vmatprep.mubr.msk.f32.mxu1 %vm4818_vm3, %v6764_v2  ;;  %4246 = vmatprep.mubr.msk.f32.mxu0 %vm4818_vm3, %v6764_v2 }
 0x20b   :  { %3926 = vmatmul.mubr.f32.gmra.mrb[16].mxu1 %v6798_v9  ;;  %4247 = vmatmul.mubr.f32.gmra.mrb[16].mxu0 %v5988_v30  ;;  %v6811_v30 = vld [vmem:[#allocation15_spill] sm:$0xff] }
 0x20c   :  { %3928 = vmatprep.mubr.msk.f32.mxu1 %vm4818_vm3, %v6764_v2  ;;  %4249 = vmatprep.mubr.msk.f32.mxu0 %vm4818_vm3, %v6764_v2 }
 0x20f   :  { %3929 = vmatmul.mubr.f32.gmra.mrb[18].mxu1 %v6799_v62  ;;  %4250 = vmatmul.mubr.f32.gmra.mrb[18].mxu0 %v6002_v16  ;;  %v2903_v62 = vld [vmem:[#allocation5 + $0x20] sm:$0xff] }
 0x210   :  { %3931 = vmatprep.mubr.msk.f32.mxu1 %vm4818_vm3, %v6764_v2  ;;  %4252 = vmatprep.mubr.msk.f32.mxu0 %vm4818_vm3, %v6764_v2 }
 0x213   :  { %3932 = vmatmul.mubr.f32.gmra.mrb[20].mxu1 %v6800_v38  ;;  %4253 = vmatmul.mubr.f32.gmra.mrb[20].mxu0 %v6034_v33 }
 0x214   :  { %3934 = vmatprep.mubr.msk.f32.mxu1 %vm4818_vm3, %v6764_v2  ;;  %4255 = vmatprep.mubr.msk.f32.mxu0 %vm4818_vm3, %v6764_v2 }
 0x217   :  { %3935 = vmatmul.mubr.f32.gmra.mrb[22].mxu1 %v6801_v15  ;;  %4256 = vmatmul.mubr.f32.gmra.mrb[22].mxu0 %v6059_v23 }
 0x218   :  { %3937 = vmatprep.mubr.msk.f32.mxu1 %vm4818_vm3, %v6764_v2  ;;  %4258 = vmatprep.mubr.msk.f32.mxu0 %vm4818_vm3, %v6764_v2 }
 0x21b   :  { %3938 = vmatmul.mubr.f32.gmra.mrb[24].mxu1 %v6802_v10  ;;  %4259 = vmatmul.mubr.f32.gmra.mrb[24].mxu0 %v6066_v11  ;;  %v2900_v11 = vld [vmem:[#allocation5 + $0x8] sm:$0xff] }
 0x21c   :  { %3940 = vmatprep.mubr.msk.f32.mxu1 %vm4818_vm3, %v6764_v2  ;;  %4261 = vmatprep.mubr.msk.f32.mxu0 %vm4818_vm3, %v6764_v2 }
 0x21f   :  { %3941 = vmatmul.mubr.f32.gmra.mrb[26].mxu1 %v6803_v55  ;;  %4262 = vmatmul.mubr.f32.gmra.mrb[26].mxu0 %v6088_v12  ;;  %v2926_v12 = vsub.s32 0, %v6811_v30 }
 0x220   :  { %3943 = vmatprep.mubr.msk.f32.mxu1 %vm4818_vm3, %v6764_v2  ;;  %4264 = vmatprep.mubr.msk.f32.mxu0 %vm4818_vm3, %v6764_v2 }
 0x223   :  { %3944 = vmatmul.mubr.f32.gmra.mrb[28].mxu1 %v6804_v24  ;;  %4265 = vmatmul.mubr.f32.gmra.mrb[28].mxu0 %v6113_v52 }
 0x224   :  { %3946 = vmatprep.mubr.msk.f32.mxu1 %vm4818_vm3, %v6764_v2  ;;  %4267 = vmatprep.mubr.msk.f32.mxu0 %vm4818_vm3, %v6764_v2 }
 0x227   :  { %3947 = vmatmul.mubr.f32.gmra.mrb[30].mxu1 %v6805_v37  ;;  %4268 = vmatmul.mubr.f32.gmra.mrb[30].mxu0 %v6122_v47  ;;  %v2957_v37 = vld [vmem:[#allocation7 + $0x20] sm:$0xff] }
 0x228   :  { %3949 = vmatprep.mubr.msk.f32.mxu1 %vm4818_vm3, %v6764_v2  ;;  %4270 = vmatprep.mubr.msk.f32.mxu0 %vm4818_vm3, %v6764_v2 }
 0x22b   :  { %3950 = vmatmul.mubr.f32.gmra.mrb[32].mxu1 %v6806_v21  ;;  %4271 = vmatmul.mubr.f32.gmra.mrb[32].mxu0 %v6136_v40  ;;  %v2953_v40 = vld [vmem:[#allocation7] sm:$0xff] }
 0x22c   :  { %3952 = vmatprep.mubr.msk.f32.mxu1 %vm4818_vm3, %v6764_v2  ;;  %4273 = vmatprep.mubr.msk.f32.mxu0 %vm4818_vm3, %v6764_v2 }
 0x22f   :  { %3953 = vmatmul.mubr.f32.gmra.mrb[34].mxu1 %v6807_v32  ;;  %4274 = vmatmul.mubr.f32.gmra.mrb[34].mxu0 %v6149_v44 }
 0x230   :  { %3955 = vmatprep.mubr.msk.f32.mxu1 %vm4818_vm3, %v6764_v2  ;;  %4276 = vmatprep.mubr.msk.f32.mxu0 %vm4818_vm3, %v6764_v2 }
 0x233   :  { %3956 = vmatmul.mubr.f32.gmra.mrb[36].mxu1 %v6808_v41  ;;  %4277 = vmatmul.mubr.f32.gmra.mrb[36].mxu0 %v6162_v49  ;;  %v6622_v49 = vld [vmem:[%s6715_s3 + $0x1] ss:$0 sm:$0xff] }
 0x234   :  { %3958 = vmatprep.mubr.msk.f32.mxu1 %vm4818_vm3, %v6764_v2  ;;  %4279 = vmatprep.mubr.msk.f32.mxu0 %vm4818_vm3, %v6764_v2  ;;  %v2982_v0 = vmul.f32 %v6622_v49, %v2953_v40  ;;  %v2984_v42 = vmul.f32 %v6622_v49, %v2955_v57  ;;  %v2985_v15 = vmul.f32 %v6622_v49, %v2956_v6  ;;  %v2905_v40 = vld [vmem:[#allocation5 + $0x30] sm:$0xff] }
 0x237   :  { %3959 = vmatmul.mubr.f32.gmra.mrb[38].mxu1 %v6809_v58  ;;  %4280 = vmatmul.mubr.f32.gmra.mrb[38].mxu0 %v6169_v13 }
 0x238   :  { %3961 = vmatprep.mubr.msk.f32.mxu1 %vm4818_vm3, %v6764_v2  ;;  %4282 = vmatprep.mubr.msk.f32.mxu0 %vm4818_vm3, %v6764_v2 }
 0x23b   :  { %3962 = vmatmul.mubr.f32.gmra.mrb[40].mxu1 %v6810_v54  ;;  %4283 = vmatmul.mubr.f32.gmra.mrb[40].mxu0 %v6184_v18  ;;  %v2954_v18 = vld [vmem:[#allocation7 + $0x8] sm:$0xff] }
 0x23c   :  { %3964 = vmatprep.mubr.msk.f32.mxu1 %vm4818_vm3, %v6764_v2  ;;  %4285 = vmatprep.mubr.msk.f32.mxu0 %vm4818_vm3, %v6764_v2  ;;  %v2983_v34 = vmul.f32 %v6622_v49, %v2954_v18 }
 0x23f   :  { %3965 = vmatmul.mubr.f32.gmra.mrb[42].mxu1 %v6208_v1  ;;  %4286 = vmatmul.mubr.f32.gmra.mrb[42].mxu0 %v6789_v50 }
 0x240   :  { %3967 = vmatprep.mubr.msk.f32.mxu1 %vm4818_vm3, %v6764_v2  ;;  %4288 = vmatprep.mubr.msk.f32.mxu0 %vm4818_vm3, %v6764_v2 }
 0x243   :  { %3968 = vmatmul.mubr.f32.gmra.mrb[44].mxu1 %v6215_v20  ;;  %4289 = vmatmul.mubr.f32.gmra.mrb[44].mxu0 %v6203_v4  ;;  %v2895_v20 = vld [vmem:[%s6715_s3] sm:$0x1]  ;;  %v2897_v4 = vld [vmem:[%s6715_s3 + $0x2] sm:$0x1] }
 0x244   :  { %3970 = vmatprep.mubr.msk.f32.mxu1 %vm4818_vm3, %v6764_v2  ;;  %4291 = vmatprep.mubr.msk.f32.mxu0 %vm4818_vm3, %v6764_v2  ;;  %v3007_v16 = vmul.f32 %v2897_v4, %v2895_v20  ;;  %v6613_v28 = vrot.slane %v2895_v20, %v2926_v12  ;;  %v2904_v4 = vld [vmem:[#allocation5 + $0x28] sm:$0xff] }
 0x246   :  { %v6615_v14 = vrot.slane %v3007_v16, %v2926_v12  ;;  %v2928_v52 = vmul.f32 %v6613_v28, %v2899_v17  ;;  %v2929_v26 = vmul.f32 %v6613_v28, %v2900_v11  ;;  %v2930_v43 = vmul.f32 %v6613_v28, %v2901_v59  ;;  %v2958_v17 = vld [vmem:[#allocation7 + $0x28] sm:$0xff] }
 0x247   :  { %3971 = vmatmul.mubr.f32.gmra.mrb[46].mxu1 %v6228_v31  ;;  %4292 = vmatmul.mubr.f32.gmra.mrb[46].mxu0 %v6219_v39  ;;  %v2931_v35 = vmul.f32 %v6613_v28, %v2902_v36  ;;  %v2932_v58 = vmul.f32 %v6613_v28, %v2903_v62  ;;  %v2986_v12 = vmul.f32 %v6622_v49, %v2957_v37 }
 0x248   :  { %3973 = vmatprep.mubr.msk.f32.mxu1 %vm4818_vm3, %v6764_v2  ;;  %4294 = vmatprep.mubr.msk.f32.mxu0 %vm4818_vm3, %v6764_v2  ;;  %v2933_v11 = vmul.f32 %v6613_v28, %v2904_v4 }
 0x24b   :  { %3974 = vmatmul.mubr.f32.gmra.mrb[48].mxu1 %v6239_v56  ;;  %4295 = vmatmul.mubr.f32.gmra.mrb[48].mxu0 %v6230_v61 }
 0x2be   :  { %v1948_v2 = vpop.f32.mrb[0].mxu1  ;;  %v2747_v33 = vpop.f32.mrb[0].mxu0 }
 0x2bf   :  { %v4441_v29 = vadd.f32 %v2747_v33, %v1948_v2  ;;  %v3903_v13 = vpop.f32.mrb[1].mxu1  ;;  %v4224_v23 = vpop.f32.mrb[1].mxu0 }
 0x2c1   :  { %v3012_v47 = vmul.f32 %v4441_v29, %v6615_v14 }
 0x2c2   :  { %v1955_v39 = vpop.f32.mrb[2].mxu1  ;;  %v2753_v44 = vpop.f32.mrb[2].mxu0 }
 0x2c3   :  { %v4442_v1 = vadd.f32 %v2753_v44, %v1955_v39  ;;  %v3906_v31 = vpop.f32.mrb[3].mxu1  ;;  %v4227_v61 = vpop.f32.mrb[3].mxu0  ;;  %v3037_v56 = vadd.f32 %v3012_v47, %v2928_v52  ;;  %v2987_v44 = vmul.f32 %v6622_v49, %v2958_v17 }
 0x2c4   :  { %v2959_v31 = vld [vmem:[#allocation7 + $0x30] sm:$0xff] }
 0x2c5   :  { %v3013_v8 = vmul.f32 %v4442_v1, %v6615_v14  ;;  %v3062_v3 = vmul.f32 %v3037_v56, %v2982_v0  ;;  %v2934_v56 = vmul.f32 %v6613_v28, %v2905_v40  ;;  %v2988_v57 = vmul.f32 %v6622_v49, %v2959_v31 }
 0x2c6   :  { %v1962_v19 = vpop.f32.mrb[4].mxu1  ;;  %v2759_v25 = vpop.f32.mrb[4].mxu0 }
 0x2c7   :  { %v3038_v63 = vadd.f32 %v3013_v8, %v2929_v26  ;;  %v4443_v22 = vadd.f32 %v2759_v25, %v1962_v19  ;;  %v3909_v46 = vpop.f32.mrb[5].mxu1  ;;  %v4230_v48 = vpop.f32.mrb[5].mxu0  ;;  %v2906_v19 = vld [vmem:[#allocation5 + $0x38] sm:$0xff] }
 0x2c8   :  { %v2960_v46 = vld [vmem:[#allocation7 + $0x38] sm:$0xff] }
 0x2c9   :  { %v3063_v45 = vmul.f32 %v3038_v63, %v2983_v34  ;;  %v3014_v50 = vmul.f32 %v4443_v22, %v6615_v14  ;;  %v2989_v6 = vmul.f32 %v6622_v49, %v2960_v46 }
 0x2ca   :  { %v1969_v5 = vpop.f32.mrb[6].mxu1  ;;  %v2765_v51 = vpop.f32.mrb[6].mxu0 }
 0x2cb   :  { %v3087_v7 = vadd.f32 %v3063_v45, %v3062_v3  ;;  %v3039_v53 = vadd.f32 %v3014_v50, %v2930_v43  ;;  %v4444_v60 = vadd.f32 %v2765_v51, %v1969_v5  ;;  %v3912_v27 = vpop.f32.mrb[7].mxu1  ;;  %v4233_v9 = vpop.f32.mrb[7].mxu0  ;;  %v2935_v45 = vmul.f32 %v6613_v28, %v2906_v19  ;;  %v2907_v5 = vld [vmem:[#allocation5 + $0x40] sm:$0xff] }
 0x2cd   :  { %v3064_v38 = vmul.f32 %v3039_v53, %v2984_v42  ;;  %v3015_v10 = vmul.f32 %v4444_v60, %v6615_v14 }
 0x2ce   :  { %v1976_v55 = vpop.f32.mrb[8].mxu1  ;;  %v2771_v24 = vpop.f32.mrb[8].mxu0 }
 0x2cf   :  { %v3088_v21 = vadd.f32 %v3087_v7, %v3064_v38  ;;  %v3040_v32 = vadd.f32 %v3015_v10, %v2931_v35  ;;  %v4445_v41 = vadd.f32 %v2771_v24, %v1976_v55  ;;  %v3915_v54 = vpop.f32.mrb[9].mxu1  ;;  %v4236_v20 = vpop.f32.mrb[9].mxu0  ;;  %v2961_v35 = vld [vmem:[#allocation7 + $0x40] sm:$0xff]  ;;  %v2936_v38 = vmul.f32 %v6613_v28, %v2907_v5 }
 0x2d0   :  { %v2908_v55 = vld [vmem:[#allocation5 + $0x48] sm:$0xff]  ;;  %v2990_v37 = vmul.f32 %v6622_v49, %v2961_v35 }
 0x2d1   :  { %v3065_v30 = vmul.f32 %v3040_v32, %v2985_v15  ;;  %v3016_v16 = vmul.f32 %v4445_v41, %v6615_v14 }
 0x2d2   :  { %v1983_v2 = vpop.f32.mrb[10].mxu1  ;;  %v2777_v33 = vpop.f32.mrb[10].mxu0 }
 0x2d3   :  { %v3089_v29 = vadd.f32 %v3088_v21, %v3065_v30  ;;  %v3041_v13 = vadd.f32 %v3016_v16, %v2932_v58  ;;  %v4446_v23 = vadd.f32 %v2777_v33, %v1983_v2  ;;  %v3918_v52 = vpop.f32.mrb[11].mxu1  ;;  %v4239_v47 = vpop.f32.mrb[11].mxu0  ;;  %v2962_v58 = vld [vmem:[#allocation7 + $0x48] sm:$0xff]  ;;  %v2937_v30 = vmul.f32 %v6613_v28, %v2908_v55 }
 0x2d4   :  { %v2909_v2 = vld [vmem:[#allocation5 + $0x50] sm:$0xff]  ;;  %v2991_v17 = vmul.f32 %v6622_v49, %v2962_v58 }
 0x2d5   :  { %v3066_v39 = vmul.f32 %v3041_v13, %v2986_v12  ;;  %v3017_v18 = vmul.f32 %v4446_v23, %v6615_v14 }
 0x2d6   :  { %v1990_v1 = vpop.f32.mrb[12].mxu1  ;;  %v2783_v26 = vpop.f32.mrb[12].mxu0 }
 0x2d7   :  { %v3090_v61 = vadd.f32 %v3089_v29, %v3066_v39  ;;  %v3042_v59 = vadd.f32 %v3017_v18, %v2933_v11  ;;  %v4447_v0 = vadd.f32 %v2783_v26, %v1990_v1  ;;  %v3921_v34 = vpop.f32.mrb[13].mxu1  ;;  %v4242_v8 = vpop.f32.mrb[13].mxu0  ;;  %v2963_v11 = vld [vmem:[#allocation7 + $0x50] sm:$0xff]  ;;  %v2938_v39 = vmul.f32 %v6613_v28, %v2909_v2 }
 0x2d8   :  { %v2910_v1 = vld [vmem:[#allocation5 + $0x58] sm:$0xff]  ;;  %v2992_v31 = vmul.f32 %v6622_v49, %v2963_v11 }
 0x2d9   :  { %v3067_v25 = vmul.f32 %v3042_v59, %v2987_v44  ;;  %v3018_v63 = vmul.f32 %v4447_v0, %v6615_v14 }
 0x2da   :  { %v1997_v22 = vpop.f32.mrb[14].mxu1  ;;  %v2789_v43 = vpop.f32.mrb[14].mxu0 }
 0x2db   :  { %v3091_v48 = vadd.f32 %v3090_v61, %v3067_v25  ;;  %v3043_v36 = vadd.f32 %v3018_v63, %v2934_v56  ;;  %v4448_v3 = vadd.f32 %v2789_v43, %v1997_v22  ;;  %v3924_v42 = vpop.f32.mrb[15].mxu1  ;;  %v4245_v50 = vpop.f32.mrb[15].mxu0  ;;  %v2964_v56 = vld [vmem:[#allocation7 + $0x58] sm:$0xff]  ;;  %v2939_v25 = vmul.f32 %v6613_v28, %v2910_v1 }
 0x2dc   :  { %v2911_v22 = vld [vmem:[#allocation5 + $0x60] sm:$0xff]  ;;  %v2993_v46 = vmul.f32 %v6622_v49, %v2964_v56 }
 0x2dd   :  { %v3068_v51 = vmul.f32 %v3043_v36, %v2988_v57  ;;  %v3019_v7 = vmul.f32 %v4448_v3, %v6615_v14 }
 0x2de   :  { %v2004_v53 = vpop.f32.mrb[16].mxu1  ;;  %v2795_v60 = vpop.f32.mrb[16].mxu0 }
 0x2df   :  { %v3092_v27 = vadd.f32 %v3091_v48, %v3068_v51  ;;  %v3044_v9 = vadd.f32 %v3019_v7, %v2935_v45  ;;  %v4449_v62 = vadd.f32 %v2795_v60, %v2004_v53  ;;  %v3927_v15 = vpop.f32.mrb[17].mxu1  ;;  %v4248_v10 = vpop.f32.mrb[17].mxu0  ;;  %v2965_v45 = vld [vmem:[#allocation7 + $0x60] sm:$0xff]  ;;  %v2940_v51 = vmul.f32 %v6613_v28, %v2911_v22 }
 0x2e0   :  { %v2912_v53 = vld [vmem:[#allocation5 + $0x68] sm:$0xff]  ;;  %v2994_v35 = vmul.f32 %v6622_v49, %v2965_v45 }
 0x2e1   :  { %v3069_v24 = vmul.f32 %v3044_v9, %v2989_v6  ;;  %v3020_v21 = vmul.f32 %v4449_v62, %v6615_v14 }
 0x2e2   :  { %v2011_v32 = vpop.f32.mrb[18].mxu1  ;;  %v2801_v41 = vpop.f32.mrb[18].mxu0 }
 0x2e3   :  { %v3093_v54 = vadd.f32 %v3092_v27, %v3069_v24  ;;  %v3045_v20 = vadd.f32 %v3020_v21, %v2936_v38  ;;  %v4450_v4 = vadd.f32 %v2801_v41, %v2011_v32  ;;  %v3930_v12 = vpop.f32.mrb[19].mxu1  ;;  %v4251_v16 = vpop.f32.mrb[19].mxu0  ;;  %v2966_v38 = vld [vmem:[#allocation7 + $0x68] sm:$0xff]  ;;  %v2941_v24 = vmul.f32 %v6613_v28, %v2912_v53 }
 0x2e4   :  { %v2913_v32 = vld [vmem:[#allocation5 + $0x70] sm:$0xff]  ;;  %v2995_v58 = vmul.f32 %v6622_v49, %v2966_v38 }
 0x2e5   :  { %v3070_v33 = vmul.f32 %v3045_v20, %v2990_v37  ;;  %v3021_v29 = vmul.f32 %v4450_v4, %v6615_v14 }
 0x2e6   :  { %v2018_v13 = vpop.f32.mrb[20].mxu1  ;;  %v2807_v23 = vpop.f32.mrb[20].mxu0 }
 0x2e7   :  { %v3094_v52 = vadd.f32 %v3093_v54, %v3070_v33  ;;  %v3046_v47 = vadd.f32 %v3021_v29, %v2937_v30  ;;  %v4451_v40 = vadd.f32 %v2807_v23, %v2018_v13  ;;  %v3933_v44 = vpop.f32.mrb[21].mxu1  ;;  %v4254_v18 = vpop.f32.mrb[21].mxu0  ;;  %v2967_v30 = vld [vmem:[#allocation7 + $0x70] sm:$0xff]  ;;  %v2942_v33 = vmul.f32 %v6613_v28, %v2913_v32 }
 0x2e8   :  { %v2914_v13 = vld [vmem:[#allocation5 + $0x78] sm:$0xff]  ;;  %v2996_v11 = vmul.f32 %v6622_v49, %v2967_v30 }
 0x2e9   :  { %v3071_v26 = vmul.f32 %v3046_v47, %v2991_v17  ;;  %v3022_v61 = vmul.f32 %v4451_v40, %v6615_v14 }
 0x2ea   :  { %v2025_v59 = vpop.f32.mrb[22].mxu1  ;;  %v2813_v0 = vpop.f32.mrb[22].mxu0 }
 0x2eb   :  { %v3095_v34 = vadd.f32 %v3094_v52, %v3071_v26  ;;  %v3047_v8 = vadd.f32 %v3022_v61, %v2938_v39  ;;  %v4452_v19 = vadd.f32 %v2813_v0, %v2025_v59  ;;  %v3936_v57 = vpop.f32.mrb[23].mxu1  ;;  %v4257_v63 = vpop.f32.mrb[23].mxu0  ;;  %v2968_v39 = vld [vmem:[#allocation7 + $0x78] sm:$0xff]  ;;  %v2943_v26 = vmul.f32 %v6613_v28, %v2914_v13 }
 0x2ec   :  { %v2915_v59 = vld [vmem:[#allocation5 + $0x80] sm:$0xff]  ;;  %v2997_v56 = vmul.f32 %v6622_v49, %v2968_v39 }
 0x2ed   :  { %v3072_v43 = vmul.f32 %v3047_v8, %v2992_v31  ;;  %v3023_v48 = vmul.f32 %v4452_v19, %v6615_v14 }
 0x2ee   :  { %v2032_v36 = vpop.f32.mrb[24].mxu1  ;;  %v2819_v3 = vpop.f32.mrb[24].mxu0 }
 0x2ef   :  { %v3096_v42 = vadd.f32 %v3095_v34, %v3072_v43  ;;  %v3048_v50 = vadd.f32 %v3023_v48, %v2939_v25  ;;  %v4453_v5 = vadd.f32 %v2819_v3, %v2032_v36  ;;  %v3939_v6 = vpop.f32.mrb[25].mxu1  ;;  %v4260_v7 = vpop.f32.mrb[25].mxu0  ;;  %v2969_v25 = vld [vmem:[#allocation7 + $0x80] sm:$0xff]  ;;  %v2944_v43 = vmul.f32 %v6613_v28, %v2915_v59 }
 0x2f0   :  { %v2916_v36 = vld [vmem:[#allocation5 + $0x88] sm:$0xff]  ;;  %v2998_v45 = vmul.f32 %v6622_v49, %v2969_v25 }
 0x2f1   :  { %v3073_v60 = vmul.f32 %v3048_v50, %v2993_v46  ;;  %v3024_v27 = vmul.f32 %v4453_v5, %v6615_v14 }
 0x2f2   :  { %v2039_v9 = vpop.f32.mrb[26].mxu1  ;;  %v2825_v62 = vpop.f32.mrb[26].mxu0 }
 0x2f3   :  { %v3097_v15 = vadd.f32 %v3096_v42, %v3073_v60  ;;  %v3049_v10 = vadd.f32 %v3024_v27, %v2940_v51  ;;  %v4454_v55 = vadd.f32 %v2825_v62, %v2039_v9  ;;  %v3942_v37 = vpop.f32.mrb[27].mxu1  ;;  %v4263_v21 = vpop.f32.mrb[27].mxu0  ;;  %v2970_v51 = vld [vmem:[#allocation7 + $0x88] sm:$0xff]  ;;  %v2945_v60 = vmul.f32 %v6613_v28, %v2916_v36 }
 0x2f4   :  { %v2917_v9 = vld [vmem:[#allocation5 + $0x90] sm:$0xff]  ;;  %v2999_v38 = vmul.f32 %v6622_v49, %v2970_v51 }
 0x2f5   :  { %v3074_v41 = vmul.f32 %v3049_v10, %v2994_v35  ;;  %v3025_v54 = vmul.f32 %v4454_v55, %v6615_v14 }
 0x2f6   :  { %v2046_v20 = vpop.f32.mrb[28].mxu1  ;;  %v2831_v4 = vpop.f32.mrb[28].mxu0 }
 0x2f7   :  { %v3098_v12 = vadd.f32 %v3097_v15, %v3074_v41  ;;  %v3050_v16 = vadd.f32 %v3025_v54, %v2941_v24  ;;  %v4455_v2 = vadd.f32 %v2831_v4, %v2046_v20  ;;  %v3945_v17 = vpop.f32.mrb[29].mxu1  ;;  %v4266_v29 = vpop.f32.mrb[29].mxu0  ;;  %v2971_v24 = vld [vmem:[#allocation7 + $0x90] sm:$0xff]  ;;  %v2946_v41 = vmul.f32 %v6613_v28, %v2917_v9 }
 0x2f8   :  { %v2918_v20 = vld [vmem:[#allocation5 + $0x98] sm:$0xff]  ;;  %v3000_v30 = vmul.f32 %v6622_v49, %v2971_v24 }
 0x2f9   :  { %v3075_v23 = vmul.f32 %v3050_v16, %v2995_v58  ;;  %v3026_v52 = vmul.f32 %v4455_v2, %v6615_v14 }
 0x2fa   :  { %v2053_v47 = vpop.f32.mrb[30].mxu1  ;;  %v2837_v40 = vpop.f32.mrb[30].mxu0 }
 0x2fb   :  { %v3099_v44 = vadd.f32 %v3098_v12, %v3075_v23  ;;  %v3051_v18 = vadd.f32 %v3026_v52, %v2942_v33  ;;  %v4456_v1 = vadd.f32 %v2837_v40, %v2053_v47  ;;  %v3948_v31 = vpop.f32.mrb[31].mxu1  ;;  %v4269_v61 = vpop.f32.mrb[31].mxu0  ;;  %v2972_v33 = vld [vmem:[#allocation7 + $0x98] sm:$0xff]  ;;  %v2947_v23 = vmul.f32 %v6613_v28, %v2918_v20 }
 0x2fc   :  { %v2919_v47 = vld [vmem:[#allocation5 + $0xa0] sm:$0xff]  ;;  %v3001_v39 = vmul.f32 %v6622_v49, %v2972_v33 }
 0x2fd   :  { %v3076_v0 = vmul.f32 %v3051_v18, %v2996_v11  ;;  %v3027_v34 = vmul.f32 %v4456_v1, %v6615_v14 }
 0x2fe   :  { %v2060_v8 = vpop.f32.mrb[32].mxu1  ;;  %v2843_v19 = vpop.f32.mrb[32].mxu0 }
 0x2ff   :  { %v3100_v57 = vadd.f32 %v3099_v44, %v3076_v0  ;;  %v3052_v63 = vadd.f32 %v3027_v34, %v2943_v26  ;;  %v4457_v22 = vadd.f32 %v2843_v19, %v2060_v8  ;;  %v3951_v46 = vpop.f32.mrb[33].mxu1  ;;  %v4272_v48 = vpop.f32.mrb[33].mxu0  ;;  %v2973_v26 = vld [vmem:[#allocation7 + $0xa0] sm:$0xff]  ;;  %v2948_v0 = vmul.f32 %v6613_v28, %v2919_v47 }
 0x300   :  { %v2920_v8 = vld [vmem:[#allocation5 + $0xa8] sm:$0xff]  ;;  %v3002_v25 = vmul.f32 %v6622_v49, %v2973_v26 }
 0x301   :  { %v3077_v3 = vmul.f32 %v3052_v63, %v2997_v56  ;;  %v3028_v42 = vmul.f32 %v4457_v22, %v6615_v14 }
 0x302   :  { %v2067_v50 = vpop.f32.mrb[34].mxu1  ;;  %v2849_v5 = vpop.f32.mrb[34].mxu0 }
 0x303   :  { %v3101_v6 = vadd.f32 %v3100_v57, %v3077_v3  ;;  %v3053_v7 = vadd.f32 %v3028_v42, %v2944_v43  ;;  %v4458_v53 = vadd.f32 %v2849_v5, %v2067_v50  ;;  %v3954_v35 = vpop.f32.mrb[35].mxu1  ;;  %v4275_v27 = vpop.f32.mrb[35].mxu0  ;;  %v2974_v43 = vld [vmem:[#allocation7 + $0xa8] sm:$0xff]  ;;  %v2949_v3 = vmul.f32 %v6613_v28, %v2920_v8 }
 0x304   :  { %v2921_v50 = vld [vmem:[#allocation5 + $0xb0] sm:$0xff]  ;;  %v3003_v51 = vmul.f32 %v6622_v49, %v2974_v43 }
 0x305   :  { %v3078_v62 = vmul.f32 %v3053_v7, %v2998_v45  ;;  %v3029_v15 = vmul.f32 %v4458_v53, %v6615_v14 }
 0x306   :  { %v2074_v10 = vpop.f32.mrb[36].mxu1  ;;  %v2855_v55 = vpop.f32.mrb[36].mxu0 }
 0x307   :  { %v3102_v37 = vadd.f32 %v3101_v6, %v3078_v62  ;;  %v3054_v21 = vadd.f32 %v3029_v15, %v2945_v60  ;;  %v4459_v32 = vadd.f32 %v2855_v55, %v2074_v10  ;;  %v3957_v58 = vpop.f32.mrb[37].mxu1  ;;  %v4278_v54 = vpop.f32.mrb[37].mxu0  ;;  %v2975_v60 = vld [vmem:[#allocation7 + $0xb0] sm:$0xff]  ;;  %v2950_v62 = vmul.f32 %v6613_v28, %v2921_v50 }
 0x308   :  { %v2922_v10 = vld [vmem:[#allocation5 + $0xb8] sm:$0xff]  ;;  %v3004_v24 = vmul.f32 %v6622_v49, %v2975_v60 }
 0x309   :  { %v3079_v4 = vmul.f32 %v3054_v21, %v2999_v38  ;;  %v3030_v12 = vmul.f32 %v4459_v32, %v6615_v14 }
 0x30a   :  { %v2081_v16 = vpop.f32.mrb[38].mxu1  ;;  %v2861_v2 = vpop.f32.mrb[38].mxu0 }
 0x30b   :  { %v3103_v17 = vadd.f32 %v3102_v37, %v3079_v4  ;;  %v3055_v29 = vadd.f32 %v3030_v12, %v2946_v41  ;;  %v4460_v13 = vadd.f32 %v2861_v2, %v2081_v16  ;;  %v3960_v11 = vpop.f32.mrb[39].mxu1  ;;  %v4281_v52 = vpop.f32.mrb[39].mxu0  ;;  %v2976_v41 = vld [vmem:[#allocation7 + $0xb8] sm:$0xff]  ;;  %v2951_v4 = vmul.f32 %v6613_v28, %v2922_v10 }
 0x30c   :  { %v2923_v16 = vld [vmem:[#allocation5 + $0xc0] sm:$0xff]  ;;  %v3005_v33 = vmul.f32 %v6622_v49, %v2976_v41 }
 0x30d   :  { %v3080_v40 = vmul.f32 %v3055_v29, %v3000_v30  ;;  %v3031_v44 = vmul.f32 %v4460_v13, %v6615_v14 }
 0x30e   :  { %v2088_v18 = vpop.f32.mrb[40].mxu1  ;;  %v2867_v1 = vpop.f32.mrb[40].mxu0 }
 0x30f   :  { %v3104_v31 = vadd.f32 %v3103_v17, %v3080_v40  ;;  %v3056_v61 = vadd.f32 %v3031_v44, %v2947_v23  ;;  %v4461_v59 = vadd.f32 %v2867_v1, %v2088_v18  ;;  %v3963_v56 = vpop.f32.mrb[41].mxu1  ;;  %v4284_v34 = vpop.f32.mrb[41].mxu0  ;;  %v2977_v23 = vld [vmem:[#allocation7 + $0xc0] sm:$0xff]  ;;  %v2952_v40 = vmul.f32 %v6613_v28, %v2923_v16  ;;  %v2898_v28 = vld [vmem:[%s6715_s3 + $0x3] sm:$0x1] }
 0x310   :  { %v3006_v1 = vmul.f32 %v6622_v49, %v2977_v23 }
 0x311   :  { %v3081_v19 = vmul.f32 %v3056_v61, %v3001_v39  ;;  %v3032_v57 = vmul.f32 %v4461_v59, %v6615_v14 }
 0x312   :  { %v2095_v63 = vpop.f32.mrb[42].mxu1  ;;  %v2873_v22 = vpop.f32.mrb[42].mxu0 }
 0x313   :  { %v3105_v46 = vadd.f32 %v3104_v31, %v3081_v19  ;;  %v3057_v48 = vadd.f32 %v3032_v57, %v2948_v0  ;;  %v4462_v36 = vadd.f32 %v2873_v22, %v2095_v63  ;;  %v3966_v45 = vpop.f32.mrb[43].mxu1  ;;  %v4287_v42 = vpop.f32.mrb[43].mxu0 }
 0x315   :  { %v3082_v5 = vmul.f32 %v3057_v48, %v3002_v25  ;;  %v3033_v6 = vmul.f32 %v4462_v36, %v6615_v14 }
 0x316   :  { %v2102_v7 = vpop.f32.mrb[44].mxu1  ;;  %v2879_v53 = vpop.f32.mrb[44].mxu0 }
 0x317   :  { %v3106_v35 = vadd.f32 %v3105_v46, %v3082_v5  ;;  %v3058_v27 = vadd.f32 %v3033_v6, %v2949_v3  ;;  %v4463_v9 = vadd.f32 %v2879_v53, %v2102_v7  ;;  %v3969_v38 = vpop.f32.mrb[45].mxu1  ;;  %v4290_v15 = vpop.f32.mrb[45].mxu0 }
 0x319   :  { %v3083_v55 = vmul.f32 %v3058_v27, %v3003_v51  ;;  %v3034_v37 = vmul.f32 %v4463_v9, %v6615_v14 }
 0x31a   :  { %v2109_v21 = vpop.f32.mrb[46].mxu1  ;;  %v2885_v32 = vpop.f32.mrb[46].mxu0 }
 0x31b   :  { %v3107_v58 = vadd.f32 %v3106_v35, %v3083_v55  ;;  %v3059_v54 = vadd.f32 %v3034_v37, %v2950_v62  ;;  %v4464_v20 = vadd.f32 %v2885_v32, %v2109_v21  ;;  %v3972_v30 = vpop.f32.mrb[47].mxu1  ;;  %v4293_v12 = vpop.f32.mrb[47].mxu0 }
 0x31d   :  { %v3084_v2 = vmul.f32 %v3059_v54, %v3004_v24  ;;  %v3035_v17 = vmul.f32 %v4464_v20, %v6615_v14 }
 0x31e   :  { %v2116_v29 = vpop.f32.mrb[48].mxu1  ;;  %v2891_v13 = vpop.f32.mrb[48].mxu0 }
 0x31f   :  { %v3108_v11 = vadd.f32 %v3107_v58, %v3084_v2  ;;  %v3060_v52 = vadd.f32 %v3035_v17, %v2951_v4  ;;  %v4465_v47 = vadd.f32 %v2891_v13, %v2116_v29  ;;  %v3975_v39 = vpop.f32.mrb[49].mxu1  ;;  %v4296_v44 = vpop.f32.mrb[49].mxu0 }
 0x321   :  { %v3085_v18 = vmul.f32 %v3060_v52, %v3005_v33  ;;  %v3036_v26 = vmul.f32 %v4465_v47, %v6615_v14 }
 0x323   :  { %v3109_v31 = vadd.f32 %v3108_v11, %v3085_v18  ;;  %v3061_v61 = vadd.f32 %v3036_v26, %v2952_v40 }
 0x325   :  { %v3086_v59 = vmul.f32 %v3061_v61, %v3006_v1 }
 0x327   :  { %v3110_v0 = vadd.f32 %v3109_v31, %v3086_v59 }
 0x329   :  { %v3111_v56 = vrot.slane %v3110_v0, 4 }
 0x32b   :  { %v3112_v34 = vadd.f32 %v3111_v56, %v3110_v0 }
 0x32d   :  { %v3113_v8 = vrot.slane %v3112_v34, 2 }
 0x32f   :  { %v3114_v19 = vadd.f32 %v3113_v8, %v3112_v34 }
 0x331   :  { %v3115_v25 = vrot.slane %v3114_v19, 1 }
 0x333   :  { %v3116_v57 = vadd.f32 %v3115_v25, %v3114_v19 }
 0x335   :  { %v3117_v63 = vadd.f32 %v3116_v57, %v2898_v28 }
 0x337   :  { %3118 = vst [vmem:[#allocation10] sm:$0x1] %v3117_v63 }
 0x338   :  { %4791 = shalt.err (!%p4788_p8)
}
 0x339   :  { %s4792_s28 = scalar_lea.hbm %s6717_s5, 16 }
 0x33a   :  { %p4793_p9 = scmp.ne.s32.totalorder %s6717_s5, %s4792_s28  ;;  %p4796_p10 = scmp.lt.u32.totalorder %s4792_s28, %s6717_s5 }
 0x33c   :  { %p4798_p11 = pnand %p4796_p10, %p4793_p9 }
 0x33e   :  { %4801 = shalt.err (!%p4798_p11)
}
 0x33f   :  { %3128 = dma.vmem_to_hbm [thread:$0]  %s3126_s23, 16, %s6717_s5, [#allocation4]  }
 0x340   :  { %4808 = dma.done.wait [#allocation4], 16  }
 0x341   :  { %4809 = vsyncadd [#allocation4], 4294967280 }
 0x342   :  { %3132 = vsyncpa [#allocation3], 1 }
 0x343   :  { %3133 = vsyncpa [#allocation6], 1 }
 0x344   :  { %3134 = vsyncpa [#allocation9], 1 }
 0x345   :  { %3135 = vsyncpa [#allocation4], 1 }

</bundles_post_ra>
